<compile_context>
chip_gen: v5e
topology: v5e:2x2
jax: 0.10.0
libtpu: 0.0.40
codegen_flags: <defaults>
</compile_context>

<pallas_src>
import functools

import jax
import jax.numpy as jnp
from jax.experimental import pallas as pl
from jax.experimental.pallas import tpu as pltpu


_VMEM_LIMIT = 32 * 1024 * 1024   # conservative scoped-VMEM budget (fits v5e/v6e/v7x)
_TM_MAX = 256                    # row-tile cap, sized for v7x's 64 MiB physical VMEM
_CONV_KS = (5, 11, 23)           # conv_encode2 / conv_encode3 / conv_encode4 kernel sizes


def _row_tile(m):
    # Whole array when small (block == full dim is always legal); otherwise a
    # multiple-of-8 tile so partial edge blocks still satisfy the (8,128) rule.
    return m if m <= _TM_MAX else _TM_MAX


# --------------------------- generic tiled linear ----------------------------

def _linear_kernel(x_ref, w_ref, b_ref, o_ref, acc_ref, *, activation):
    @pl.when(pl.program_id(2) == 0)
    def _():
        acc_ref[...] = jnp.zeros_like(acc_ref)

    acc_ref[...] += jnp.dot(x_ref[...], w_ref[...],
                            preferred_element_type=jnp.float32)

    @pl.when(pl.program_id(2) == pl.num_programs(2) - 1)
    def _():
        y = acc_ref[...] + b_ref[...]
        if activation == "tanh":
            y = jnp.tanh(y)
        o_ref[...] = y.astype(o_ref.dtype)


def pallas_linear(x, w, b, activation=None):
    M, K = x.shape
    K2, N = w.shape
    assert K == K2
    tm = _row_tile(M)
    # K and N are small in this model (<= ~804); keep them as single full,
    # lane-dense blocks (tk == K also keeps the K-accumulation exact).
    tk, tn = K, N
    grid = (pl.cdiv(M, tm), pl.cdiv(N, tn), pl.cdiv(K, tk))
    return pl.pallas_call(
        functools.partial(_linear_kernel, activation=activation),
        out_shape=jax.ShapeDtypeStruct((M, N), jnp.float32),
        grid_spec=pltpu.PrefetchScalarGridSpec(
            num_scalar_prefetch=0,
            grid=grid,
            in_specs=[pl.BlockSpec((tm, tk), lambda i, j, k: (i, k)),
                      pl.BlockSpec((tk, tn), lambda i, j, k: (k, j)),
                      pl.BlockSpec((1, tn), lambda i, j, k: (0, j))],
            out_specs=pl.BlockSpec((tm, tn), lambda i, j, k: (i, j)),
            scratch_shapes=[pltpu.VMEM((tm, tn), jnp.float32)]),
        compiler_params=pltpu.CompilerParams(
            dimension_semantics=("parallel", "parallel", "arbitrary"),
            vmem_limit_bytes=_VMEM_LIMIT),
    )(x, w, b.reshape(1, N))


# --------------------------- fused encoder chain -----------------------------

def _encoder_kernel(x_ref, td_ref, mm_ref,
                    wix_ref, wit_ref, bi_ref,
                    wmx_ref, wmm_ref, bm_ref,
                    wei_ref, wem_ref, be_ref, o_ref):
    # TODO(synk): Interval_encoder / Mask_encoder are external modules not defined in
    # model/UCITR_linear.py; approximated as per-timestep tanh(Linear([inputs, time_delta]))
    # and tanh(Linear([inputs, missing_mask])) with the same output widths (32 and D).
    x, td, mm = x_ref[...], td_ref[...], mm_ref[...]
    h_int = jnp.tanh(
        jnp.dot(x, wix_ref[...], preferred_element_type=jnp.float32)
        + jnp.dot(td, wit_ref[...], preferred_element_type=jnp.float32)
        + bi_ref[...])
    h_msk = jnp.tanh(
        jnp.dot(x, wmx_ref[...], preferred_element_type=jnp.float32)
        + jnp.dot(mm, wmm_ref[...], preferred_element_type=jnp.float32)
        + bm_ref[...])
    # linear_encoder applied to [h_int | h_msk] without materializing the concat.
    o_ref[...] = (jnp.dot(h_int, wei_ref[...], preferred_element_type=jnp.float32)
                  + jnp.dot(h_msk, wem_ref[...], preferred_element_type=jnp.float32)
                  + be_ref[...]).astype(o_ref.dtype)


def pallas_fused_encoder(x, td, mm, p):
    M, D = x.shape
    E = p["b_enc"].shape[0]       # 256
    HI = p["b_int"].shape[0]      # 32
    tm = _row_tile(M)

    def full(shape):
        return pl.BlockSpec(shape, lambda i, _s=shape: (0,) * len(_s))

    def row(n):
        return pl.BlockSpec((tm, n), lambda i: (i, 0))

    return pl.pallas_call(
        _encoder_kernel,
        out_shape=jax.ShapeDtypeStruct((M, E), jnp.float32),
        grid_spec=pltpu.PrefetchScalarGridSpec(
            num_scalar_prefetch=0,
            grid=(pl.cdiv(M, tm),),
            in_specs=[row(D), row(D), row(D),
                      full((D, HI)), full((D, HI)), full((1, HI)),
                      full((D, D)), full((D, D)), full((1, D)),
                      full((HI, E)), full((D, E)), full((1, E))],
            out_specs=pl.BlockSpec((tm, E), lambda i: (i, 0))),
        compiler_params=pltpu.CompilerParams(
            dimension_semantics=("parallel",),
            vmem_limit_bytes=_VMEM_LIMIT),
    )(x, td, mm,
      p["W_int_x"], p["W_int_t"], p["b_int"].reshape(1, HI),
      p["W_msk_x"], p["W_msk_m"], p["b_msk"].reshape(1, D),
      p["W_enc_i"], p["W_enc_m"], p["b_enc"].reshape(1, E))


# --------------------------- fused conv-transposes ---------------------------

def _fused_convT_kernel(x_ref, wT_ref, b_ref, o_ref, *, lin, ks):
    # One grid step per batch row.
    # x block: (1, C, Lin); wT: (sum(ks), C); b: (len(ks),) in SMEM; o block: (1, 1, Ltot)
    x = x_ref[0]                                                   # (C, Lin)
    # Channel reduction on the MXU: taps[k, i] = sum_c w[c, k] * x[c, i]
    taps = jnp.dot(wT_ref[...], x,
                   preferred_element_type=jnp.float32)             # (sum(ks), Lin)
    o_ref[...] = jnp.zeros_like(o_ref)
    kbase, off = 0, 0
    for seg_idx, K in enumerate(ks):                               # static unroll
        for k in range(K):
            o_ref[0, :, off + k: off + k + lin] += taps[kbase + k: kbase + k + 1, :]
        o_ref[0, :, off: off + lin + K - 1] += b_ref[seg_idx]      # scalar bias from SMEM
        kbase += K
        off += lin + K - 1


def pallas_fused_conv_transpose(x, wT, b, ks=_CONV_KS):
    # x: (B, C, Lin) NCL layout; wT: (sum(ks), C); b: (len(ks),)
    # Returns (B, sum(Lin + K - 1)) — the cat of the three single-channel outputs.
    B, C, Lin = x.shape
    Ltot = sum(Lin + K - 1 for K in ks)
    out = pl.pallas_call(
        functools.partial(_fused_convT_kernel, lin=Lin, ks=tuple(ks)),
        out_shape=jax.ShapeDtypeStruct((B, 1, Ltot), jnp.float32),
        grid_spec=pltpu.PrefetchScalarGridSpec(
            num_scalar_prefetch=0,
            grid=(B,),
            in_specs=[pl.BlockSpec((1, C, Lin), lambda bi: (bi, 0, 0)),
                      pl.BlockSpec((sum(ks), C), lambda bi: (0, 0)),
                      pl.BlockSpec(memory_space=pltpu.MemorySpace.SMEM)],
            out_specs=pl.BlockSpec((1, 1, Ltot), lambda bi: (bi, 0, 0))),
        compiler_params=pltpu.CompilerParams(
            dimension_semantics=("parallel",),
            vmem_limit_bytes=_VMEM_LIMIT),
    )(x, wT, b)
    return out.reshape(B, Ltot)


# --------------------------- forward pass ------------------------------------

def ucitr_linear_forward(params, inputs, time_delta, missing_mask, *, predict_timestep):
    B, L, D = inputs.shape
    PT = predict_timestep
    M = B * L

    hidden = pallas_fused_encoder(inputs.reshape(M, D),
                                  time_delta.reshape(M, D),
                                  missing_mask.reshape(M, D),
                                  params).reshape(B, L, 256)

    # ConvTranspose1d consumes NCL = (B, in_channels = L - PT, length = 256)
    hidden_front = hidden[:, :-PT, :]
    cat_hidden = pallas_fused_conv_transpose(hidden_front,
                                             params["W_conv_T"],
                                             params["b_conv"])            # (B, 804)

    total_hidden = pallas_linear(cat_hidden, params["W_emb"], params["b_emb"])  # (B, H)

    # decode: the L Linear(H -> 2D) heads stacked along N in one lane-dense matmul,
    # then the shared Linear(2D -> D).
    hid_dec = pallas_linear(total_hidden, params["W_dec_s"], params["b_dec_s"])  # (B, L*2D)
    output = pallas_linear(hid_dec.reshape(B * L, 2 * D),
                           params["W_out"], params["b_out"]).reshape(B, L, D)

    # pred: the PT Wk heads Linear(H -> 256) stacked along N in one matmul.
    pred = pallas_linear(total_hidden, params["W_k_s"],
                         params["b_k_s"]).reshape(B, PT, 256)

    hidden_back = hidden[:, -PT:, :]
    return total_hidden, output, pred, hidden_back


# --------------------------- pure-JAX reference -------------------------------

def _reference_forward(params, inputs, time_delta, missing_mask, *, predict_timestep):
    B, L, D = inputs.shape
    PT = predict_timestep
    h_int = jnp.tanh(inputs @ params["W_int_x"] + time_delta @ params["W_int_t"]
                     + params["b_int"])
    h_msk = jnp.tanh(inputs @ params["W_msk_x"] + missing_mask @ params["W_msk_m"]
                     + params["b_msk"])
    hidden = (h_int @ params["W_enc_i"] + h_msk @ params["W_enc_m"]
              + params["b_enc"])                                   # (B, L, 256)
    hidden_front = hidden[:, :-PT, :]                              # (B, C, 256)
    Lin = hidden_front.shape[-1]
    outs, kbase = [], 0
    for si, K in enumerate(_CONV_KS):
        w = params["W_conv_T"][kbase:kbase + K].T                  # (C, K)
        taps = jnp.einsum("bci,ck->bik", hidden_front, w)          # (B, Lin, K)
        o = jnp.zeros((B, Lin + K - 1), jnp.float32)
        for k in range(K):
            o = o.at[:, k:k + Lin].add(taps[:, :, k])
        outs.append(o + params["b_conv"][si])
        kbase += K
    cat_hidden = jnp.concatenate(outs, axis=-1)                    # (B, 804)
    total_hidden = cat_hidden @ params["W_emb"] + params["b_emb"]
    hid_dec = total_hidden @ params["W_dec_s"] + params["b_dec_s"]
    output = hid_dec.reshape(B, L, 2 * D) @ params["W_out"] + params["b_out"]
    pred = (total_hidden @ params["W_k_s"] + params["b_k_s"]).reshape(B, PT, 256)
    hidden_back = hidden[:, -PT:, :]
    return total_hidden, output, pred, hidden_back


# --------------------------- parameter init ----------------------------------

def _init_linear(key, fan_in, fan_out):
    kw, kb = jax.random.split(key)
    bound = fan_in ** -0.5
    w = jax.random.uniform(kw, (fan_in, fan_out), jnp.float32, -bound, bound)
    b = jax.random.uniform(kb, (fan_out,), jnp.float32, -bound, bound)
    return w, b


def init_params(key, length, hidden_dim, input_dim, predict_timestep):
    D, H, L, PT = input_dim, hidden_dim, length, predict_timestep
    keys = jax.random.split(key, 10)
    p = {}

    # Interval_encoder / Mask_encoder surrogates (weights pre-split so the fused
    # encoder kernel needs no input concatenation).
    w_int, p["b_int"] = _init_linear(keys[0], 2 * D, 32)
    p["W_int_x"], p["W_int_t"] = w_int[:D], w_int[D:]
    w_msk, p["b_msk"] = _init_linear(keys[1], 2 * D, D)
    p["W_msk_x"], p["W_msk_m"] = w_msk[:D], w_msk[D:]

    # linear_encoder: Linear(32 + D, 256), split into [interval | mask] row blocks.
    w_enc, p["b_enc"] = _init_linear(keys[2], 32 + D, 256)
    p["W_enc_i"], p["W_enc_m"] = w_enc[:32], w_enc[32:]

    p["W_emb"], p["b_emb"] = _init_linear(keys[3], 804, H)       # embedding_linear
    p["W_out"], p["b_out"] = _init_linear(keys[4], 2 * D, D)     # linear_decoder

    # ConvTranspose1d(C = L - PT, 1, K): PyTorch weight (C, 1, K) stored pre-transposed
    # and tap-stacked as (sum(K), C); biases stacked as (3,) scalars (go to SMEM).
    C = L - PT
    wts, bs = [], []
    for K, k in zip(_CONV_KS, jax.random.split(keys[5], len(_CONV_KS))):
        kw, kb = jax.random.split(k)
        bound = (C * K) ** -0.5
        wts.append(jax.random.uniform(kw, (C, K), jnp.float32, -bound, bound).T)
        bs.append(jax.random.uniform(kb, (1,), jnp.float32, -bound, bound))
    p["W_conv_T"] = jnp.concatenate(wts, axis=0)                 # (39, C)
    p["b_conv"] = jnp.concatenate(bs, axis=0)                    # (3,)

    # linear_decode_list: L independent Linear(H, 2D) heads stacked along N.
    dec = [_init_linear(k, H, 2 * D) for k in jax.random.split(keys[6], L)]
    p["W_dec_s"] = jnp.concatenate([w for w, _ in dec], axis=1)  # (H, L*2D)
    p["b_dec_s"] = jnp.concatenate([b for _, b in dec], axis=0)  # (L*2D,)

    # Wk: PT independent Linear(H, 256) heads stacked along N.
    wk = [_init_linear(k, H, 256) for k in jax.random.split(keys[7], PT)]
    p["W_k_s"] = jnp.concatenate([w for w, _ in wk], axis=1)     # (H, PT*256)
    p["b_k_s"] = jnp.concatenate([b for _, b in wk], axis=0)     # (PT*256,)
    return p


# --------------------------- main --------------------------------------------

if __name__ == "__main__":
    B, L, D, H, PT = 2, 8, 4, 32, 2   # batch, length, input_dim, hidden_dim, predict_timestep

    params = init_params(jax.random.PRNGKey(42), L, H, D, PT)

    key = jax.random.PRNGKey(0)
    k1, k2, k3 = jax.random.split(key, 3)
    inputs = jax.random.normal(k1, (B, L, D), jnp.float32)
    time_delta = jax.random.uniform(k2, (B, L, D), dtype=jnp.float32)
    missing_mask = (jax.random.uniform(k3, (B, L, D)) > 0.2).astype(jnp.float32)

    fwd = jax.jit(functools.partial(ucitr_linear_forward, predict_timestep=PT))
    total_hidden, output, pred, hidden_back = fwd(params, inputs, time_delta, missing_mask)
    jax.block_until_ready((total_hidden, output, pred, hidden_back))

    assert total_hidden.shape == (B, H)
    assert output.shape == (B, L, D)
    assert pred.shape == (B, PT, 256)
    assert hidden_back.shape == (B, PT, 256)
    assert all(bool(jnp.all(jnp.isfinite(t)))
               for t in (total_hidden, output, pred, hidden_back))

    # Numerical check against a pure-JAX reference of the same decomposition.
    ref = _reference_forward(params, inputs, time_delta, missing_mask, predict_timestep=PT)
    for got, want in zip((total_hidden, output, pred, hidden_back), ref):
        assert got.shape == want.shape
        assert bool(jnp.allclose(got, want, rtol=1e-3, atol=1e-3))

    print("KERNEL_OK")
</pallas_src>

<mosaic_0001>
module attributes {stable_mosaic.version = 11 : i64} {
  func.func @_encoder_kernel(%arg0: i32, %arg1: memref<16x4xf32, #tpu.memory_space<vmem>>, %arg2: memref<16x4xf32, #tpu.memory_space<vmem>>, %arg3: memref<16x4xf32, #tpu.memory_space<vmem>>, %arg4: memref<4x32xf32, #tpu.memory_space<vmem>>, %arg5: memref<4x32xf32, #tpu.memory_space<vmem>>, %arg6: memref<1x32xf32, #tpu.memory_space<vmem>>, %arg7: memref<4x4xf32, #tpu.memory_space<vmem>>, %arg8: memref<4x4xf32, #tpu.memory_space<vmem>>, %arg9: memref<1x4xf32, #tpu.memory_space<vmem>>, %arg10: memref<32x256xf32, #tpu.memory_space<vmem>>, %arg11: memref<4x256xf32, #tpu.memory_space<vmem>>, %arg12: memref<1x256xf32, #tpu.memory_space<vmem>>, %arg13: memref<16x256xf32, #tpu.memory_space<vmem>>) attributes {dimension_semantics = [#tpu.dimension_semantics<parallel>], iteration_bounds = array<i64: 1>, scalar_prefetch = 0 : i64, scratch_operands = 0 : i64, tpu.core_type = #tpu.core_type<tc>, window_params = [{transform_indices = @transform_0, window_bounds = array<i64: 16, 4>}, {transform_indices = @transform_1, window_bounds = array<i64: 16, 4>}, {transform_indices = @transform_2, window_bounds = array<i64: 16, 4>}, {pipeline_mode = #tpu.pipeline_mode<synchronous>, transform_indices = @transform_3, window_bounds = array<i64: 4, 32>}, {pipeline_mode = #tpu.pipeline_mode<synchronous>, transform_indices = @transform_4, window_bounds = array<i64: 4, 32>}, {pipeline_mode = #tpu.pipeline_mode<synchronous>, transform_indices = @transform_5, window_bounds = array<i64: 1, 32>}, {pipeline_mode = #tpu.pipeline_mode<synchronous>, transform_indices = @transform_6, window_bounds = array<i64: 4, 4>}, {pipeline_mode = #tpu.pipeline_mode<synchronous>, transform_indices = @transform_7, window_bounds = array<i64: 4, 4>}, {pipeline_mode = #tpu.pipeline_mode<synchronous>, transform_indices = @transform_8, window_bounds = array<i64: 1, 4>}, {pipeline_mode = #tpu.pipeline_mode<synchronous>, transform_indices = @transform_9, window_bounds = array<i64: 32, 256>}, {pipeline_mode = #tpu.pipeline_mode<synchronous>, transform_indices = @transform_10, window_bounds = array<i64: 4, 256>}, {pipeline_mode = #tpu.pipeline_mode<synchronous>, transform_indices = @transform_11, window_bounds = array<i64: 1, 256>}, {transform_indices = @transform_12, window_bounds = array<i64: 16, 256>}]} {
    %c0 = arith.constant 0 : index
    %c0_0 = arith.constant 0 : index
    %0 = vector.load %arg1[%c0, %c0_0] : memref<16x4xf32, #tpu.memory_space<vmem>>, vector<16x4xf32>
    %c0_1 = arith.constant 0 : index
    %c0_2 = arith.constant 0 : index
    %1 = vector.load %arg2[%c0_1, %c0_2] : memref<16x4xf32, #tpu.memory_space<vmem>>, vector<16x4xf32>
    %c0_3 = arith.constant 0 : index
    %c0_4 = arith.constant 0 : index
    %2 = vector.load %arg3[%c0_3, %c0_4] : memref<16x4xf32, #tpu.memory_space<vmem>>, vector<16x4xf32>
    %c0_5 = arith.constant 0 : index
    %c0_6 = arith.constant 0 : index
    %3 = vector.load %arg4[%c0_5, %c0_6] : memref<4x32xf32, #tpu.memory_space<vmem>>, vector<4x32xf32>
    %cst = arith.constant dense<0.000000e+00> : vector<16x32xf32>
    %4 = tpu.matmul %0, %3, %cst {dimension_numbers = #tpu.dot_dimension_numbers<[1], [0], [0], [1], [0, 0, 1, 1], [], []>} : vector<16x4xf32>, vector<4x32xf32>, vector<16x32xf32> -> vector<16x32xf32>
    %c0_7 = arith.constant 0 : index
    %c0_8 = arith.constant 0 : index
    %5 = vector.load %arg5[%c0_7, %c0_8] : memref<4x32xf32, #tpu.memory_space<vmem>>, vector<4x32xf32>
    %cst_9 = arith.constant dense<0.000000e+00> : vector<16x32xf32>
    %6 = tpu.matmul %1, %5, %cst_9 {dimension_numbers = #tpu.dot_dimension_numbers<[1], [0], [0], [1], [0, 0, 1, 1], [], []>} : vector<16x4xf32>, vector<4x32xf32>, vector<16x32xf32> -> vector<16x32xf32>
    %7 = arith.addf %4, %6 : vector<16x32xf32>
    %c0_10 = arith.constant 0 : index
    %c0_11 = arith.constant 0 : index
    %8 = vector.load %arg6[%c0_10, %c0_11] : memref<1x32xf32, #tpu.memory_space<vmem>>, vector<1x32xf32>
    %9 = vector.broadcast %8 : vector<1x32xf32> to vector<16x32xf32>
    %10 = arith.addf %7, %9 : vector<16x32xf32>
    %11 = math.tanh %10 : vector<16x32xf32>
    %c0_12 = arith.constant 0 : index
    %c0_13 = arith.constant 0 : index
    %12 = vector.load %arg7[%c0_12, %c0_13] : memref<4x4xf32, #tpu.memory_space<vmem>>, vector<4x4xf32>
    %cst_14 = arith.constant dense<0.000000e+00> : vector<16x4xf32>
    %13 = tpu.matmul %0, %12, %cst_14 {dimension_numbers = #tpu.dot_dimension_numbers<[1], [0], [0], [1], [0, 0, 1, 1], [], []>} : vector<16x4xf32>, vector<4x4xf32>, vector<16x4xf32> -> vector<16x4xf32>
    %c0_15 = arith.constant 0 : index
    %c0_16 = arith.constant 0 : index
    %14 = vector.load %arg8[%c0_15, %c0_16] : memref<4x4xf32, #tpu.memory_space<vmem>>, vector<4x4xf32>
    %cst_17 = arith.constant dense<0.000000e+00> : vector<16x4xf32>
    %15 = tpu.matmul %2, %14, %cst_17 {dimension_numbers = #tpu.dot_dimension_numbers<[1], [0], [0], [1], [0, 0, 1, 1], [], []>} : vector<16x4xf32>, vector<4x4xf32>, vector<16x4xf32> -> vector<16x4xf32>
    %16 = arith.addf %13, %15 : vector<16x4xf32>
    %c0_18 = arith.constant 0 : index
    %c0_19 = arith.constant 0 : index
    %17 = vector.load %arg9[%c0_18, %c0_19] : memref<1x4xf32, #tpu.memory_space<vmem>>, vector<1x4xf32>
    %18 = vector.broadcast %17 : vector<1x4xf32> to vector<16x4xf32>
    %19 = arith.addf %16, %18 : vector<16x4xf32>
    %20 = math.tanh %19 : vector<16x4xf32>
    %c0_20 = arith.constant 0 : index
    %c0_21 = arith.constant 0 : index
    %21 = vector.load %arg10[%c0_20, %c0_21] : memref<32x256xf32, #tpu.memory_space<vmem>>, vector<32x256xf32>
    %cst_22 = arith.constant dense<0.000000e+00> : vector<16x256xf32>
    %22 = tpu.matmul %11, %21, %cst_22 {dimension_numbers = #tpu.dot_dimension_numbers<[1], [0], [0], [1], [0, 0, 1, 1], [], []>} : vector<16x32xf32>, vector<32x256xf32>, vector<16x256xf32> -> vector<16x256xf32>
    %c0_23 = arith.constant 0 : index
    %c0_24 = arith.constant 0 : index
    %23 = vector.load %arg11[%c0_23, %c0_24] : memref<4x256xf32, #tpu.memory_space<vmem>>, vector<4x256xf32>
    %cst_25 = arith.constant dense<0.000000e+00> : vector<16x256xf32>
    %24 = tpu.matmul %20, %23, %cst_25 {dimension_numbers = #tpu.dot_dimension_numbers<[1], [0], [0], [1], [0, 0, 1, 1], [], []>} : vector<16x4xf32>, vector<4x256xf32>, vector<16x256xf32> -> vector<16x256xf32>
    %25 = arith.addf %22, %24 : vector<16x256xf32>
    %c0_26 = arith.constant 0 : index
    %c0_27 = arith.constant 0 : index
    %26 = vector.load %arg12[%c0_26, %c0_27] : memref<1x256xf32, #tpu.memory_space<vmem>>, vector<1x256xf32>
    %27 = vector.broadcast %26 : vector<1x256xf32> to vector<16x256xf32>
    %28 = arith.addf %25, %27 : vector<16x256xf32>
    %c0_28 = arith.constant 0 : index
    %c0_29 = arith.constant 0 : index
    %29 = vector.load %arg13[%c0_28, %c0_29] : memref<16x256xf32, #tpu.memory_space<vmem>>, vector<16x256xf32>
    tpu.vector_store %arg13[%c0_28, %c0_29], %28 {strides = array<i32>} : memref<16x256xf32, #tpu.memory_space<vmem>>, vector<16x256xf32>,
    return
  }
  func.func @transform_0(%arg0: i32) -> (i32, i32) {
    %c0_i32 = arith.constant 0 : i32
    %c0_i32_0 = arith.constant 0 : i32
    return %arg0, %c0_i32 : i32, i32
  }
  func.func @transform_1(%arg0: i32) -> (i32, i32) {
    %c0_i32 = arith.constant 0 : i32
    %c0_i32_0 = arith.constant 0 : i32
    return %arg0, %c0_i32 : i32, i32
  }
  func.func @transform_2(%arg0: i32) -> (i32, i32) {
    %c0_i32 = arith.constant 0 : i32
    %c0_i32_0 = arith.constant 0 : i32
    return %arg0, %c0_i32 : i32, i32
  }
  func.func @transform_3(%arg0: i32) -> (i32, i32) {
    %c0_i32 = arith.constant 0 : i32
    %c0_i32_0 = arith.constant 0 : i32
    %c0_i32_1 = arith.constant 0 : i32
    return %c0_i32, %c0_i32_0 : i32, i32
  }
  func.func @transform_4(%arg0: i32) -> (i32, i32) {
    %c0_i32 = arith.constant 0 : i32
    %c0_i32_0 = arith.constant 0 : i32
    %c0_i32_1 = arith.constant 0 : i32
    return %c0_i32, %c0_i32_0 : i32, i32
  }
  func.func @transform_5(%arg0: i32) -> (i32, i32) {
    %c0_i32 = arith.constant 0 : i32
    %c0_i32_0 = arith.constant 0 : i32
    %c0_i32_1 = arith.constant 0 : i32
    return %c0_i32, %c0_i32_0 : i32, i32
  }
  func.func @transform_6(%arg0: i32) -> (i32, i32) {
    %c0_i32 = arith.constant 0 : i32
    %c0_i32_0 = arith.constant 0 : i32
    %c0_i32_1 = arith.constant 0 : i32
    return %c0_i32, %c0_i32_0 : i32, i32
  }
  func.func @transform_7(%arg0: i32) -> (i32, i32) {
    %c0_i32 = arith.constant 0 : i32
    %c0_i32_0 = arith.constant 0 : i32
    %c0_i32_1 = arith.constant 0 : i32
    return %c0_i32, %c0_i32_0 : i32, i32
  }
  func.func @transform_8(%arg0: i32) -> (i32, i32) {
    %c0_i32 = arith.constant 0 : i32
    %c0_i32_0 = arith.constant 0 : i32
    %c0_i32_1 = arith.constant 0 : i32
    return %c0_i32, %c0_i32_0 : i32, i32
  }
  func.func @transform_9(%arg0: i32) -> (i32, i32) {
    %c0_i32 = arith.constant 0 : i32
    %c0_i32_0 = arith.constant 0 : i32
    %c0_i32_1 = arith.constant 0 : i32
    return %c0_i32, %c0_i32_0 : i32, i32
  }
  func.func @transform_10(%arg0: i32) -> (i32, i32) {
    %c0_i32 = arith.constant 0 : i32
    %c0_i32_0 = arith.constant 0 : i32
    %c0_i32_1 = arith.constant 0 : i32
    return %c0_i32, %c0_i32_0 : i32, i32
  }
  func.func @transform_11(%arg0: i32) -> (i32, i32) {
    %c0_i32 = arith.constant 0 : i32
    %c0_i32_0 = arith.constant 0 : i32
    %c0_i32_1 = arith.constant 0 : i32
    return %c0_i32, %c0_i32_0 : i32, i32
  }
  func.func @transform_12(%arg0: i32) -> (i32, i32) {
    %c0_i32 = arith.constant 0 : i32
    %c0_i32_0 = arith.constant 0 : i32
    return %arg0, %c0_i32 : i32, i32
  }
}

module attributes {stable_mosaic.version = 11 : i64} {
  func.func @_linear_kernel(%arg0: i32, %arg1: i32, %arg2: i32, %arg3: memref<2x804xf32, #tpu.memory_space<vmem>>, %arg4: memref<804x32xf32, #tpu.memory_space<vmem>>, %arg5: memref<1x32xf32, #tpu.memory_space<vmem>>, %arg6: memref<2x32xf32, #tpu.memory_space<vmem>>, %arg7: memref<2x32xf32, #tpu.memory_space<vmem>>) attributes {dimension_semantics = [#tpu.dimension_semantics<parallel>, #tpu.dimension_semantics<parallel>, #tpu.dimension_semantics<arbitrary>], iteration_bounds = array<i64: 1, 1, 1>, scalar_prefetch = 0 : i64, scratch_operands = 1 : i64, tpu.core_type = #tpu.core_type<tc>, window_params = [{transform_indices = @transform_0, window_bounds = array<i64: 2, 804>}, {transform_indices = @transform_1, window_bounds = array<i64: 804, 32>}, {transform_indices = @transform_2, window_bounds = array<i64: 1, 32>}, {transform_indices = @transform_3, window_bounds = array<i64: 2, 32>}]} {
    %c0_i32 = arith.constant 0 : i32
    %0 = arith.cmpi eq, %arg2, %c0_i32 : i32
    %1 = arith.extui %0 : i1 to i32
    %c0_i32_0 = arith.constant 0 : i32
    %2 = arith.cmpi ne, %1, %c0_i32_0 : i32
    scf.if %2 {
      %cst_10 = arith.constant 0.000000e+00 : f32
      %12 = vector.broadcast %cst_10 : f32 to vector<2x32xf32>
      %c0_11 = arith.constant 0 : index
      %c0_12 = arith.constant 0 : index
      %13 = vector.load %arg7[%c0_11, %c0_12] : memref<2x32xf32, #tpu.memory_space<vmem>>, vector<2x32xf32>
      tpu.vector_store %arg7[%c0_11, %c0_12], %12 {strides = array<i32>} : memref<2x32xf32, #tpu.memory_space<vmem>>, vector<2x32xf32>,
    } else {
    }
    %c0 = arith.constant 0 : index
    %c0_1 = arith.constant 0 : index
    %3 = vector.load %arg7[%c0, %c0_1] : memref<2x32xf32, #tpu.memory_space<vmem>>, vector<2x32xf32>
    %c0_2 = arith.constant 0 : index
    %c0_3 = arith.constant 0 : index
    %4 = vector.load %arg3[%c0_2, %c0_3] : memref<2x804xf32, #tpu.memory_space<vmem>>, vector<2x804xf32>
    %c0_4 = arith.constant 0 : index
    %c0_5 = arith.constant 0 : index
    %5 = vector.load %arg4[%c0_4, %c0_5] : memref<804x32xf32, #tpu.memory_space<vmem>>, vector<804x32xf32>
    %cst = arith.constant dense<0.000000e+00> : vector<2x32xf32>
    %6 = tpu.matmul %4, %5, %cst {dimension_numbers = #tpu.dot_dimension_numbers<[1], [0], [0], [1], [0, 0, 1, 1], [], []>} : vector<2x804xf32>, vector<804x32xf32>, vector<2x32xf32> -> vector<2x32xf32>
    %7 = arith.addf %3, %6 : vector<2x32xf32>
    %c0_6 = arith.constant 0 : index
    %c0_7 = arith.constant 0 : index
    %8 = vector.load %arg7[%c0_6, %c0_7] : memref<2x32xf32, #tpu.memory_space<vmem>>, vector<2x32xf32>
    tpu.vector_store %arg7[%c0_6, %c0_7], %7 {strides = array<i32>} : memref<2x32xf32, #tpu.memory_space<vmem>>, vector<2x32xf32>,
    %c0_i32_8 = arith.constant 0 : i32
    %9 = arith.cmpi eq, %arg2, %c0_i32_8 : i32
    %10 = arith.extui %9 : i1 to i32
    %c0_i32_9 = arith.constant 0 : i32
    %11 = arith.cmpi ne, %10, %c0_i32_9 : i32
    scf.if %11 {
      %c0_10 = arith.constant 0 : index
      %c0_11 = arith.constant 0 : index
      %12 = vector.load %arg7[%c0_10, %c0_11] : memref<2x32xf32, #tpu.memory_space<vmem>>, vector<2x32xf32>
      %c0_12 = arith.constant 0 : index
      %c0_13 = arith.constant 0 : index
      %13 = vector.load %arg5[%c0_12, %c0_13] : memref<1x32xf32, #tpu.memory_space<vmem>>, vector<1x32xf32>
      %14 = vector.broadcast %13 : vector<1x32xf32> to vector<2x32xf32>
      %15 = arith.addf %12, %14 : vector<2x32xf32>
      %c0_14 = arith.constant 0 : index
      %c0_15 = arith.constant 0 : index
      %16 = vector.load %arg6[%c0_14, %c0_15] : memref<2x32xf32, #tpu.memory_space<vmem>>, vector<2x32xf32>
      tpu.vector_store %arg6[%c0_14, %c0_15], %15 {strides = array<i32>} : memref<2x32xf32, #tpu.memory_space<vmem>>, vector<2x32xf32>,
    } else {
    }
    return
  }
  func.func @transform_0(%arg0: i32, %arg1: i32, %arg2: i32) -> (i32, i32) {
    %c0_i32 = arith.constant 0 : i32
    return %arg0, %arg2 : i32, i32
  }
  func.func @transform_1(%arg0: i32, %arg1: i32, %arg2: i32) -> (i32, i32) {
    %c0_i32 = arith.constant 0 : i32
    return %arg2, %arg1 : i32, i32
  }
  func.func @transform_2(%arg0: i32, %arg1: i32, %arg2: i32) -> (i32, i32) {
    %c0_i32 = arith.constant 0 : i32
    %c0_i32_0 = arith.constant 0 : i32
    return %c0_i32, %arg1 : i32, i32
  }
  func.func @transform_3(%arg0: i32, %arg1: i32, %arg2: i32) -> (i32, i32) {
    %c0_i32 = arith.constant 0 : i32
    return %arg0, %arg1 : i32, i32
  }
}

module attributes {stable_mosaic.version = 11 : i64} {
  func.func @_fused_convT_kernel(%arg0: i32, %arg1: memref<1x6x256xf32, #tpu.memory_space<vmem>>, %arg2: memref<39x6xf32, #tpu.memory_space<vmem>>, %arg3: memref<3xf32, #tpu.memory_space<smem>>, %arg4: memref<1x1x804xf32, #tpu.memory_space<vmem>>) attributes {dimension_semantics = [#tpu.dimension_semantics<parallel>], iteration_bounds = array<i64: 2>, scalar_prefetch = 0 : i64, scratch_operands = 0 : i64, tpu.core_type = #tpu.core_type<tc>, window_params = [{transform_indices = @transform_0, window_bounds = array<i64: 1, 6, 256>}, {pipeline_mode = #tpu.pipeline_mode<synchronous>, transform_indices = @transform_1, window_bounds = array<i64: 39, 6>}, {transform_indices = @transform_2, window_bounds = array<i64: 3>}, {transform_indices = @transform_3, window_bounds = array<i64: 1, 1, 804>}]} {
    %c0 = arith.constant 0 : index
    %c0_0 = arith.constant 0 : index
    %c0_1 = arith.constant 0 : index
    %0 = vector.load %arg1[%c0, %c0_0, %c0_1] : memref<1x6x256xf32, #tpu.memory_space<vmem>>, vector<1x6x256xf32>
    %1 = vector.shape_cast %0 : vector<1x6x256xf32> to vector<6x256xf32>
    %c0_2 = arith.constant 0 : index
    %c0_3 = arith.constant 0 : index
    %2 = vector.load %arg2[%c0_2, %c0_3] : memref<39x6xf32, #tpu.memory_space<vmem>>, vector<39x6xf32>
    %cst = arith.constant dense<0.000000e+00> : vector<39x256xf32>
    %3 = tpu.matmul %2, %1, %cst {dimension_numbers = #tpu.dot_dimension_numbers<[1], [0], [0], [1], [0, 0, 1, 1], [], []>} : vector<39x6xf32>, vector<6x256xf32>, vector<39x256xf32> -> vector<39x256xf32>
    %cst_4 = arith.constant 0.000000e+00 : f32
    %4 = vector.broadcast %cst_4 : f32 to vector<1x1x804xf32>
    %c0_5 = arith.constant 0 : index
    %c0_6 = arith.constant 0 : index
    %c0_7 = arith.constant 0 : index
    %5 = vector.load %arg4[%c0_5, %c0_6, %c0_7] : memref<1x1x804xf32, #tpu.memory_space<vmem>>, vector<1x1x804xf32>
    tpu.vector_store %arg4[%c0_5, %c0_6, %c0_7], %4 {strides = array<i32>} : memref<1x1x804xf32, #tpu.memory_space<vmem>>, vector<1x1x804xf32>,
    %c0_8 = arith.constant 0 : index
    %c0_9 = arith.constant 0 : index
    %c0_10 = arith.constant 0 : index
    %6 = vector.load %arg4[%c0_8, %c0_9, %c0_10] : memref<1x1x804xf32, #tpu.memory_space<vmem>>, vector<1x1x256xf32>
    %7 = vector.shape_cast %6 : vector<1x1x256xf32> to vector<1x256xf32>
    %8 = vector.extract_strided_slice %3 {offsets = [0, 0], sizes = [1, 256], strides = [1, 1]} : vector<39x256xf32> to vector<1x256xf32>
    %9 = arith.addf %7, %8 : vector<1x256xf32>
    %c0_11 = arith.constant 0 : index
    %c0_12 = arith.constant 0 : index
    %c0_13 = arith.constant 0 : index
    %10 = vector.load %arg4[%c0_11, %c0_12, %c0_13] : memref<1x1x804xf32, #tpu.memory_space<vmem>>, vector<1x1x256xf32>
    %11 = vector.shape_cast %10 : vector<1x1x256xf32> to vector<1x256xf32>
    %12 = vector.shape_cast %9 : vector<1x256xf32> to vector<1x1x256xf32>
    tpu.vector_store %arg4[%c0_11, %c0_12, %c0_13], %12 {strides = array<i32>} : memref<1x1x804xf32, #tpu.memory_space<vmem>>, vector<1x1x256xf32>,
    %c0_14 = arith.constant 0 : index
    %c0_15 = arith.constant 0 : index
    %c1 = arith.constant 1 : index
    %13 = vector.load %arg4[%c0_14, %c0_15, %c1] : memref<1x1x804xf32, #tpu.memory_space<vmem>>, vector<1x1x256xf32>
    %14 = vector.shape_cast %13 : vector<1x1x256xf32> to vector<1x256xf32>
    %15 = vector.extract_strided_slice %3 {offsets = [1, 0], sizes = [1, 256], strides = [1, 1]} : vector<39x256xf32> to vector<1x256xf32>
    %16 = arith.addf %14, %15 : vector<1x256xf32>
    %c0_16 = arith.constant 0 : index
    %c0_17 = arith.constant 0 : index
    %c1_18 = arith.constant 1 : index
    %17 = vector.load %arg4[%c0_16, %c0_17, %c1_18] : memref<1x1x804xf32, #tpu.memory_space<vmem>>, vector<1x1x256xf32>
    %18 = vector.shape_cast %17 : vector<1x1x256xf32> to vector<1x256xf32>
    %19 = vector.shape_cast %16 : vector<1x256xf32> to vector<1x1x256xf32>
    tpu.vector_store %arg4[%c0_16, %c0_17, %c1_18], %19 {strides = array<i32>} : memref<1x1x804xf32, #tpu.memory_space<vmem>>, vector<1x1x256xf32>,
    %c0_19 = arith.constant 0 : index
    %c0_20 = arith.constant 0 : index
    %c2 = arith.constant 2 : index
    %20 = vector.load %arg4[%c0_19, %c0_20, %c2] : memref<1x1x804xf32, #tpu.memory_space<vmem>>, vector<1x1x256xf32>
    %21 = vector.shape_cast %20 : vector<1x1x256xf32> to vector<1x256xf32>
    %22 = vector.extract_strided_slice %3 {offsets = [2, 0], sizes = [1, 256], strides = [1, 1]} : vector<39x256xf32> to vector<1x256xf32>
    %23 = arith.addf %21, %22 : vector<1x256xf32>
    %c0_21 = arith.constant 0 : index
    %c0_22 = arith.constant 0 : index
    %c2_23 = arith.constant 2 : index
    %24 = vector.load %arg4[%c0_21, %c0_22, %c2_23] : memref<1x1x804xf32, #tpu.memory_space<vmem>>, vector<1x1x256xf32>
    %25 = vector.shape_cast %24 : vector<1x1x256xf32> to vector<1x256xf32>
    %26 = vector.shape_cast %23 : vector<1x256xf32> to vector<1x1x256xf32>
    tpu.vector_store %arg4[%c0_21, %c0_22, %c2_23], %26 {strides = array<i32>} : memref<1x1x804xf32, #tpu.memory_space<vmem>>, vector<1x1x256xf32>,
    %c0_24 = arith.constant 0 : index
    %c0_25 = arith.constant 0 : index
    %c3 = arith.constant 3 : index
    %27 = vector.load %arg4[%c0_24, %c0_25, %c3] : memref<1x1x804xf32, #tpu.memory_space<vmem>>, vector<1x1x256xf32>
    %28 = vector.shape_cast %27 : vector<1x1x256xf32> to vector<1x256xf32>
    %29 = vector.extract_strided_slice %3 {offsets = [3, 0], sizes = [1, 256], strides = [1, 1]} : vector<39x256xf32> to vector<1x256xf32>
    %30 = arith.addf %28, %29 : vector<1x256xf32>
    %c0_26 = arith.constant 0 : index
    %c0_27 = arith.constant 0 : index
    %c3_28 = arith.constant 3 : index
    %31 = vector.load %arg4[%c0_26, %c0_27, %c3_28] : memref<1x1x804xf32, #tpu.memory_space<vmem>>, vector<1x1x256xf32>
    %32 = vector.shape_cast %31 : vector<1x1x256xf32> to vector<1x256xf32>
    %33 = vector.shape_cast %30 : vector<1x256xf32> to vector<1x1x256xf32>
    tpu.vector_store %arg4[%c0_26, %c0_27, %c3_28], %33 {strides = array<i32>} : memref<1x1x804xf32, #tpu.memory_space<vmem>>, vector<1x1x256xf32>,
    %c0_29 = arith.constant 0 : index
    %c0_30 = arith.constant 0 : index
    %c4 = arith.constant 4 : index
    %34 = vector.load %arg4[%c0_29, %c0_30, %c4] : memref<1x1x804xf32, #tpu.memory_space<vmem>>, vector<1x1x256xf32>
    %35 = vector.shape_cast %34 : vector<1x1x256xf32> to vector<1x256xf32>
    %36 = vector.extract_strided_slice %3 {offsets = [4, 0], sizes = [1, 256], strides = [1, 1]} : vector<39x256xf32> to vector<1x256xf32>
    %37 = arith.addf %35, %36 : vector<1x256xf32>
    %c0_31 = arith.constant 0 : index
    %c0_32 = arith.constant 0 : index
    %c4_33 = arith.constant 4 : index
    %38 = vector.load %arg4[%c0_31, %c0_32, %c4_33] : memref<1x1x804xf32, #tpu.memory_space<vmem>>, vector<1x1x256xf32>
    %39 = vector.shape_cast %38 : vector<1x1x256xf32> to vector<1x256xf32>
    %40 = vector.shape_cast %37 : vector<1x256xf32> to vector<1x1x256xf32>
    tpu.vector_store %arg4[%c0_31, %c0_32, %c4_33], %40 {strides = array<i32>} : memref<1x1x804xf32, #tpu.memory_space<vmem>>, vector<1x1x256xf32>,
    %c0_34 = arith.constant 0 : index
    %c0_35 = arith.constant 0 : index
    %c0_36 = arith.constant 0 : index
    %41 = vector.load %arg4[%c0_34, %c0_35, %c0_36] : memref<1x1x804xf32, #tpu.memory_space<vmem>>, vector<1x1x260xf32>
    %42 = vector.shape_cast %41 : vector<1x1x260xf32> to vector<1x260xf32>
    %c0_37 = arith.constant 0 : index
    %43 = memref.load %arg3[%c0_37] : memref<3xf32, #tpu.memory_space<smem>>
    %44 = vector.broadcast %43 : f32 to vector<1x260xf32>
    %45 = arith.addf %42, %44 : vector<1x260xf32>
    %c0_38 = arith.constant 0 : index
    %c0_39 = arith.constant 0 : index
    %c0_40 = arith.constant 0 : index
    %46 = vector.load %arg4[%c0_38, %c0_39, %c0_40] : memref<1x1x804xf32, #tpu.memory_space<vmem>>, vector<1x1x260xf32>
    %47 = vector.shape_cast %46 : vector<1x1x260xf32> to vector<1x260xf32>
    %48 = vector.shape_cast %45 : vector<1x260xf32> to vector<1x1x260xf32>
    tpu.vector_store %arg4[%c0_38, %c0_39, %c0_40], %48 {strides = array<i32>} : memref<1x1x804xf32, #tpu.memory_space<vmem>>, vector<1x1x260xf32>,
    %c0_41 = arith.constant 0 : index
    %c0_42 = arith.constant 0 : index
    %c260 = arith.constant 260 : index
    %49 = vector.load %arg4[%c0_41, %c0_42, %c260] : memref<1x1x804xf32, #tpu.memory_space<vmem>>, vector<1x1x256xf32>
    %50 = vector.shape_cast %49 : vector<1x1x256xf32> to vector<1x256xf32>
    %51 = vector.extract_strided_slice %3 {offsets = [5, 0], sizes = [1, 256], strides = [1, 1]} : vector<39x256xf32> to vector<1x256xf32>
    %52 = arith.addf %50, %51 : vector<1x256xf32>
    %c0_43 = arith.constant 0 : index
    %c0_44 = arith.constant 0 : index
    %c260_45 = arith.constant 260 : index
    %53 = vector.load %arg4[%c0_43, %c0_44, %c260_45] : memref<1x1x804xf32, #tpu.memory_space<vmem>>, vector<1x1x256xf32>
    %54 = vector.shape_cast %53 : vector<1x1x256xf32> to vector<1x256xf32>
    %55 = vector.shape_cast %52 : vector<1x256xf32> to vector<1x1x256xf32>
    tpu.vector_store %arg4[%c0_43, %c0_44, %c260_45], %55 {strides = array<i32>} : memref<1x1x804xf32, #tpu.memory_space<vmem>>, vector<1x1x256xf32>,
    %c0_46 = arith.constant 0 : index
    %c0_47 = arith.constant 0 : index
    %c261 = arith.constant 261 : index
    %56 = vector.load %arg4[%c0_46, %c0_47, %c261] : memref<1x1x804xf32, #tpu.memory_space<vmem>>, vector<1x1x256xf32>
    %57 = vector.shape_cast %56 : vector<1x1x256xf32> to vector<1x256xf32>
    %58 = vector.extract_strided_slice %3 {offsets = [6, 0], sizes = [1, 256], strides = [1, 1]} : vector<39x256xf32> to vector<1x256xf32>
    %59 = arith.addf %57, %58 : vector<1x256xf32>
    %c0_48 = arith.constant 0 : index
    %c0_49 = arith.constant 0 : index
    %c261_50 = arith.constant 261 : index
    %60 = vector.load %arg4[%c0_48, %c0_49, %c261_50] : memref<1x1x804xf32, #tpu.memory_space<vmem>>, vector<1x1x256xf32>
    %61 = vector.shape_cast %60 : vector<1x1x256xf32> to vector<1x256xf32>
    %62 = vector.shape_cast %59 : vector<1x256xf32> to vector<1x1x256xf32>
    tpu.vector_store %arg4[%c0_48, %c0_49, %c261_50], %62 {strides = array<i32>} : memref<1x1x804xf32, #tpu.memory_space<vmem>>, vector<1x1x256xf32>,
    %c0_51 = arith.constant 0 : index
    %c0_52 = arith.constant 0 : index
    %c262 = arith.constant 262 : index
    %63 = vector.load %arg4[%c0_51, %c0_52, %c262] : memref<1x1x804xf32, #tpu.memory_space<vmem>>, vector<1x1x256xf32>
    %64 = vector.shape_cast %63 : vector<1x1x256xf32> to vector<1x256xf32>
    %65 = vector.extract_strided_slice %3 {offsets = [7, 0], sizes = [1, 256], strides = [1, 1]} : vector<39x256xf32> to vector<1x256xf32>
    %66 = arith.addf %64, %65 : vector<1x256xf32>
    %c0_53 = arith.constant 0 : index
    %c0_54 = arith.constant 0 : index
    %c262_55 = arith.constant 262 : index
    %67 = vector.load %arg4[%c0_53, %c0_54, %c262_55] : memref<1x1x804xf32, #tpu.memory_space<vmem>>, vector<1x1x256xf32>
    %68 = vector.shape_cast %67 : vector<1x1x256xf32> to vector<1x256xf32>
    %69 = vector.shape_cast %66 : vector<1x256xf32> to vector<1x1x256xf32>
    tpu.vector_store %arg4[%c0_53, %c0_54, %c262_55], %69 {strides = array<i32>} : memref<1x1x804xf32, #tpu.memory_space<vmem>>, vector<1x1x256xf32>,
    %c0_56 = arith.constant 0 : index
    %c0_57 = arith.constant 0 : index
    %c263 = arith.constant 263 : index
    %70 = vector.load %arg4[%c0_56, %c0_57, %c263] : memref<1x1x804xf32, #tpu.memory_space<vmem>>, vector<1x1x256xf32>
    %71 = vector.shape_cast %70 : vector<1x1x256xf32> to vector<1x256xf32>
    %72 = vector.extract_strided_slice %3 {offsets = [8, 0], sizes = [1, 256], strides = [1, 1]} : vector<39x256xf32> to vector<1x256xf32>
    %73 = arith.addf %71, %72 : vector<1x256xf32>
    %c0_58 = arith.constant 0 : index
    %c0_59 = arith.constant 0 : index
    %c263_60 = arith.constant 263 : index
    %74 = vector.load %arg4[%c0_58, %c0_59, %c263_60] : memref<1x1x804xf32, #tpu.memory_space<vmem>>, vector<1x1x256xf32>
    %75 = vector.shape_cast %74 : vector<1x1x256xf32> to vector<1x256xf32>
    %76 = vector.shape_cast %73 : vector<1x256xf32> to vector<1x1x256xf32>
    tpu.vector_store %arg4[%c0_58, %c0_59, %c263_60], %76 {strides = array<i32>} : memref<1x1x804xf32, #tpu.memory_space<vmem>>, vector<1x1x256xf32>,
    %c0_61 = arith.constant 0 : index
    %c0_62 = arith.constant 0 : index
    %c264 = arith.constant 264 : index
    %77 = vector.load %arg4[%c0_61, %c0_62, %c264] : memref<1x1x804xf32, #tpu.memory_space<vmem>>, vector<1x1x256xf32>
    %78 = vector.shape_cast %77 : vector<1x1x256xf32> to vector<1x256xf32>
    %79 = vector.extract_strided_slice %3 {offsets = [9, 0], sizes = [1, 256], strides = [1, 1]} : vector<39x256xf32> to vector<1x256xf32>
    %80 = arith.addf %78, %79 : vector<1x256xf32>
    %c0_63 = arith.constant 0 : index
    %c0_64 = arith.constant 0 : index
    %c264_65 = arith.constant 264 : index
    %81 = vector.load %arg4[%c0_63, %c0_64, %c264_65] : memref<1x1x804xf32, #tpu.memory_space<vmem>>, vector<1x1x256xf32>
    %82 = vector.shape_cast %81 : vector<1x1x256xf32> to vector<1x256xf32>
    %83 = vector.shape_cast %80 : vector<1x256xf32> to vector<1x1x256xf32>
    tpu.vector_store %arg4[%c0_63, %c0_64, %c264_65], %83 {strides = array<i32>} : memref<1x1x804xf32, #tpu.memory_space<vmem>>, vector<1x1x256xf32>,
    %c0_66 = arith.constant 0 : index
    %c0_67 = arith.constant 0 : index
    %c265 = arith.constant 265 : index
    %84 = vector.load %arg4[%c0_66, %c0_67, %c265] : memref<1x1x804xf32, #tpu.memory_space<vmem>>, vector<1x1x256xf32>
    %85 = vector.shape_cast %84 : vector<1x1x256xf32> to vector<1x256xf32>
    %86 = vector.extract_strided_slice %3 {offsets = [10, 0], sizes = [1, 256], strides = [1, 1]} : vector<39x256xf32> to vector<1x256xf32>
    %87 = arith.addf %85, %86 : vector<1x256xf32>
    %c0_68 = arith.constant 0 : index
    %c0_69 = arith.constant 0 : index
    %c265_70 = arith.constant 265 : index
    %88 = vector.load %arg4[%c0_68, %c0_69, %c265_70] : memref<1x1x804xf32, #tpu.memory_space<vmem>>, vector<1x1x256xf32>
    %89 = vector.shape_cast %88 : vector<1x1x256xf32> to vector<1x256xf32>
    %90 = vector.shape_cast %87 : vector<1x256xf32> to vector<1x1x256xf32>
    tpu.vector_store %arg4[%c0_68, %c0_69, %c265_70], %90 {strides = array<i32>} : memref<1x1x804xf32, #tpu.memory_space<vmem>>, vector<1x1x256xf32>,
    %c0_71 = arith.constant 0 : index
    %c0_72 = arith.constant 0 : index
    %c266 = arith.constant 266 : index
    %91 = vector.load %arg4[%c0_71, %c0_72, %c266] : memref<1x1x804xf32, #tpu.memory_space<vmem>>, vector<1x1x256xf32>
    %92 = vector.shape_cast %91 : vector<1x1x256xf32> to vector<1x256xf32>
    %93 = vector.extract_strided_slice %3 {offsets = [11, 0], sizes = [1, 256], strides = [1, 1]} : vector<39x256xf32> to vector<1x256xf32>
    %94 = arith.addf %92, %93 : vector<1x256xf32>
    %c0_73 = arith.constant 0 : index
    %c0_74 = arith.constant 0 : index
    %c266_75 = arith.constant 266 : index
    %95 = vector.load %arg4[%c0_73, %c0_74, %c266_75] : memref<1x1x804xf32, #tpu.memory_space<vmem>>, vector<1x1x256xf32>
    %96 = vector.shape_cast %95 : vector<1x1x256xf32> to vector<1x256xf32>
    %97 = vector.shape_cast %94 : vector<1x256xf32> to vector<1x1x256xf32>
    tpu.vector_store %arg4[%c0_73, %c0_74, %c266_75], %97 {strides = array<i32>} : memref<1x1x804xf32, #tpu.memory_space<vmem>>, vector<1x1x256xf32>,
    %c0_76 = arith.constant 0 : index
    %c0_77 = arith.constant 0 : index
    %c267 = arith.constant 267 : index
    %98 = vector.load %arg4[%c0_76, %c0_77, %c267] : memref<1x1x804xf32, #tpu.memory_space<vmem>>, vector<1x1x256xf32>
    %99 = vector.shape_cast %98 : vector<1x1x256xf32> to vector<1x256xf32>
    %100 = vector.extract_strided_slice %3 {offsets = [12, 0], sizes = [1, 256], strides = [1, 1]} : vector<39x256xf32> to vector<1x256xf32>
    %101 = arith.addf %99, %100 : vector<1x256xf32>
    %c0_78 = arith.constant 0 : index
    %c0_79 = arith.constant 0 : index
    %c267_80 = arith.constant 267 : index
    %102 = vector.load %arg4[%c0_78, %c0_79, %c267_80] : memref<1x1x804xf32, #tpu.memory_space<vmem>>, vector<1x1x256xf32>
    %103 = vector.shape_cast %102 : vector<1x1x256xf32> to vector<1x256xf32>
    %104 = vector.shape_cast %101 : vector<1x256xf32> to vector<1x1x256xf32>
    tpu.vector_store %arg4[%c0_78, %c0_79, %c267_80], %104 {strides = array<i32>} : memref<1x1x804xf32, #tpu.memory_space<vmem>>, vector<1x1x256xf32>,
    %c0_81 = arith.constant 0 : index
    %c0_82 = arith.constant 0 : index
    %c268 = arith.constant 268 : index
    %105 = vector.load %arg4[%c0_81, %c0_82, %c268] : memref<1x1x804xf32, #tpu.memory_space<vmem>>, vector<1x1x256xf32>
    %106 = vector.shape_cast %105 : vector<1x1x256xf32> to vector<1x256xf32>
    %107 = vector.extract_strided_slice %3 {offsets = [13, 0], sizes = [1, 256], strides = [1, 1]} : vector<39x256xf32> to vector<1x256xf32>
    %108 = arith.addf %106, %107 : vector<1x256xf32>
    %c0_83 = arith.constant 0 : index
    %c0_84 = arith.constant 0 : index
    %c268_85 = arith.constant 268 : index
    %109 = vector.load %arg4[%c0_83, %c0_84, %c268_85] : memref<1x1x804xf32, #tpu.memory_space<vmem>>, vector<1x1x256xf32>
    %110 = vector.shape_cast %109 : vector<1x1x256xf32> to vector<1x256xf32>
    %111 = vector.shape_cast %108 : vector<1x256xf32> to vector<1x1x256xf32>
    tpu.vector_store %arg4[%c0_83, %c0_84, %c268_85], %111 {strides = array<i32>} : memref<1x1x804xf32, #tpu.memory_space<vmem>>, vector<1x1x256xf32>,
    %c0_86 = arith.constant 0 : index
    %c0_87 = arith.constant 0 : index
    %c269 = arith.constant 269 : index
    %112 = vector.load %arg4[%c0_86, %c0_87, %c269] : memref<1x1x804xf32, #tpu.memory_space<vmem>>, vector<1x1x256xf32>
    %113 = vector.shape_cast %112 : vector<1x1x256xf32> to vector<1x256xf32>
    %114 = vector.extract_strided_slice %3 {offsets = [14, 0], sizes = [1, 256], strides = [1, 1]} : vector<39x256xf32> to vector<1x256xf32>
    %115 = arith.addf %113, %114 : vector<1x256xf32>
    %c0_88 = arith.constant 0 : index
    %c0_89 = arith.constant 0 : index
    %c269_90 = arith.constant 269 : index
    %116 = vector.load %arg4[%c0_88, %c0_89, %c269_90] : memref<1x1x804xf32, #tpu.memory_space<vmem>>, vector<1x1x256xf32>
    %117 = vector.shape_cast %116 : vector<1x1x256xf32> to vector<1x256xf32>
    %118 = vector.shape_cast %115 : vector<1x256xf32> to vector<1x1x256xf32>
    tpu.vector_store %arg4[%c0_88, %c0_89, %c269_90], %118 {strides = array<i32>} : memref<1x1x804xf32, #tpu.memory_space<vmem>>, vector<1x1x256xf32>,
    %c0_91 = arith.constant 0 : index
    %c0_92 = arith.constant 0 : index
    %c270 = arith.constant 270 : index
    %119 = vector.load %arg4[%c0_91, %c0_92, %c270] : memref<1x1x804xf32, #tpu.memory_space<vmem>>, vector<1x1x256xf32>
    %120 = vector.shape_cast %119 : vector<1x1x256xf32> to vector<1x256xf32>
    %121 = vector.extract_strided_slice %3 {offsets = [15, 0], sizes = [1, 256], strides = [1, 1]} : vector<39x256xf32> to vector<1x256xf32>
    %122 = arith.addf %120, %121 : vector<1x256xf32>
    %c0_93 = arith.constant 0 : index
    %c0_94 = arith.constant 0 : index
    %c270_95 = arith.constant 270 : index
    %123 = vector.load %arg4[%c0_93, %c0_94, %c270_95] : memref<1x1x804xf32, #tpu.memory_space<vmem>>, vector<1x1x256xf32>
    %124 = vector.shape_cast %123 : vector<1x1x256xf32> to vector<1x256xf32>
    %125 = vector.shape_cast %122 : vector<1x256xf32> to vector<1x1x256xf32>
    tpu.vector_store %arg4[%c0_93, %c0_94, %c270_95], %125 {strides = array<i32>} : memref<1x1x804xf32, #tpu.memory_space<vmem>>, vector<1x1x256xf32>,
    %c0_96 = arith.constant 0 : index
    %c0_97 = arith.constant 0 : index
    %c260_98 = arith.constant 260 : index
    %126 = vector.load %arg4[%c0_96, %c0_97, %c260_98] : memref<1x1x804xf32, #tpu.memory_space<vmem>>, vector<1x1x266xf32>
    %127 = vector.shape_cast %126 : vector<1x1x266xf32> to vector<1x266xf32>
    %c1_99 = arith.constant 1 : index
    %128 = memref.load %arg3[%c1_99] : memref<3xf32, #tpu.memory_space<smem>>
    %129 = vector.broadcast %128 : f32 to vector<1x266xf32>
    %130 = arith.addf %127, %129 : vector<1x266xf32>
    %c0_100 = arith.constant 0 : index
    %c0_101 = arith.constant 0 : index
    %c260_102 = arith.constant 260 : index
    %131 = vector.load %arg4[%c0_100, %c0_101, %c260_102] : memref<1x1x804xf32, #tpu.memory_space<vmem>>, vector<1x1x266xf32>
    %132 = vector.shape_cast %131 : vector<1x1x266xf32> to vector<1x266xf32>
    %133 = vector.shape_cast %130 : vector<1x266xf32> to vector<1x1x266xf32>
    tpu.vector_store %arg4[%c0_100, %c0_101, %c260_102], %133 {strides = array<i32>} : memref<1x1x804xf32, #tpu.memory_space<vmem>>, vector<1x1x266xf32>,
    %c0_103 = arith.constant 0 : index
    %c0_104 = arith.constant 0 : index
    %c526 = arith.constant 526 : index
    %134 = vector.load %arg4[%c0_103, %c0_104, %c526] : memref<1x1x804xf32, #tpu.memory_space<vmem>>, vector<1x1x256xf32>
    %135 = vector.shape_cast %134 : vector<1x1x256xf32> to vector<1x256xf32>
    %136 = vector.extract_strided_slice %3 {offsets = [16, 0], sizes = [1, 256], strides = [1, 1]} : vector<39x256xf32> to vector<1x256xf32>
    %137 = arith.addf %135, %136 : vector<1x256xf32>
    %c0_105 = arith.constant 0 : index
    %c0_106 = arith.constant 0 : index
    %c526_107 = arith.constant 526 : index
    %138 = vector.load %arg4[%c0_105, %c0_106, %c526_107] : memref<1x1x804xf32, #tpu.memory_space<vmem>>, vector<1x1x256xf32>
    %139 = vector.shape_cast %138 : vector<1x1x256xf32> to vector<1x256xf32>
    %140 = vector.shape_cast %137 : vector<1x256xf32> to vector<1x1x256xf32>
    tpu.vector_store %arg4[%c0_105, %c0_106, %c526_107], %140 {strides = array<i32>} : memref<1x1x804xf32, #tpu.memory_space<vmem>>, vector<1x1x256xf32>,
    %c0_108 = arith.constant 0 : index
    %c0_109 = arith.constant 0 : index
    %c527 = arith.constant 527 : index
    %141 = vector.load %arg4[%c0_108, %c0_109, %c527] : memref<1x1x804xf32, #tpu.memory_space<vmem>>, vector<1x1x256xf32>
    %142 = vector.shape_cast %141 : vector<1x1x256xf32> to vector<1x256xf32>
    %143 = vector.extract_strided_slice %3 {offsets = [17, 0], sizes = [1, 256], strides = [1, 1]} : vector<39x256xf32> to vector<1x256xf32>
    %144 = arith.addf %142, %143 : vector<1x256xf32>
    %c0_110 = arith.constant 0 : index
    %c0_111 = arith.constant 0 : index
    %c527_112 = arith.constant 527 : index
    %145 = vector.load %arg4[%c0_110, %c0_111, %c527_112] : memref<1x1x804xf32, #tpu.memory_space<vmem>>, vector<1x1x256xf32>
    %146 = vector.shape_cast %145 : vector<1x1x256xf32> to vector<1x256xf32>
    %147 = vector.shape_cast %144 : vector<1x256xf32> to vector<1x1x256xf32>
    tpu.vector_store %arg4[%c0_110, %c0_111, %c527_112], %147 {strides = array<i32>} : memref<1x1x804xf32, #tpu.memory_space<vmem>>, vector<1x1x256xf32>,
    %c0_113 = arith.constant 0 : index
    %c0_114 = arith.constant 0 : index
    %c528 = arith.constant 528 : index
    %148 = vector.load %arg4[%c0_113, %c0_114, %c528] : memref<1x1x804xf32, #tpu.memory_space<vmem>>, vector<1x1x256xf32>
    %149 = vector.shape_cast %148 : vector<1x1x256xf32> to vector<1x256xf32>
    %150 = vector.extract_strided_slice %3 {offsets = [18, 0], sizes = [1, 256], strides = [1, 1]} : vector<39x256xf32> to vector<1x256xf32>
    %151 = arith.addf %149, %150 : vector<1x256xf32>
    %c0_115 = arith.constant 0 : index
    %c0_116 = arith.constant 0 : index
    %c528_117 = arith.constant 528 : index
    %152 = vector.load %arg4[%c0_115, %c0_116, %c528_117] : memref<1x1x804xf32, #tpu.memory_space<vmem>>, vector<1x1x256xf32>
    %153 = vector.shape_cast %152 : vector<1x1x256xf32> to vector<1x256xf32>
    %154 = vector.shape_cast %151 : vector<1x256xf32> to vector<1x1x256xf32>
    tpu.vector_store %arg4[%c0_115, %c0_116, %c528_117], %154 {strides = array<i32>} : memref<1x1x804xf32, #tpu.memory_space<vmem>>, vector<1x1x256xf32>,
    %c0_118 = arith.constant 0 : index
    %c0_119 = arith.constant 0 : index
    %c529 = arith.constant 529 : index
    %155 = vector.load %arg4[%c0_118, %c0_119, %c529] : memref<1x1x804xf32, #tpu.memory_space<vmem>>, vector<1x1x256xf32>
    %156 = vector.shape_cast %155 : vector<1x1x256xf32> to vector<1x256xf32>
    %157 = vector.extract_strided_slice %3 {offsets = [19, 0], sizes = [1, 256], strides = [1, 1]} : vector<39x256xf32> to vector<1x256xf32>
    %158 = arith.addf %156, %157 : vector<1x256xf32>
    %c0_120 = arith.constant 0 : index
    %c0_121 = arith.constant 0 : index
    %c529_122 = arith.constant 529 : index
    %159 = vector.load %arg4[%c0_120, %c0_121, %c529_122] : memref<1x1x804xf32, #tpu.memory_space<vmem>>, vector<1x1x256xf32>
    %160 = vector.shape_cast %159 : vector<1x1x256xf32> to vector<1x256xf32>
    %161 = vector.shape_cast %158 : vector<1x256xf32> to vector<1x1x256xf32>
    tpu.vector_store %arg4[%c0_120, %c0_121, %c529_122], %161 {strides = array<i32>} : memref<1x1x804xf32, #tpu.memory_space<vmem>>, vector<1x1x256xf32>,
    %c0_123 = arith.constant 0 : index
    %c0_124 = arith.constant 0 : index
    %c530 = arith.constant 530 : index
    %162 = vector.load %arg4[%c0_123, %c0_124, %c530] : memref<1x1x804xf32, #tpu.memory_space<vmem>>, vector<1x1x256xf32>
    %163 = vector.shape_cast %162 : vector<1x1x256xf32> to vector<1x256xf32>
    %164 = vector.extract_strided_slice %3 {offsets = [20, 0], sizes = [1, 256], strides = [1, 1]} : vector<39x256xf32> to vector<1x256xf32>
    %165 = arith.addf %163, %164 : vector<1x256xf32>
    %c0_125 = arith.constant 0 : index
    %c0_126 = arith.constant 0 : index
    %c530_127 = arith.constant 530 : index
    %166 = vector.load %arg4[%c0_125, %c0_126, %c530_127] : memref<1x1x804xf32, #tpu.memory_space<vmem>>, vector<1x1x256xf32>
    %167 = vector.shape_cast %166 : vector<1x1x256xf32> to vector<1x256xf32>
    %168 = vector.shape_cast %165 : vector<1x256xf32> to vector<1x1x256xf32>
    tpu.vector_store %arg4[%c0_125, %c0_126, %c530_127], %168 {strides = array<i32>} : memref<1x1x804xf32, #tpu.memory_space<vmem>>, vector<1x1x256xf32>,
    %c0_128 = arith.constant 0 : index
    %c0_129 = arith.constant 0 : index
    %c531 = arith.constant 531 : index
    %169 = vector.load %arg4[%c0_128, %c0_129, %c531] : memref<1x1x804xf32, #tpu.memory_space<vmem>>, vector<1x1x256xf32>
    %170 = vector.shape_cast %169 : vector<1x1x256xf32> to vector<1x256xf32>
    %171 = vector.extract_strided_slice %3 {offsets = [21, 0], sizes = [1, 256], strides = [1, 1]} : vector<39x256xf32> to vector<1x256xf32>
    %172 = arith.addf %170, %171 : vector<1x256xf32>
    %c0_130 = arith.constant 0 : index
    %c0_131 = arith.constant 0 : index
    %c531_132 = arith.constant 531 : index
    %173 = vector.load %arg4[%c0_130, %c0_131, %c531_132] : memref<1x1x804xf32, #tpu.memory_space<vmem>>, vector<1x1x256xf32>
    %174 = vector.shape_cast %173 : vector<1x1x256xf32> to vector<1x256xf32>
    %175 = vector.shape_cast %172 : vector<1x256xf32> to vector<1x1x256xf32>
    tpu.vector_store %arg4[%c0_130, %c0_131, %c531_132], %175 {strides = array<i32>} : memref<1x1x804xf32, #tpu.memory_space<vmem>>, vector<1x1x256xf32>,
    %c0_133 = arith.constant 0 : index
    %c0_134 = arith.constant 0 : index
    %c532 = arith.constant 532 : index
    %176 = vector.load %arg4[%c0_133, %c0_134, %c532] : memref<1x1x804xf32, #tpu.memory_space<vmem>>, vector<1x1x256xf32>
    %177 = vector.shape_cast %176 : vector<1x1x256xf32> to vector<1x256xf32>
    %178 = vector.extract_strided_slice %3 {offsets = [22, 0], sizes = [1, 256], strides = [1, 1]} : vector<39x256xf32> to vector<1x256xf32>
    %179 = arith.addf %177, %178 : vector<1x256xf32>
    %c0_135 = arith.constant 0 : index
    %c0_136 = arith.constant 0 : index
    %c532_137 = arith.constant 532 : index
    %180 = vector.load %arg4[%c0_135, %c0_136, %c532_137] : memref<1x1x804xf32, #tpu.memory_space<vmem>>, vector<1x1x256xf32>
    %181 = vector.shape_cast %180 : vector<1x1x256xf32> to vector<1x256xf32>
    %182 = vector.shape_cast %179 : vector<1x256xf32> to vector<1x1x256xf32>
    tpu.vector_store %arg4[%c0_135, %c0_136, %c532_137], %182 {strides = array<i32>} : memref<1x1x804xf32, #tpu.memory_space<vmem>>, vector<1x1x256xf32>,
    %c0_138 = arith.constant 0 : index
    %c0_139 = arith.constant 0 : index
    %c533 = arith.constant 533 : index
    %183 = vector.load %arg4[%c0_138, %c0_139, %c533] : memref<1x1x804xf32, #tpu.memory_space<vmem>>, vector<1x1x256xf32>
    %184 = vector.shape_cast %183 : vector<1x1x256xf32> to vector<1x256xf32>
    %185 = vector.extract_strided_slice %3 {offsets = [23, 0], sizes = [1, 256], strides = [1, 1]} : vector<39x256xf32> to vector<1x256xf32>
    %186 = arith.addf %184, %185 : vector<1x256xf32>
    %c0_140 = arith.constant 0 : index
    %c0_141 = arith.constant 0 : index
    %c533_142 = arith.constant 533 : index
    %187 = vector.load %arg4[%c0_140, %c0_141, %c533_142] : memref<1x1x804xf32, #tpu.memory_space<vmem>>, vector<1x1x256xf32>
    %188 = vector.shape_cast %187 : vector<1x1x256xf32> to vector<1x256xf32>
    %189 = vector.shape_cast %186 : vector<1x256xf32> to vector<1x1x256xf32>
    tpu.vector_store %arg4[%c0_140, %c0_141, %c533_142], %189 {strides = array<i32>} : memref<1x1x804xf32, #tpu.memory_space<vmem>>, vector<1x1x256xf32>,
    %c0_143 = arith.constant 0 : index
    %c0_144 = arith.constant 0 : index
    %c534 = arith.constant 534 : index
    %190 = vector.load %arg4[%c0_143, %c0_144, %c534] : memref<1x1x804xf32, #tpu.memory_space<vmem>>, vector<1x1x256xf32>
    %191 = vector.shape_cast %190 : vector<1x1x256xf32> to vector<1x256xf32>
    %192 = vector.extract_strided_slice %3 {offsets = [24, 0], sizes = [1, 256], strides = [1, 1]} : vector<39x256xf32> to vector<1x256xf32>
    %193 = arith.addf %191, %192 : vector<1x256xf32>
    %c0_145 = arith.constant 0 : index
    %c0_146 = arith.constant 0 : index
    %c534_147 = arith.constant 534 : index
    %194 = vector.load %arg4[%c0_145, %c0_146, %c534_147] : memref<1x1x804xf32, #tpu.memory_space<vmem>>, vector<1x1x256xf32>
    %195 = vector.shape_cast %194 : vector<1x1x256xf32> to vector<1x256xf32>
    %196 = vector.shape_cast %193 : vector<1x256xf32> to vector<1x1x256xf32>
    tpu.vector_store %arg4[%c0_145, %c0_146, %c534_147], %196 {strides = array<i32>} : memref<1x1x804xf32, #tpu.memory_space<vmem>>, vector<1x1x256xf32>,
    %c0_148 = arith.constant 0 : index
    %c0_149 = arith.constant 0 : index
    %c535 = arith.constant 535 : index
    %197 = vector.load %arg4[%c0_148, %c0_149, %c535] : memref<1x1x804xf32, #tpu.memory_space<vmem>>, vector<1x1x256xf32>
    %198 = vector.shape_cast %197 : vector<1x1x256xf32> to vector<1x256xf32>
    %199 = vector.extract_strided_slice %3 {offsets = [25, 0], sizes = [1, 256], strides = [1, 1]} : vector<39x256xf32> to vector<1x256xf32>
    %200 = arith.addf %198, %199 : vector<1x256xf32>
    %c0_150 = arith.constant 0 : index
    %c0_151 = arith.constant 0 : index
    %c535_152 = arith.constant 535 : index
    %201 = vector.load %arg4[%c0_150, %c0_151, %c535_152] : memref<1x1x804xf32, #tpu.memory_space<vmem>>, vector<1x1x256xf32>
    %202 = vector.shape_cast %201 : vector<1x1x256xf32> to vector<1x256xf32>
    %203 = vector.shape_cast %200 : vector<1x256xf32> to vector<1x1x256xf32>
    tpu.vector_store %arg4[%c0_150, %c0_151, %c535_152], %203 {strides = array<i32>} : memref<1x1x804xf32, #tpu.memory_space<vmem>>, vector<1x1x256xf32>,
    %c0_153 = arith.constant 0 : index
    %c0_154 = arith.constant 0 : index
    %c536 = arith.constant 536 : index
    %204 = vector.load %arg4[%c0_153, %c0_154, %c536] : memref<1x1x804xf32, #tpu.memory_space<vmem>>, vector<1x1x256xf32>
    %205 = vector.shape_cast %204 : vector<1x1x256xf32> to vector<1x256xf32>
    %206 = vector.extract_strided_slice %3 {offsets = [26, 0], sizes = [1, 256], strides = [1, 1]} : vector<39x256xf32> to vector<1x256xf32>
    %207 = arith.addf %205, %206 : vector<1x256xf32>
    %c0_155 = arith.constant 0 : index
    %c0_156 = arith.constant 0 : index
    %c536_157 = arith.constant 536 : index
    %208 = vector.load %arg4[%c0_155, %c0_156, %c536_157] : memref<1x1x804xf32, #tpu.memory_space<vmem>>, vector<1x1x256xf32>
    %209 = vector.shape_cast %208 : vector<1x1x256xf32> to vector<1x256xf32>
    %210 = vector.shape_cast %207 : vector<1x256xf32> to vector<1x1x256xf32>
    tpu.vector_store %arg4[%c0_155, %c0_156, %c536_157], %210 {strides = array<i32>} : memref<1x1x804xf32, #tpu.memory_space<vmem>>, vector<1x1x256xf32>,
    %c0_158 = arith.constant 0 : index
    %c0_159 = arith.constant 0 : index
    %c537 = arith.constant 537 : index
    %211 = vector.load %arg4[%c0_158, %c0_159, %c537] : memref<1x1x804xf32, #tpu.memory_space<vmem>>, vector<1x1x256xf32>
    %212 = vector.shape_cast %211 : vector<1x1x256xf32> to vector<1x256xf32>
    %213 = vector.extract_strided_slice %3 {offsets = [27, 0], sizes = [1, 256], strides = [1, 1]} : vector<39x256xf32> to vector<1x256xf32>
    %214 = arith.addf %212, %213 : vector<1x256xf32>
    %c0_160 = arith.constant 0 : index
    %c0_161 = arith.constant 0 : index
    %c537_162 = arith.constant 537 : index
    %215 = vector.load %arg4[%c0_160, %c0_161, %c537_162] : memref<1x1x804xf32, #tpu.memory_space<vmem>>, vector<1x1x256xf32>
    %216 = vector.shape_cast %215 : vector<1x1x256xf32> to vector<1x256xf32>
    %217 = vector.shape_cast %214 : vector<1x256xf32> to vector<1x1x256xf32>
    tpu.vector_store %arg4[%c0_160, %c0_161, %c537_162], %217 {strides = array<i32>} : memref<1x1x804xf32, #tpu.memory_space<vmem>>, vector<1x1x256xf32>,
    %c0_163 = arith.constant 0 : index
    %c0_164 = arith.constant 0 : index
    %c538 = arith.constant 538 : index
    %218 = vector.load %arg4[%c0_163, %c0_164, %c538] : memref<1x1x804xf32, #tpu.memory_space<vmem>>, vector<1x1x256xf32>
    %219 = vector.shape_cast %218 : vector<1x1x256xf32> to vector<1x256xf32>
    %220 = vector.extract_strided_slice %3 {offsets = [28, 0], sizes = [1, 256], strides = [1, 1]} : vector<39x256xf32> to vector<1x256xf32>
    %221 = arith.addf %219, %220 : vector<1x256xf32>
    %c0_165 = arith.constant 0 : index
    %c0_166 = arith.constant 0 : index
    %c538_167 = arith.constant 538 : index
    %222 = vector.load %arg4[%c0_165, %c0_166, %c538_167] : memref<1x1x804xf32, #tpu.memory_space<vmem>>, vector<1x1x256xf32>
    %223 = vector.shape_cast %222 : vector<1x1x256xf32> to vector<1x256xf32>
    %224 = vector.shape_cast %221 : vector<1x256xf32> to vector<1x1x256xf32>
    tpu.vector_store %arg4[%c0_165, %c0_166, %c538_167], %224 {strides = array<i32>} : memref<1x1x804xf32, #tpu.memory_space<vmem>>, vector<1x1x256xf32>,
    %c0_168 = arith.constant 0 : index
    %c0_169 = arith.constant 0 : index
    %c539 = arith.constant 539 : index
    %225 = vector.load %arg4[%c0_168, %c0_169, %c539] : memref<1x1x804xf32, #tpu.memory_space<vmem>>, vector<1x1x256xf32>
    %226 = vector.shape_cast %225 : vector<1x1x256xf32> to vector<1x256xf32>
    %227 = vector.extract_strided_slice %3 {offsets = [29, 0], sizes = [1, 256], strides = [1, 1]} : vector<39x256xf32> to vector<1x256xf32>
    %228 = arith.addf %226, %227 : vector<1x256xf32>
    %c0_170 = arith.constant 0 : index
    %c0_171 = arith.constant 0 : index
    %c539_172 = arith.constant 539 : index
    %229 = vector.load %arg4[%c0_170, %c0_171, %c539_172] : memref<1x1x804xf32, #tpu.memory_space<vmem>>, vector<1x1x256xf32>
    %230 = vector.shape_cast %229 : vector<1x1x256xf32> to vector<1x256xf32>
    %231 = vector.shape_cast %228 : vector<1x256xf32> to vector<1x1x256xf32>
    tpu.vector_store %arg4[%c0_170, %c0_171, %c539_172], %231 {strides = array<i32>} : memref<1x1x804xf32, #tpu.memory_space<vmem>>, vector<1x1x256xf32>,
    %c0_173 = arith.constant 0 : index
    %c0_174 = arith.constant 0 : index
    %c540 = arith.constant 540 : index
    %232 = vector.load %arg4[%c0_173, %c0_174, %c540] : memref<1x1x804xf32, #tpu.memory_space<vmem>>, vector<1x1x256xf32>
    %233 = vector.shape_cast %232 : vector<1x1x256xf32> to vector<1x256xf32>
    %234 = vector.extract_strided_slice %3 {offsets = [30, 0], sizes = [1, 256], strides = [1, 1]} : vector<39x256xf32> to vector<1x256xf32>
    %235 = arith.addf %233, %234 : vector<1x256xf32>
    %c0_175 = arith.constant 0 : index
    %c0_176 = arith.constant 0 : index
    %c540_177 = arith.constant 540 : index
    %236 = vector.load %arg4[%c0_175, %c0_176, %c540_177] : memref<1x1x804xf32, #tpu.memory_space<vmem>>, vector<1x1x256xf32>
    %237 = vector.shape_cast %236 : vector<1x1x256xf32> to vector<1x256xf32>
    %238 = vector.shape_cast %235 : vector<1x256xf32> to vector<1x1x256xf32>
    tpu.vector_store %arg4[%c0_175, %c0_176, %c540_177], %238 {strides = array<i32>} : memref<1x1x804xf32, #tpu.memory_space<vmem>>, vector<1x1x256xf32>,
    %c0_178 = arith.constant 0 : index
    %c0_179 = arith.constant 0 : index
    %c541 = arith.constant 541 : index
    %239 = vector.load %arg4[%c0_178, %c0_179, %c541] : memref<1x1x804xf32, #tpu.memory_space<vmem>>, vector<1x1x256xf32>
    %240 = vector.shape_cast %239 : vector<1x1x256xf32> to vector<1x256xf32>
    %241 = vector.extract_strided_slice %3 {offsets = [31, 0], sizes = [1, 256], strides = [1, 1]} : vector<39x256xf32> to vector<1x256xf32>
    %242 = arith.addf %240, %241 : vector<1x256xf32>
    %c0_180 = arith.constant 0 : index
    %c0_181 = arith.constant 0 : index
    %c541_182 = arith.constant 541 : index
    %243 = vector.load %arg4[%c0_180, %c0_181, %c541_182] : memref<1x1x804xf32, #tpu.memory_space<vmem>>, vector<1x1x256xf32>
    %244 = vector.shape_cast %243 : vector<1x1x256xf32> to vector<1x256xf32>
    %245 = vector.shape_cast %242 : vector<1x256xf32> to vector<1x1x256xf32>
    tpu.vector_store %arg4[%c0_180, %c0_181, %c541_182], %245 {strides = array<i32>} : memref<1x1x804xf32, #tpu.memory_space<vmem>>, vector<1x1x256xf32>,
    %c0_183 = arith.constant 0 : index
    %c0_184 = arith.constant 0 : index
    %c542 = arith.constant 542 : index
    %246 = vector.load %arg4[%c0_183, %c0_184, %c542] : memref<1x1x804xf32, #tpu.memory_space<vmem>>, vector<1x1x256xf32>
    %247 = vector.shape_cast %246 : vector<1x1x256xf32> to vector<1x256xf32>
    %248 = vector.extract_strided_slice %3 {offsets = [32, 0], sizes = [1, 256], strides = [1, 1]} : vector<39x256xf32> to vector<1x256xf32>
    %249 = arith.addf %247, %248 : vector<1x256xf32>
    %c0_185 = arith.constant 0 : index
    %c0_186 = arith.constant 0 : index
    %c542_187 = arith.constant 542 : index
    %250 = vector.load %arg4[%c0_185, %c0_186, %c542_187] : memref<1x1x804xf32, #tpu.memory_space<vmem>>, vector<1x1x256xf32>
    %251 = vector.shape_cast %250 : vector<1x1x256xf32> to vector<1x256xf32>
    %252 = vector.shape_cast %249 : vector<1x256xf32> to vector<1x1x256xf32>
    tpu.vector_store %arg4[%c0_185, %c0_186, %c542_187], %252 {strides = array<i32>} : memref<1x1x804xf32, #tpu.memory_space<vmem>>, vector<1x1x256xf32>,
    %c0_188 = arith.constant 0 : index
    %c0_189 = arith.constant 0 : index
    %c543 = arith.constant 543 : index
    %253 = vector.load %arg4[%c0_188, %c0_189, %c543] : memref<1x1x804xf32, #tpu.memory_space<vmem>>, vector<1x1x256xf32>
    %254 = vector.shape_cast %253 : vector<1x1x256xf32> to vector<1x256xf32>
    %255 = vector.extract_strided_slice %3 {offsets = [33, 0], sizes = [1, 256], strides = [1, 1]} : vector<39x256xf32> to vector<1x256xf32>
    %256 = arith.addf %254, %255 : vector<1x256xf32>
    %c0_190 = arith.constant 0 : index
    %c0_191 = arith.constant 0 : index
    %c543_192 = arith.constant 543 : index
    %257 = vector.load %arg4[%c0_190, %c0_191, %c543_192] : memref<1x1x804xf32, #tpu.memory_space<vmem>>, vector<1x1x256xf32>
    %258 = vector.shape_cast %257 : vector<1x1x256xf32> to vector<1x256xf32>
    %259 = vector.shape_cast %256 : vector<1x256xf32> to vector<1x1x256xf32>
    tpu.vector_store %arg4[%c0_190, %c0_191, %c543_192], %259 {strides = array<i32>} : memref<1x1x804xf32, #tpu.memory_space<vmem>>, vector<1x1x256xf32>,
    %c0_193 = arith.constant 0 : index
    %c0_194 = arith.constant 0 : index
    %c544 = arith.constant 544 : index
    %260 = vector.load %arg4[%c0_193, %c0_194, %c544] : memref<1x1x804xf32, #tpu.memory_space<vmem>>, vector<1x1x256xf32>
    %261 = vector.shape_cast %260 : vector<1x1x256xf32> to vector<1x256xf32>
    %262 = vector.extract_strided_slice %3 {offsets = [34, 0], sizes = [1, 256], strides = [1, 1]} : vector<39x256xf32> to vector<1x256xf32>
    %263 = arith.addf %261, %262 : vector<1x256xf32>
    %c0_195 = arith.constant 0 : index
    %c0_196 = arith.constant 0 : index
    %c544_197 = arith.constant 544 : index
    %264 = vector.load %arg4[%c0_195, %c0_196, %c544_197] : memref<1x1x804xf32, #tpu.memory_space<vmem>>, vector<1x1x256xf32>
    %265 = vector.shape_cast %264 : vector<1x1x256xf32> to vector<1x256xf32>
    %266 = vector.shape_cast %263 : vector<1x256xf32> to vector<1x1x256xf32>
    tpu.vector_store %arg4[%c0_195, %c0_196, %c544_197], %266 {strides = array<i32>} : memref<1x1x804xf32, #tpu.memory_space<vmem>>, vector<1x1x256xf32>,
    %c0_198 = arith.constant 0 : index
    %c0_199 = arith.constant 0 : index
    %c545 = arith.constant 545 : index
    %267 = vector.load %arg4[%c0_198, %c0_199, %c545] : memref<1x1x804xf32, #tpu.memory_space<vmem>>, vector<1x1x256xf32>
    %268 = vector.shape_cast %267 : vector<1x1x256xf32> to vector<1x256xf32>
    %269 = vector.extract_strided_slice %3 {offsets = [35, 0], sizes = [1, 256], strides = [1, 1]} : vector<39x256xf32> to vector<1x256xf32>
    %270 = arith.addf %268, %269 : vector<1x256xf32>
    %c0_200 = arith.constant 0 : index
    %c0_201 = arith.constant 0 : index
    %c545_202 = arith.constant 545 : index
    %271 = vector.load %arg4[%c0_200, %c0_201, %c545_202] : memref<1x1x804xf32, #tpu.memory_space<vmem>>, vector<1x1x256xf32>
    %272 = vector.shape_cast %271 : vector<1x1x256xf32> to vector<1x256xf32>
    %273 = vector.shape_cast %270 : vector<1x256xf32> to vector<1x1x256xf32>
    tpu.vector_store %arg4[%c0_200, %c0_201, %c545_202], %273 {strides = array<i32>} : memref<1x1x804xf32, #tpu.memory_space<vmem>>, vector<1x1x256xf32>,
    %c0_203 = arith.constant 0 : index
    %c0_204 = arith.constant 0 : index
    %c546 = arith.constant 546 : index
    %274 = vector.load %arg4[%c0_203, %c0_204, %c546] : memref<1x1x804xf32, #tpu.memory_space<vmem>>, vector<1x1x256xf32>
    %275 = vector.shape_cast %274 : vector<1x1x256xf32> to vector<1x256xf32>
    %276 = vector.extract_strided_slice %3 {offsets = [36, 0], sizes = [1, 256], strides = [1, 1]} : vector<39x256xf32> to vector<1x256xf32>
    %277 = arith.addf %275, %276 : vector<1x256xf32>
    %c0_205 = arith.constant 0 : index
    %c0_206 = arith.constant 0 : index
    %c546_207 = arith.constant 546 : index
    %278 = vector.load %arg4[%c0_205, %c0_206, %c546_207] : memref<1x1x804xf32, #tpu.memory_space<vmem>>, vector<1x1x256xf32>
    %279 = vector.shape_cast %278 : vector<1x1x256xf32> to vector<1x256xf32>
    %280 = vector.shape_cast %277 : vector<1x256xf32> to vector<1x1x256xf32>
    tpu.vector_store %arg4[%c0_205, %c0_206, %c546_207], %280 {strides = array<i32>} : memref<1x1x804xf32, #tpu.memory_space<vmem>>, vector<1x1x256xf32>,
    %c0_208 = arith.constant 0 : index
    %c0_209 = arith.constant 0 : index
    %c547 = arith.constant 547 : index
    %281 = vector.load %arg4[%c0_208, %c0_209, %c547] : memref<1x1x804xf32, #tpu.memory_space<vmem>>, vector<1x1x256xf32>
    %282 = vector.shape_cast %281 : vector<1x1x256xf32> to vector<1x256xf32>
    %283 = vector.extract_strided_slice %3 {offsets = [37, 0], sizes = [1, 256], strides = [1, 1]} : vector<39x256xf32> to vector<1x256xf32>
    %284 = arith.addf %282, %283 : vector<1x256xf32>
    %c0_210 = arith.constant 0 : index
    %c0_211 = arith.constant 0 : index
    %c547_212 = arith.constant 547 : index
    %285 = vector.load %arg4[%c0_210, %c0_211, %c547_212] : memref<1x1x804xf32, #tpu.memory_space<vmem>>, vector<1x1x256xf32>
    %286 = vector.shape_cast %285 : vector<1x1x256xf32> to vector<1x256xf32>
    %287 = vector.shape_cast %284 : vector<1x256xf32> to vector<1x1x256xf32>
    tpu.vector_store %arg4[%c0_210, %c0_211, %c547_212], %287 {strides = array<i32>} : memref<1x1x804xf32, #tpu.memory_space<vmem>>, vector<1x1x256xf32>,
    %c0_213 = arith.constant 0 : index
    %c0_214 = arith.constant 0 : index
    %c548 = arith.constant 548 : index
    %288 = vector.load %arg4[%c0_213, %c0_214, %c548] : memref<1x1x804xf32, #tpu.memory_space<vmem>>, vector<1x1x256xf32>
    %289 = vector.shape_cast %288 : vector<1x1x256xf32> to vector<1x256xf32>
    %290 = vector.extract_strided_slice %3 {offsets = [38, 0], sizes = [1, 256], strides = [1, 1]} : vector<39x256xf32> to vector<1x256xf32>
    %291 = arith.addf %289, %290 : vector<1x256xf32>
    %c0_215 = arith.constant 0 : index
    %c0_216 = arith.constant 0 : index
    %c548_217 = arith.constant 548 : index
    %292 = vector.load %arg4[%c0_215, %c0_216, %c548_217] : memref<1x1x804xf32, #tpu.memory_space<vmem>>, vector<1x1x256xf32>
    %293 = vector.shape_cast %292 : vector<1x1x256xf32> to vector<1x256xf32>
    %294 = vector.shape_cast %291 : vector<1x256xf32> to vector<1x1x256xf32>
    tpu.vector_store %arg4[%c0_215, %c0_216, %c548_217], %294 {strides = array<i32>} : memref<1x1x804xf32, #tpu.memory_space<vmem>>, vector<1x1x256xf32>,
    %c0_218 = arith.constant 0 : index
    %c0_219 = arith.constant 0 : index
    %c526_220 = arith.constant 526 : index
    %295 = vector.load %arg4[%c0_218, %c0_219, %c526_220] : memref<1x1x804xf32, #tpu.memory_space<vmem>>, vector<1x1x278xf32>
    %296 = vector.shape_cast %295 : vector<1x1x278xf32> to vector<1x278xf32>
    %c2_221 = arith.constant 2 : index
    %297 = memref.load %arg3[%c2_221] : memref<3xf32, #tpu.memory_space<smem>>
    %298 = vector.broadcast %297 : f32 to vector<1x278xf32>
    %299 = arith.addf %296, %298 : vector<1x278xf32>
    %c0_222 = arith.constant 0 : index
    %c0_223 = arith.constant 0 : index
    %c526_224 = arith.constant 526 : index
    %300 = vector.load %arg4[%c0_222, %c0_223, %c526_224] : memref<1x1x804xf32, #tpu.memory_space<vmem>>, vector<1x1x278xf32>
    %301 = vector.shape_cast %300 : vector<1x1x278xf32> to vector<1x278xf32>
    %302 = vector.shape_cast %299 : vector<1x278xf32> to vector<1x1x278xf32>
    tpu.vector_store %arg4[%c0_222, %c0_223, %c526_224], %302 {strides = array<i32>} : memref<1x1x804xf32, #tpu.memory_space<vmem>>, vector<1x1x278xf32>,
    return
  }
  func.func @transform_0(%arg0: i32) -> (i32, i32, i32) {
    %c0_i32 = arith.constant 0 : i32
    %c0_i32_0 = arith.constant 0 : i32
    %c0_i32_1 = arith.constant 0 : i32
    return %arg0, %c0_i32, %c0_i32_0 : i32, i32, i32
  }
  func.func @transform_1(%arg0: i32) -> (i32, i32) {
    %c0_i32 = arith.constant 0 : i32
    %c0_i32_0 = arith.constant 0 : i32
    %c0_i32_1 = arith.constant 0 : i32
    return %c0_i32, %c0_i32_0 : i32, i32
  }
  func.func @transform_2(%arg0: i32) -> i32 {
    %c0_i32 = arith.constant 0 : i32
    %c0_i32_0 = arith.constant 0 : i32
    return %c0_i32 : i32
  }
  func.func @transform_3(%arg0: i32) -> (i32, i32, i32) {
    %c0_i32 = arith.constant 0 : i32
    %c0_i32_0 = arith.constant 0 : i32
    %c0_i32_1 = arith.constant 0 : i32
    return %arg0, %c0_i32, %c0_i32_0 : i32, i32, i32
  }
}

module attributes {stable_mosaic.version = 11 : i64} {
  func.func @_linear_kernel(%arg0: i32, %arg1: i32, %arg2: i32, %arg3: memref<2x32xf32, #tpu.memory_space<vmem>>, %arg4: memref<32x64xf32, #tpu.memory_space<vmem>>, %arg5: memref<1x64xf32, #tpu.memory_space<vmem>>, %arg6: memref<2x64xf32, #tpu.memory_space<vmem>>, %arg7: memref<2x64xf32, #tpu.memory_space<vmem>>) attributes {dimension_semantics = [#tpu.dimension_semantics<parallel>, #tpu.dimension_semantics<parallel>, #tpu.dimension_semantics<arbitrary>], iteration_bounds = array<i64: 1, 1, 1>, scalar_prefetch = 0 : i64, scratch_operands = 1 : i64, tpu.core_type = #tpu.core_type<tc>, window_params = [{transform_indices = @transform_0, window_bounds = array<i64: 2, 32>}, {transform_indices = @transform_1, window_bounds = array<i64: 32, 64>}, {transform_indices = @transform_2, window_bounds = array<i64: 1, 64>}, {transform_indices = @transform_3, window_bounds = array<i64: 2, 64>}]} {
    %c0_i32 = arith.constant 0 : i32
    %0 = arith.cmpi eq, %arg2, %c0_i32 : i32
    %1 = arith.extui %0 : i1 to i32
    %c0_i32_0 = arith.constant 0 : i32
    %2 = arith.cmpi ne, %1, %c0_i32_0 : i32
    scf.if %2 {
      %cst_10 = arith.constant 0.000000e+00 : f32
      %12 = vector.broadcast %cst_10 : f32 to vector<2x64xf32>
      %c0_11 = arith.constant 0 : index
      %c0_12 = arith.constant 0 : index
      %13 = vector.load %arg7[%c0_11, %c0_12] : memref<2x64xf32, #tpu.memory_space<vmem>>, vector<2x64xf32>
      tpu.vector_store %arg7[%c0_11, %c0_12], %12 {strides = array<i32>} : memref<2x64xf32, #tpu.memory_space<vmem>>, vector<2x64xf32>,
    } else {
    }
    %c0 = arith.constant 0 : index
    %c0_1 = arith.constant 0 : index
    %3 = vector.load %arg7[%c0, %c0_1] : memref<2x64xf32, #tpu.memory_space<vmem>>, vector<2x64xf32>
    %c0_2 = arith.constant 0 : index
    %c0_3 = arith.constant 0 : index
    %4 = vector.load %arg3[%c0_2, %c0_3] : memref<2x32xf32, #tpu.memory_space<vmem>>, vector<2x32xf32>
    %c0_4 = arith.constant 0 : index
    %c0_5 = arith.constant 0 : index
    %5 = vector.load %arg4[%c0_4, %c0_5] : memref<32x64xf32, #tpu.memory_space<vmem>>, vector<32x64xf32>
    %cst = arith.constant dense<0.000000e+00> : vector<2x64xf32>
    %6 = tpu.matmul %4, %5, %cst {dimension_numbers = #tpu.dot_dimension_numbers<[1], [0], [0], [1], [0, 0, 1, 1], [], []>} : vector<2x32xf32>, vector<32x64xf32>, vector<2x64xf32> -> vector<2x64xf32>
    %7 = arith.addf %3, %6 : vector<2x64xf32>
    %c0_6 = arith.constant 0 : index
    %c0_7 = arith.constant 0 : index
    %8 = vector.load %arg7[%c0_6, %c0_7] : memref<2x64xf32, #tpu.memory_space<vmem>>, vector<2x64xf32>
    tpu.vector_store %arg7[%c0_6, %c0_7], %7 {strides = array<i32>} : memref<2x64xf32, #tpu.memory_space<vmem>>, vector<2x64xf32>,
    %c0_i32_8 = arith.constant 0 : i32
    %9 = arith.cmpi eq, %arg2, %c0_i32_8 : i32
    %10 = arith.extui %9 : i1 to i32
    %c0_i32_9 = arith.constant 0 : i32
    %11 = arith.cmpi ne, %10, %c0_i32_9 : i32
    scf.if %11 {
      %c0_10 = arith.constant 0 : index
      %c0_11 = arith.constant 0 : index
      %12 = vector.load %arg7[%c0_10, %c0_11] : memref<2x64xf32, #tpu.memory_space<vmem>>, vector<2x64xf32>
      %c0_12 = arith.constant 0 : index
      %c0_13 = arith.constant 0 : index
      %13 = vector.load %arg5[%c0_12, %c0_13] : memref<1x64xf32, #tpu.memory_space<vmem>>, vector<1x64xf32>
      %14 = vector.broadcast %13 : vector<1x64xf32> to vector<2x64xf32>
      %15 = arith.addf %12, %14 : vector<2x64xf32>
      %c0_14 = arith.constant 0 : index
      %c0_15 = arith.constant 0 : index
      %16 = vector.load %arg6[%c0_14, %c0_15] : memref<2x64xf32, #tpu.memory_space<vmem>>, vector<2x64xf32>
      tpu.vector_store %arg6[%c0_14, %c0_15], %15 {strides = array<i32>} : memref<2x64xf32, #tpu.memory_space<vmem>>, vector<2x64xf32>,
    } else {
    }
    return
  }
  func.func @transform_0(%arg0: i32, %arg1: i32, %arg2: i32) -> (i32, i32) {
    %c0_i32 = arith.constant 0 : i32
    return %arg0, %arg2 : i32, i32
  }
  func.func @transform_1(%arg0: i32, %arg1: i32, %arg2: i32) -> (i32, i32) {
    %c0_i32 = arith.constant 0 : i32
    return %arg2, %arg1 : i32, i32
  }
  func.func @transform_2(%arg0: i32, %arg1: i32, %arg2: i32) -> (i32, i32) {
    %c0_i32 = arith.constant 0 : i32
    %c0_i32_0 = arith.constant 0 : i32
    return %c0_i32, %arg1 : i32, i32
  }
  func.func @transform_3(%arg0: i32, %arg1: i32, %arg2: i32) -> (i32, i32) {
    %c0_i32 = arith.constant 0 : i32
    return %arg0, %arg1 : i32, i32
  }
}

module attributes {stable_mosaic.version = 11 : i64} {
  func.func @_linear_kernel(%arg0: i32, %arg1: i32, %arg2: i32, %arg3: memref<2x32xf32, #tpu.memory_space<vmem>>, %arg4: memref<32x512xf32, #tpu.memory_space<vmem>>, %arg5: memref<1x512xf32, #tpu.memory_space<vmem>>, %arg6: memref<2x512xf32, #tpu.memory_space<vmem>>, %arg7: memref<2x512xf32, #tpu.memory_space<vmem>>) attributes {dimension_semantics = [#tpu.dimension_semantics<parallel>, #tpu.dimension_semantics<parallel>, #tpu.dimension_semantics<arbitrary>], iteration_bounds = array<i64: 1, 1, 1>, scalar_prefetch = 0 : i64, scratch_operands = 1 : i64, tpu.core_type = #tpu.core_type<tc>, window_params = [{transform_indices = @transform_0, window_bounds = array<i64: 2, 32>}, {transform_indices = @transform_1, window_bounds = array<i64: 32, 512>}, {transform_indices = @transform_2, window_bounds = array<i64: 1, 512>}, {transform_indices = @transform_3, window_bounds = array<i64: 2, 512>}]} {
    %c0_i32 = arith.constant 0 : i32
    %0 = arith.cmpi eq, %arg2, %c0_i32 : i32
    %1 = arith.extui %0 : i1 to i32
    %c0_i32_0 = arith.constant 0 : i32
    %2 = arith.cmpi ne, %1, %c0_i32_0 : i32
    scf.if %2 {
      %cst_10 = arith.constant 0.000000e+00 : f32
      %12 = vector.broadcast %cst_10 : f32 to vector<2x512xf32>
      %c0_11 = arith.constant 0 : index
      %c0_12 = arith.constant 0 : index
      %13 = vector.load %arg7[%c0_11, %c0_12] : memref<2x512xf32, #tpu.memory_space<vmem>>, vector<2x512xf32>
      tpu.vector_store %arg7[%c0_11, %c0_12], %12 {strides = array<i32>} : memref<2x512xf32, #tpu.memory_space<vmem>>, vector<2x512xf32>,
    } else {
    }
    %c0 = arith.constant 0 : index
    %c0_1 = arith.constant 0 : index
    %3 = vector.load %arg7[%c0, %c0_1] : memref<2x512xf32, #tpu.memory_space<vmem>>, vector<2x512xf32>
    %c0_2 = arith.constant 0 : index
    %c0_3 = arith.constant 0 : index
    %4 = vector.load %arg3[%c0_2, %c0_3] : memref<2x32xf32, #tpu.memory_space<vmem>>, vector<2x32xf32>
    %c0_4 = arith.constant 0 : index
    %c0_5 = arith.constant 0 : index
    %5 = vector.load %arg4[%c0_4, %c0_5] : memref<32x512xf32, #tpu.memory_space<vmem>>, vector<32x512xf32>
    %cst = arith.constant dense<0.000000e+00> : vector<2x512xf32>
    %6 = tpu.matmul %4, %5, %cst {dimension_numbers = #tpu.dot_dimension_numbers<[1], [0], [0], [1], [0, 0, 1, 1], [], []>} : vector<2x32xf32>, vector<32x512xf32>, vector<2x512xf32> -> vector<2x512xf32>
    %7 = arith.addf %3, %6 : vector<2x512xf32>
    %c0_6 = arith.constant 0 : index
    %c0_7 = arith.constant 0 : index
    %8 = vector.load %arg7[%c0_6, %c0_7] : memref<2x512xf32, #tpu.memory_space<vmem>>, vector<2x512xf32>
    tpu.vector_store %arg7[%c0_6, %c0_7], %7 {strides = array<i32>} : memref<2x512xf32, #tpu.memory_space<vmem>>, vector<2x512xf32>,
    %c0_i32_8 = arith.constant 0 : i32
    %9 = arith.cmpi eq, %arg2, %c0_i32_8 : i32
    %10 = arith.extui %9 : i1 to i32
    %c0_i32_9 = arith.constant 0 : i32
    %11 = arith.cmpi ne, %10, %c0_i32_9 : i32
    scf.if %11 {
      %c0_10 = arith.constant 0 : index
      %c0_11 = arith.constant 0 : index
      %12 = vector.load %arg7[%c0_10, %c0_11] : memref<2x512xf32, #tpu.memory_space<vmem>>, vector<2x512xf32>
      %c0_12 = arith.constant 0 : index
      %c0_13 = arith.constant 0 : index
      %13 = vector.load %arg5[%c0_12, %c0_13] : memref<1x512xf32, #tpu.memory_space<vmem>>, vector<1x512xf32>
      %14 = vector.broadcast %13 : vector<1x512xf32> to vector<2x512xf32>
      %15 = arith.addf %12, %14 : vector<2x512xf32>
      %c0_14 = arith.constant 0 : index
      %c0_15 = arith.constant 0 : index
      %16 = vector.load %arg6[%c0_14, %c0_15] : memref<2x512xf32, #tpu.memory_space<vmem>>, vector<2x512xf32>
      tpu.vector_store %arg6[%c0_14, %c0_15], %15 {strides = array<i32>} : memref<2x512xf32, #tpu.memory_space<vmem>>, vector<2x512xf32>,
    } else {
    }
    return
  }
  func.func @transform_0(%arg0: i32, %arg1: i32, %arg2: i32) -> (i32, i32) {
    %c0_i32 = arith.constant 0 : i32
    return %arg0, %arg2 : i32, i32
  }
  func.func @transform_1(%arg0: i32, %arg1: i32, %arg2: i32) -> (i32, i32) {
    %c0_i32 = arith.constant 0 : i32
    return %arg2, %arg1 : i32, i32
  }
  func.func @transform_2(%arg0: i32, %arg1: i32, %arg2: i32) -> (i32, i32) {
    %c0_i32 = arith.constant 0 : i32
    %c0_i32_0 = arith.constant 0 : i32
    return %c0_i32, %arg1 : i32, i32
  }
  func.func @transform_3(%arg0: i32, %arg1: i32, %arg2: i32) -> (i32, i32) {
    %c0_i32 = arith.constant 0 : i32
    return %arg0, %arg1 : i32, i32
  }
}

module attributes {stable_mosaic.version = 11 : i64} {
  func.func @_linear_kernel(%arg0: i32, %arg1: i32, %arg2: i32, %arg3: memref<16x8xf32, #tpu.memory_space<vmem>>, %arg4: memref<8x4xf32, #tpu.memory_space<vmem>>, %arg5: memref<1x4xf32, #tpu.memory_space<vmem>>, %arg6: memref<16x4xf32, #tpu.memory_space<vmem>>, %arg7: memref<16x4xf32, #tpu.memory_space<vmem>>) attributes {dimension_semantics = [#tpu.dimension_semantics<parallel>, #tpu.dimension_semantics<parallel>, #tpu.dimension_semantics<arbitrary>], iteration_bounds = array<i64: 1, 1, 1>, scalar_prefetch = 0 : i64, scratch_operands = 1 : i64, tpu.core_type = #tpu.core_type<tc>, window_params = [{transform_indices = @transform_0, window_bounds = array<i64: 16, 8>}, {transform_indices = @transform_1, window_bounds = array<i64: 8, 4>}, {transform_indices = @transform_2, window_bounds = array<i64: 1, 4>}, {transform_indices = @transform_3, window_bounds = array<i64: 16, 4>}]} {
    %c0_i32 = arith.constant 0 : i32
    %0 = arith.cmpi eq, %arg2, %c0_i32 : i32
    %1 = arith.extui %0 : i1 to i32
    %c0_i32_0 = arith.constant 0 : i32
    %2 = arith.cmpi ne, %1, %c0_i32_0 : i32
    scf.if %2 {
      %cst_10 = arith.constant 0.000000e+00 : f32
      %12 = vector.broadcast %cst_10 : f32 to vector<16x4xf32>
      %c0_11 = arith.constant 0 : index
      %c0_12 = arith.constant 0 : index
      %13 = vector.load %arg7[%c0_11, %c0_12] : memref<16x4xf32, #tpu.memory_space<vmem>>, vector<16x4xf32>
      tpu.vector_store %arg7[%c0_11, %c0_12], %12 {strides = array<i32>} : memref<16x4xf32, #tpu.memory_space<vmem>>, vector<16x4xf32>,
    } else {
    }
    %c0 = arith.constant 0 : index
    %c0_1 = arith.constant 0 : index
    %3 = vector.load %arg7[%c0, %c0_1] : memref<16x4xf32, #tpu.memory_space<vmem>>, vector<16x4xf32>
    %c0_2 = arith.constant 0 : index
    %c0_3 = arith.constant 0 : index
    %4 = vector.load %arg3[%c0_2, %c0_3] : memref<16x8xf32, #tpu.memory_space<vmem>>, vector<16x8xf32>
    %c0_4 = arith.constant 0 : index
    %c0_5 = arith.constant 0 : index
    %5 = vector.load %arg4[%c0_4, %c0_5] : memref<8x4xf32, #tpu.memory_space<vmem>>, vector<8x4xf32>
    %cst = arith.constant dense<0.000000e+00> : vector<16x4xf32>
    %6 = tpu.matmul %4, %5, %cst {dimension_numbers = #tpu.dot_dimension_numbers<[1], [0], [0], [1], [0, 0, 1, 1], [], []>} : vector<16x8xf32>, vector<8x4xf32>, vector<16x4xf32> -> vector<16x4xf32>
    %7 = arith.addf %3, %6 : vector<16x4xf32>
    %c0_6 = arith.constant 0 : index
    %c0_7 = arith.constant 0 : index
    %8 = vector.load %arg7[%c0_6, %c0_7] : memref<16x4xf32, #tpu.memory_space<vmem>>, vector<16x4xf32>
    tpu.vector_store %arg7[%c0_6, %c0_7], %7 {strides = array<i32>} : memref<16x4xf32, #tpu.memory_space<vmem>>, vector<16x4xf32>,
    %c0_i32_8 = arith.constant 0 : i32
    %9 = arith.cmpi eq, %arg2, %c0_i32_8 : i32
    %10 = arith.extui %9 : i1 to i32
    %c0_i32_9 = arith.constant 0 : i32
    %11 = arith.cmpi ne, %10, %c0_i32_9 : i32
    scf.if %11 {
      %c0_10 = arith.constant 0 : index
      %c0_11 = arith.constant 0 : index
      %12 = vector.load %arg7[%c0_10, %c0_11] : memref<16x4xf32, #tpu.memory_space<vmem>>, vector<16x4xf32>
      %c0_12 = arith.constant 0 : index
      %c0_13 = arith.constant 0 : index
      %13 = vector.load %arg5[%c0_12, %c0_13] : memref<1x4xf32, #tpu.memory_space<vmem>>, vector<1x4xf32>
      %14 = vector.broadcast %13 : vector<1x4xf32> to vector<16x4xf32>
      %15 = arith.addf %12, %14 : vector<16x4xf32>
      %c0_14 = arith.constant 0 : index
      %c0_15 = arith.constant 0 : index
      %16 = vector.load %arg6[%c0_14, %c0_15] : memref<16x4xf32, #tpu.memory_space<vmem>>, vector<16x4xf32>
      tpu.vector_store %arg6[%c0_14, %c0_15], %15 {strides = array<i32>} : memref<16x4xf32, #tpu.memory_space<vmem>>, vector<16x4xf32>,
    } else {
    }
    return
  }
  func.func @transform_0(%arg0: i32, %arg1: i32, %arg2: i32) -> (i32, i32) {
    %c0_i32 = arith.constant 0 : i32
    return %arg0, %arg2 : i32, i32
  }
  func.func @transform_1(%arg0: i32, %arg1: i32, %arg2: i32) -> (i32, i32) {
    %c0_i32 = arith.constant 0 : i32
    return %arg2, %arg1 : i32, i32
  }
  func.func @transform_2(%arg0: i32, %arg1: i32, %arg2: i32) -> (i32, i32) {
    %c0_i32 = arith.constant 0 : i32
    %c0_i32_0 = arith.constant 0 : i32
    return %c0_i32, %arg1 : i32, i32
  }
  func.func @transform_3(%arg0: i32, %arg1: i32, %arg2: i32) -> (i32, i32) {
    %c0_i32 = arith.constant 0 : i32
    return %arg0, %arg1 : i32, i32
  }
}

</mosaic_0001>

<bundles_post_ra>
// kernel: ucitr_linear_forward.6
= control target key start
LH: loop header
LB: loop body
LE: loop exit
PB: predicated region body
PF: predicated region fallthrough
CT: control target
= control target key end

     0   :  { %17 = vsyncpa [#allocation3], 0  ;;  %s409_s24 = smov [#allocation2]   ;;  %s410_s26 = smov 256   ;;  %s556_s0 = inlined_call_operand.vmem [shape: f32[16,4], index: 0, kind: input, shape index: {}]   ;;  %s557_s1 = inlined_call_operand.vmem [shape: f32[16,4], index: 1, kind: input, shape index: {}]   ;;  %s558_s2 = inlined_call_operand.vmem [shape: f32[16,4], index: 2, kind: input, shape index: {}]   ;;  %s559_s3 = inlined_call_operand.vmem [shape: f32[4,32], index: 3, kind: input, shape index: {}]   ;;  %s560_s4 = inlined_call_operand.vmem [shape: f32[4,32], index: 4, kind: input, shape index: {}]   ;;  %s561_s5 = inlined_call_operand.vmem [shape: f32[1,32], index: 5, kind: input, shape index: {}]   ;;  %s562_s6 = inlined_call_operand.vmem [shape: f32[4,4], index: 6, kind: input, shape index: {}]   ;;  %s563_s7 = inlined_call_operand.vmem [shape: f32[4,4], index: 7, kind: input, shape index: {}]   ;;  %s564_s8 = inlined_call_operand.vmem [shape: f32[1,4], index: 8, kind: input, shape index: {}]   ;;  %s565_s9 = inlined_call_operand.hbm [shape: f32[32,256], index: 9, kind: input, shape index: {}]   ;;  %s566_s10 = inlined_call_operand.vmem [shape: f32[4,256], index: 10, kind: input, shape index: {}]   ;;  %s567_s11 = inlined_call_operand.vmem [shape: f32[1,256], index: 11, kind: input, shape index: {}]   ;;  %s568_s12 = inlined_call_operand.vmem [shape: f32[16,256], index: 12, kind: output, shape index: {}]  }
   0x1   :  { %s40_s23 = sshll.u32 %s565_s9, 4  ;;  %s42_s25 = sshll.u32 %s409_s24, 4  ;;  %s41_s23 = int_to_ptr.hbm [resolvable:$true] %s40_s23  ;;  %s43_s25 = int_to_ptr.vmem [resolvable:$true] %s42_s25 }
   0x2   :  { %s411_s27 = smov 16  }
   0x3   :  { %48 = dma.hbm_to_vmem [thread:$0]  %s41_s23, 1024, %s43_s25, [#allocation3], %s410_s26, %s410_s26, %s411_s27  }
   0x4   :  { %407 = dma.done.wait [#allocation3], 1024  }
   0x5   :  { %408 = vsyncadd [#allocation3], 4294966272  ;;  %vm72_vm0 = vcmask 1043456   ;;  %vm65_vm1 = vcmask 31744   ;;  %v64_v0 = vld [vmem:[%s560_s4] sm:$0xf] }
   0x6   :  { %v63_v1 = vld [vmem:[%s559_s3] sm:$0xf]  ;;  %348 = vmatpush.msk.msra.mxu0 %vm72_vm0, %v64_v0  ;;  %v213_v7 = vld [vmem:[#allocation2 + $0x30] sm:$0xff]  ;;  %v60_v9 = vld [vmem:[%s557_s1 + $0x8] sm:$0xff]  ;;  %vm276_vm2 = vcmask 261120  }
   0x7   :  { %v140_v2 = vld [vmem:[%s563_s7] sm:$0xf]  ;;  %351 = vmatpush.msk.msra.mxu1 %vm72_vm0, %v63_v1  ;;  %v58_v10 = vld [vmem:[%s556_s0 + $0x8] sm:$0xff]  ;;  %v212_v13 = vld [vmem:[#allocation2 + $0x28] sm:$0xff] }
   0x8   :  { %v139_v3 = vld [vmem:[%s562_s6] sm:$0xf]  ;;  %354 = vmatpush.msk.msra.mxu2 %vm72_vm0, %v140_v2  ;;  %v62_v11 = vld [vmem:[%s558_s2 + $0x8] sm:$0xff]  ;;  %v209_v15 = vld [vmem:[#allocation2 + $0x10] sm:$0xff] }
   0x9   :  { %v59_v4 = vld [vmem:[%s557_s1] sm:$0xff]  ;;  %357 = vmatpush.msk.msra.mxu3 %vm72_vm0, %v139_v3  ;;  %v211_v12 = vld [vmem:[#allocation2 + $0x20] sm:$0xff]  ;;  %v208_v18 = vld [vmem:[#allocation2 + $0x8] sm:$0xff] }
   0xa   :  { %v57_v5 = vld [vmem:[%s556_s0] sm:$0xff]  ;;  %349 = vmatmul.msk.f32.vlgmr.msra.gmra.mxu0 %vm65_vm1, %v59_v4  ;;  %295 = vmatpush.msrb.mxu2 %v213_v7  ;;  %v207_v17 = vld [vmem:[#allocation2] sm:$0xff] }
   0xb   :  { %v61_v6 = vld [vmem:[%s558_s2] sm:$0xff]  ;;  %352 = vmatmul.msk.f32.vlgmr.msra.gmra.mxu1 %vm65_vm1, %v57_v5  ;;  %358 = vmatmul.msk.f32.vlgmr.msra.gmra.mxu3 %vm65_vm1, %v57_v5 }
   0xc   :  { %v214_v8 = vld [vmem:[#allocation2 + $0x38] sm:$0xff]  ;;  %355 = vmatmul.msk.f32.vlgmr.msra.gmra.mxu2 %vm65_vm1, %v61_v6 }
   0xd   :  { %318 = vmatpush.msrb.mxu3 %v214_v8  ;;  %v215_v14 = vld [vmem:[%s566_s10] sm:$0xff]  ;;  %296 = vmatpush.msrb.mxu2 %v211_v12 }
   0xe   :  { %217 = vst [vmem:[#allocation1] ss:$2 sm:$0xff] %v215_v14  ;;  %v210_v16 = vld [vmem:[#allocation2 + $0x18] sm:$0xff] }
   0xf   :  { %319 = vmatpush.msrb.mxu3 %v212_v13  ;;  %297 = vmatpush.msrb.mxu2 %v209_v15  ;;  %v373_v21 = vld [vmem:[%s561_s5] ss:$0 sm:$0xff] }
  0x10   :  { %v374_v26 = vld [vmem:[%s564_s8] ss:$0 sm:$0xff] }
  0x11   :  { %320 = vmatpush.msrb.mxu3 %v210_v16  ;;  %298 = vmatpush.msrb.mxu2 %v207_v17  ;;  %v329_v43 = vld [vmem:[%s567_s11] sm:$0x3] }
  0x12   :  { %350 = vmatmul.msk.f32.gmra.mxu0 %vm65_vm1, %v60_v9  ;;  %v331_v45 = vperm.slane %v329_v43, 0  ;;  %v332_v47 = vperm.slane %v329_v43, 1 }
  0x13   :  { %353 = vmatmul.msk.f32.gmra.mxu1 %vm65_vm1, %v58_v10  ;;  %359 = vmatmul.msk.f32.gmra.mxu3 %vm65_vm1, %v58_v10 }
  0x14   :  { %356 = vmatmul.msk.f32.gmra.mxu2 %vm65_vm1, %v62_v11  ;;  %321 = vmatpush.msrb.mxu3 %v208_v18 }
  0x15   :  { %v218_v19 = vld.sshfl [vmem:[#allocation1] sm:$0xff pattern:$0x75316420]  ;;  %v219_v20 = vld.sshfl [vmem:[#allocation1 + $0x8] sm:$0xff pattern:$0x75316420] }
  0x16   :  { %360 = vmatpush.msk.msrb.mxu0 %vm72_vm0, %v218_v19  ;;  %363 = vmatpush.msk.msrb.mxu1 %vm72_vm0, %v219_v20 }
  0x87   :  { %v93_v22 = vpop.f32.mrf.mxu0 }
  0x88   :  { %v125_v23 = vpop.f32.mrf.mxu1 }
  0x89   :  { %v126_v24 = vadd.f32 %v125_v23, %v93_v22 }
  0x8b   :  { %v135_v25 = vadd.f32 %v373_v21, %v126_v24 }
  0x8d   :  { %375 = vtanh.f32 %v135_v25 }
  0x8e   :  { %v193_v28 = vpop.f32.mrf.mxu3 }
  0x8f   :  { %v167_v27 = vpop.f32.mrf.mxu2  ;;  %v96_v30 = vpop.f32.mrf.mxu0 }
  0x90   :  { %v194_v29 = vadd.f32 %v193_v28, %v167_v27  ;;  %v128_v31 = vpop.f32.mrf.mxu1 }
  0x91   :  { %v129_v32 = vadd.f32 %v128_v31, %v96_v30 }
  0x92   :  { %v203_v33 = vadd.f32 %v374_v26, %v194_v29 }
  0x93   :  { %v376_v34 = vpop.eup %375  ;;  %v136_v35 = vadd.f32 %v373_v21, %v129_v32 }
  0x94   :  { %377 = vtanh.f32 %v203_v33  ;;  %366 = vmatmul.msk.f32.vlgmr.msrb.gmra.mxu2 %vm276_vm2, %v376_v34  ;;  %368 = vmatmul.msk.f32.vlgmr.msrb.gmra.mxu3 %vm276_vm2, %v376_v34 }
  0x95   :  { %379 = vtanh.f32 %v136_v35 }
  0x96   :  { %v196_v37 = vpop.f32.mrf.mxu3 }
  0x97   :  { %v170_v36 = vpop.f32.mrf.mxu2 }
  0x98   :  { %v197_v38 = vadd.f32 %v196_v37, %v170_v36 }
  0x9a   :  { %v378_v39 = vpop.eup %377  ;;  %v204_v40 = vadd.f32 %v374_v26, %v197_v38 }
  0x9b   :  { %v380_v41 = vpop.eup %379  ;;  %361 = vmatmul.msk.f32.vlgmr.msrb.gmra.mxu0 %vm65_vm1, %v378_v39  ;;  %364 = vmatmul.msk.f32.vlgmr.msrb.gmra.mxu1 %vm65_vm1, %v378_v39 }
  0x9c   :  { %381 = vtanh.f32 %v204_v40  ;;  %367 = vmatmul.msk.f32.gmra.mxu2 %vm276_vm2, %v380_v41  ;;  %369 = vmatmul.msk.f32.gmra.mxu3 %vm276_vm2, %v380_v41 }
  0xa2   :  { %v382_v42 = vpop.eup %381 }
  0xa3   :  { %362 = vmatmul.msk.f32.gmra.mxu0 %vm65_vm1, %v382_v42  ;;  %365 = vmatmul.msk.f32.gmra.mxu1 %vm65_vm1, %v382_v42 }
 0x117   :  { %v300_v44 = vpop.f32.mrf.mxu2  ;;  %v323_v46 = vpop.f32.mrf.mxu3 }
 0x118   :  { %v247_v48 = vpop.f32.mrf.mxu0  ;;  %v270_v49 = vpop.f32.mrf.mxu1 }
 0x119   :  { %v301_v50 = vadd.f32 %v300_v44, %v247_v48  ;;  %v324_v51 = vadd.f32 %v323_v46, %v270_v49 }
 0x11b   :  { %v335_v52 = vadd.f32 %v331_v45, %v301_v50  ;;  %v336_v53 = vadd.f32 %v332_v47, %v324_v51 }
 0x11d   :  { %339 = vst [vmem:[%s568_s12] sm:$0xff] %v335_v52 }
 0x11e   :  { %340 = vst [vmem:[%s568_s12 + $0x8] sm:$0xff] %v336_v53 }
 0x11f   :  { %v303_v54 = vpop.f32.mrf.mxu2  ;;  %v326_v55 = vpop.f32.mrf.mxu3 }
 0x120   :  { %v250_v56 = vpop.f32.mrf.mxu0  ;;  %v273_v57 = vpop.f32.mrf.mxu1 }
 0x121   :  { %v304_v58 = vadd.f32 %v303_v54, %v250_v56  ;;  %v327_v59 = vadd.f32 %v326_v55, %v273_v57 }
 0x123   :  { %v337_v60 = vadd.f32 %v331_v45, %v304_v58  ;;  %v338_v61 = vadd.f32 %v332_v47, %v327_v59 }
 0x125   :  { %341 = vst [vmem:[%s568_s12 + $0x10] sm:$0xff] %v337_v60 }
 0x126   :  { %342 = vst [vmem:[%s568_s12 + $0x18] sm:$0xff] %v338_v61 }
 0x127   :  { %347 = vsyncpa [#allocation3], 1 }

// kernel: ucitr_linear_forward.9
= control target key start
LH: loop header
LB: loop body
LE: loop exit
PB: predicated region body
PF: predicated region fallthrough
CT: control target
= control target key end

     0   :  { %vm18_vm0 = vcmask 517120   ;;  %v70_v2 = vmov 0.0   ;;  %vm26_vm1 = vcmask 261120   ;;  %s115_s1 = inlined_call_operand.vmem [shape: f32[32,64], index: 1, kind: input, shape index: {}]   ;;  %s116_s2 = inlined_call_operand.vmem [shape: f32[1,64], index: 2, kind: input, shape index: {}]   ;;  %s117_s0 = inlined_call_operand.vmem [shape: f32[2,32], index: 0, kind: input, shape index: {}]   ;;  %s118_s3 = inlined_call_operand.vmem [shape: f32[2,64], index: 3, kind: output, shape index: {}]  }
   0x1   :  { %v25_v0 = vld [vmem:[%s115_s1 + $0x18] sm:$0xff]  ;;  %v24_v1 = vld [vmem:[%s115_s1 + $0x10] sm:$0xff]  ;;  %19 = vst.msk [vmem:[#allocation2] sm:$0x3] %vm18_vm0, %v70_v2  ;;  %v23_v3 = vld [vmem:[%s115_s1 + $0x8] sm:$0xff] }
   0x2   :  { %42 = vmatpush.msra.mxu0 %v25_v0  ;;  %v22_v4 = vld [vmem:[%s115_s1] sm:$0xff] }
   0x3   :  { %v21_v5 = vld [vmem:[%s117_s0] sm:$0x3] }
   0x4   :  { %43 = vmatpush.msra.mxu0 %v24_v1  ;;  %v69_v9 = vld [vmem:[%s116_s2] ss:$0 sm:$0xff] }
   0x6   :  { %44 = vmatpush.msra.mxu0 %v23_v3 }
   0x8   :  { %45 = vmatpush.msra.mxu0 %v22_v4  ;;  %v20_v6 = vld [vmem:[#allocation2] sm:$0x3] }
   0x9   :  { %67 = vmatmul.msk.f32.vlgmr.msra.gmra.mxu0 %vm26_vm1, %v21_v5 }
  0x86   :  { %v47_v7 = vpop.f32.mrf.mxu0 }
  0x87   :  { %v50_v8 = vadd.f32 %v47_v7, %v20_v6 }
  0x89   :  { %52 = vst.msk [vmem:[#allocation2] sm:$0x3] %vm18_vm0, %v50_v8 }
  0x90   :  { %v56_v10 = vld [vmem:[#allocation2] sm:$0x3] }
  0x91   :  { %v61_v11 = vadd.f32 %v69_v9, %v56_v10 }
  0x93   :  { %62 = vst.msk [vmem:[%s118_s3] sm:$0x3] %vm18_vm0, %v61_v11 }

// kernel: ucitr_linear_forward.8
= control target key start
LH: loop header
LB: loop body
LE: loop exit
PB: predicated region body
PF: predicated region fallthrough
CT: control target
= control target key end

     0   :  { %vm145_vm0 = vcmask 1043456   ;;  %vm142_vm1 = vcmask 293888   ;;  %vm18_vm2 = vcmask 254976   ;;  %s649_s1 = inlined_call_operand.vmem [shape: f32[804,32], index: 1, kind: input, shape index: {}]   ;;  %s650_s0 = inlined_call_operand.vmem [shape: f32[2,804], index: 0, kind: input, shape index: {}]   ;;  %s651_s2 = inlined_call_operand.vmem [shape: f32[1,32], index: 2, kind: input, shape index: {}]   ;;  %s652_s3 = inlined_call_operand.vmem [shape: f32[2,32], index: 3, kind: output, shape index: {}]  }
   0x1   :  { %v38_v0 = vld [vmem:[%s649_s1 + $0x78] sm:$0xff]  ;;  %v37_v1 = vld [vmem:[%s649_s1 + $0x70] sm:$0xff]  ;;  %v36_v4 = vld [vmem:[%s649_s1 + $0x68] sm:$0xff] }
   0x2   :  { %v54_v2 = vld [vmem:[%s649_s1 + $0xf8] sm:$0xff]  ;;  %149 = vmatpush.msra.mxu0 %v38_v0  ;;  %v53_v3 = vld [vmem:[%s649_s1 + $0xf0] sm:$0xff]  ;;  %v52_v5 = vld [vmem:[%s649_s1 + $0xe8] sm:$0xff] }
   0x3   :  { %169 = vmatpush.msra.mxu1 %v54_v2  ;;  %v35_v6 = vld [vmem:[%s649_s1 + $0x60] sm:$0xff]  ;;  %v34_v8 = vld [vmem:[%s649_s1 + $0x58] sm:$0xff]  ;;  %v69_v11 = vld [vmem:[%s649_s1 + $0x170] sm:$0xff] }
   0x4   :  { %150 = vmatpush.msra.mxu0 %v37_v1  ;;  %v51_v7 = vld [vmem:[%s649_s1 + $0xe0] sm:$0xff]  ;;  %v50_v9 = vld [vmem:[%s649_s1 + $0xd8] sm:$0xff]  ;;  %v33_v13 = vld [vmem:[%s649_s1 + $0x50] sm:$0xff] }
   0x5   :  { %170 = vmatpush.msra.mxu1 %v53_v3  ;;  %v70_v10 = vld [vmem:[%s649_s1 + $0x178] sm:$0xff]  ;;  %v49_v14 = vld [vmem:[%s649_s1 + $0xd0] sm:$0xff]  ;;  %v68_v15 = vld [vmem:[%s649_s1 + $0x168] sm:$0xff] }
   0x6   :  { %151 = vmatpush.msra.mxu0 %v36_v4  ;;  %v86_v12 = vld [vmem:[%s649_s1 + $0x1f8] sm:$0xff]  ;;  %189 = vmatpush.msra.mxu2 %v70_v10  ;;  %v85_v16 = vld [vmem:[%s649_s1 + $0x1f0] sm:$0xff]  ;;  %v32_v17 = vld [vmem:[%s649_s1 + $0x48] sm:$0xff] }
   0x7   :  { %171 = vmatpush.msra.mxu1 %v52_v5  ;;  %209 = vmatpush.msra.mxu3 %v86_v12  ;;  %v48_v18 = vld [vmem:[%s649_s1 + $0xc8] sm:$0xff]  ;;  %v67_v20 = vld [vmem:[%s649_s1 + $0x160] sm:$0xff]  ;;  %v66_v24 = vld [vmem:[%s649_s1 + $0x158] sm:$0xff] }
   0x8   :  { %152 = vmatpush.msra.mxu0 %v35_v6  ;;  %190 = vmatpush.msra.mxu2 %v69_v11  ;;  %v84_v19 = vld [vmem:[%s649_s1 + $0x1e8] sm:$0xff]  ;;  %v83_v21 = vld [vmem:[%s649_s1 + $0x1e0] sm:$0xff]  ;;  %v82_v25 = vld [vmem:[%s649_s1 + $0x1d8] sm:$0xff] }
   0x9   :  { %172 = vmatpush.msra.mxu1 %v51_v7  ;;  %210 = vmatpush.msra.mxu3 %v85_v16  ;;  %v31_v22 = vld [vmem:[%s649_s1 + $0x40] sm:$0xff]  ;;  %v30_v26 = vld [vmem:[%s649_s1 + $0x38] sm:$0xff]  ;;  %v65_v28 = vld [vmem:[%s649_s1 + $0x150] sm:$0xff] }
   0xa   :  { %153 = vmatpush.msra.mxu0 %v34_v8  ;;  %v47_v23 = vld [vmem:[%s649_s1 + $0xc0] sm:$0xff]  ;;  %191 = vmatpush.msra.mxu2 %v68_v15  ;;  %v46_v27 = vld [vmem:[%s649_s1 + $0xb8] sm:$0xff]  ;;  %v81_v29 = vld [vmem:[%s649_s1 + $0x1d0] sm:$0xff] }
   0xb   :  { %173 = vmatpush.msra.mxu1 %v50_v9  ;;  %211 = vmatpush.msra.mxu3 %v84_v19  ;;  %v29_v30 = vld [vmem:[%s649_s1 + $0x30] sm:$0xff]  ;;  %v64_v32 = vld [vmem:[%s649_s1 + $0x148] sm:$0xff]  ;;  %v63_v36 = vld [vmem:[%s649_s1 + $0x140] sm:$0xff] }
   0xc   :  { %154 = vmatpush.msra.mxu0 %v33_v13  ;;  %192 = vmatpush.msra.mxu2 %v67_v20  ;;  %v45_v31 = vld [vmem:[%s649_s1 + $0xb0] sm:$0xff]  ;;  %v80_v33 = vld [vmem:[%s649_s1 + $0x1c8] sm:$0xff]  ;;  %v79_v37 = vld [vmem:[%s649_s1 + $0x1c0] sm:$0xff] }
   0xd   :  { %174 = vmatpush.msra.mxu1 %v49_v14  ;;  %212 = vmatpush.msra.mxu3 %v83_v21  ;;  %v28_v34 = vld [vmem:[%s649_s1 + $0x28] sm:$0xff]  ;;  %v27_v38 = vld [vmem:[%s649_s1 + $0x20] sm:$0xff]  ;;  %v62_v40 = vld [vmem:[%s649_s1 + $0x138] sm:$0xff] }
   0xe   :  { %155 = vmatpush.msra.mxu0 %v32_v17  ;;  %193 = vmatpush.msra.mxu2 %v66_v24  ;;  %v44_v35 = vld [vmem:[%s649_s1 + $0xa8] sm:$0xff]  ;;  %v43_v39 = vld [vmem:[%s649_s1 + $0xa0] sm:$0xff]  ;;  %v78_v41 = vld [vmem:[%s649_s1 + $0x1b8] sm:$0xff] }
   0xf   :  { %175 = vmatpush.msra.mxu1 %v48_v18  ;;  %213 = vmatpush.msra.mxu3 %v82_v25  ;;  %v26_v42 = vld [vmem:[%s649_s1 + $0x18] sm:$0xff]  ;;  %v61_v44 = vld [vmem:[%s649_s1 + $0x130] sm:$0xff]  ;;  %v60_v48 = vld [vmem:[%s649_s1 + $0x128] sm:$0xff] }
  0x10   :  { %156 = vmatpush.msra.mxu0 %v31_v22  ;;  %194 = vmatpush.msra.mxu2 %v65_v28  ;;  %v42_v43 = vld [vmem:[%s649_s1 + $0x98] sm:$0xff]  ;;  %v77_v45 = vld [vmem:[%s649_s1 + $0x1b0] sm:$0xff]  ;;  %v76_v49 = vld [vmem:[%s649_s1 + $0x1a8] sm:$0xff] }
  0x11   :  { %176 = vmatpush.msra.mxu1 %v47_v23  ;;  %214 = vmatpush.msra.mxu3 %v81_v29  ;;  %v25_v46 = vld [vmem:[%s649_s1 + $0x10] sm:$0xff]  ;;  %v24_v50 = vld [vmem:[%s649_s1 + $0x8] sm:$0xff]  ;;  %v59_v52 = vld [vmem:[%s649_s1 + $0x120] sm:$0xff] }
  0x12   :  { %157 = vmatpush.msra.mxu0 %v30_v26  ;;  %195 = vmatpush.msra.mxu2 %v64_v32  ;;  %v41_v47 = vld [vmem:[%s649_s1 + $0x90] sm:$0xff]  ;;  %v40_v51 = vld [vmem:[%s649_s1 + $0x88] sm:$0xff]  ;;  %v75_v53 = vld [vmem:[%s649_s1 + $0x1a0] sm:$0xff] }
  0x13   :  { %177 = vmatpush.msra.mxu1 %v46_v27  ;;  %215 = vmatpush.msra.mxu3 %v80_v33  ;;  %v21_v54 = vld [vmem:[%s650_s0] sm:$0xff]  ;;  %v22_v55 = vld [vmem:[%s650_s0 + $0x8] sm:$0x3f]  ;;  %v102_v58 = vld [vmem:[%s649_s1 + $0x278] sm:$0xff] }
  0x14   :  { %158 = vmatpush.msra.mxu0 %v29_v30  ;;  %196 = vmatpush.msra.mxu2 %v63_v36  ;;  %v23_v56 = vld [vmem:[%s649_s1] sm:$0xff]  ;;  %126 = vst [vmem:[#allocation1] ss:$4 sm:$0xff] %v21_v54  ;;  %v118_v59 = vld [vmem:[%s649_s1 + $0x2f8] sm:$0xff]  ;;  %v101_v62 = vld [vmem:[%s649_s1 + $0x270] sm:$0xff] }
  0x15   :  { %178 = vmatpush.msra.mxu1 %v45_v31  ;;  %216 = vmatpush.msra.mxu3 %v79_v37  ;;  %v39_v57 = vld [vmem:[%s649_s1 + $0x80] sm:$0xff]  ;;  %128 = vst [vmem:[#allocation1 + $0x20] ss:$4 sm:$0xff] %v22_v55  ;;  %v58_v60 = vld [vmem:[%s649_s1 + $0x118] sm:$0xff]  ;;  %v117_v63 = vld [vmem:[%s649_s1 + $0x2f0] sm:$0xff] }
  0x16   :  { %159 = vmatpush.msra.mxu0 %v28_v34  ;;  %197 = vmatpush.msra.mxu2 %v62_v40  ;;  %v74_v61 = vld [vmem:[%s649_s1 + $0x198] sm:$0xff]  ;;  %v57_v0 = vld [vmem:[%s649_s1 + $0x110] sm:$0xff]  ;;  %v100_v2 = vld [vmem:[%s649_s1 + $0x268] sm:$0xff] }
  0x17   :  { %179 = vmatpush.msra.mxu1 %v44_v35  ;;  %217 = vmatpush.msra.mxu3 %v78_v41  ;;  %v73_v1 = vld [vmem:[%s649_s1 + $0x190] sm:$0xff]  ;;  %v116_v3 = vld [vmem:[%s649_s1 + $0x2e8] sm:$0xff]  ;;  %v99_v6 = vld [vmem:[%s649_s1 + $0x260] sm:$0xff] }
  0x18   :  { %160 = vmatpush.msra.mxu0 %v27_v38  ;;  %198 = vmatpush.msra.mxu2 %v61_v44  ;;  %v56_v4 = vld [vmem:[%s649_s1 + $0x108] sm:$0xff]  ;;  %v115_v7 = vld [vmem:[%s649_s1 + $0x2e0] sm:$0xff]  ;;  %v98_v10 = vld [vmem:[%s649_s1 + $0x258] sm:$0xff] }
  0x19   :  { %180 = vmatpush.msra.mxu1 %v43_v39  ;;  %218 = vmatpush.msra.mxu3 %v77_v45  ;;  %v72_v5 = vld [vmem:[%s649_s1 + $0x188] sm:$0xff]  ;;  %v55_v8 = vld [vmem:[%s649_s1 + $0x100] sm:$0xff]  ;;  %v114_v11 = vld [vmem:[%s649_s1 + $0x2d8] sm:$0xff] }
  0x1a   :  { %161 = vmatpush.msra.mxu0 %v26_v42  ;;  %199 = vmatpush.msra.mxu2 %v60_v48  ;;  %v71_v9 = vld [vmem:[%s649_s1 + $0x180] sm:$0xff]  ;;  %v97_v14 = vld [vmem:[%s649_s1 + $0x250] sm:$0xff]  ;;  %v96_v18 = vld [vmem:[%s649_s1 + $0x248] sm:$0xff] }
  0x1b   :  { %181 = vmatpush.msra.mxu1 %v42_v43  ;;  %219 = vmatpush.msra.mxu3 %v76_v49  ;;  %v131_v12 = vld.sshfl [vmem:[#allocation1 + $0x10] sm:$0xff pattern:$0x73625140]  ;;  %v132_v13 = vld.sshfl [vmem:[#allocation1 + $0x18] sm:$0xff pattern:$0x73625140] }
  0x1c   :  { %162 = vmatpush.msra.mxu0 %v25_v46  ;;  %200 = vmatpush.msra.mxu2 %v59_v52  ;;  %v113_v15 = vld [vmem:[%s649_s1 + $0x2d0] sm:$0xff]  ;;  %v123_v16 = vld [vmem:[%s649_s1 + $0x320] sm:$0xf]  ;;  %v112_v19 = vld [vmem:[%s649_s1 + $0x2c8] sm:$0xff]  ;;  %v310_v46 = vmov 0.0  }
  0x1d   :  { %182 = vmatpush.msra.mxu1 %v41_v47  ;;  %220 = vmatpush.msra.mxu3 %v75_v53  ;;  %v129_v17 = vld.sshfl [vmem:[#allocation1] sm:$0xff pattern:$0x73625140]  ;;  %v122_v20 = vld [vmem:[%s649_s1 + $0x318] sm:$0xff]  ;;  %v121_v24 = vld [vmem:[%s649_s1 + $0x310] sm:$0xff] }
  0x1e   :  { %163 = vmatpush.msra.mxu0 %v24_v50  ;;  %201 = vmatpush.msra.mxu2 %v58_v60  ;;  %v130_v21 = vld.sshfl [vmem:[#allocation1 + $0x8] sm:$0xff pattern:$0x73625140]  ;;  %v95_v22 = vld [vmem:[%s649_s1 + $0x240] sm:$0xff]  ;;  %v94_v25 = vld [vmem:[%s649_s1 + $0x238] sm:$0xff] }
  0x1f   :  { %183 = vmatpush.msra.mxu1 %v40_v51  ;;  %221 = vmatpush.msra.mxu3 %v74_v61  ;;  %v111_v23 = vld [vmem:[%s649_s1 + $0x2c0] sm:$0xff]  ;;  %v110_v26 = vld [vmem:[%s649_s1 + $0x2b8] sm:$0xff]  ;;  %v120_v27 = vld [vmem:[%s649_s1 + $0x308] sm:$0xff]  ;;  %19 = vst.msk [vmem:[#allocation2] sm:$0x3] %vm18_vm2, %v310_v46 }
  0x20   :  { %164 = vmatpush.msra.mxu0 %v23_v56  ;;  %202 = vmatpush.msra.mxu2 %v57_v0  ;;  %v93_v28 = vld [vmem:[%s649_s1 + $0x230] sm:$0xff]  ;;  %v119_v30 = vld [vmem:[%s649_s1 + $0x300] sm:$0xff]  ;;  %v92_v31 = vld [vmem:[%s649_s1 + $0x228] sm:$0xff] }
  0x21   :  { %184 = vmatpush.msra.mxu1 %v39_v57  ;;  %222 = vmatpush.msra.mxu3 %v73_v1  ;;  %v109_v29 = vld [vmem:[%s649_s1 + $0x2b0] sm:$0xff]  ;;  %v108_v32 = vld [vmem:[%s649_s1 + $0x2a8] sm:$0xff]  ;;  %v91_v34 = vld [vmem:[%s649_s1 + $0x220] sm:$0xff] }
  0x22   :  { %229 = vmatpush.msrb.mxu0 %v102_v58  ;;  %203 = vmatpush.msra.mxu2 %v56_v4  ;;  %v135_v33 = vld.sshfl [vmem:[#allocation1 + $0x30] sm:$0xff pattern:$0x73625140]  ;;  %v107_v35 = vld [vmem:[%s649_s1 + $0x2a0] sm:$0xff]  ;;  %v90_v36 = vld [vmem:[%s649_s1 + $0x218] sm:$0xff] }
  0x23   :  { %249 = vmatpush.msrb.mxu1 %v118_v59  ;;  %223 = vmatpush.msra.mxu3 %v72_v5  ;;  %v106_v37 = vld [vmem:[%s649_s1 + $0x298] sm:$0xff]  ;;  %v89_v38 = vld [vmem:[%s649_s1 + $0x210] sm:$0xff]  ;;  %v88_v40 = vld [vmem:[%s649_s1 + $0x208] sm:$0xff] }
  0x24   :  { %230 = vmatpush.msrb.mxu0 %v101_v62  ;;  %204 = vmatpush.msra.mxu2 %v55_v8  ;;  %v105_v39 = vld [vmem:[%s649_s1 + $0x290] sm:$0xff]  ;;  %v104_v41 = vld [vmem:[%s649_s1 + $0x288] sm:$0xff]  ;;  %v87_v42 = vld [vmem:[%s649_s1 + $0x200] sm:$0xff] }
  0x25   :  { %250 = vmatpush.msrb.mxu1 %v117_v63  ;;  %224 = vmatpush.msra.mxu3 %v71_v9  ;;  %v103_v43 = vld [vmem:[%s649_s1 + $0x280] sm:$0xff]  ;;  %v134_v45 = vld.sshfl [vmem:[#allocation1 + $0x28] sm:$0xff pattern:$0x73625140] }
  0x26   :  { %231 = vmatpush.msrb.mxu0 %v100_v2  ;;  %205 = vmatmul.f32.vlgmr.msra.gmra.mxu2 %v131_v12  ;;  %v133_v44 = vld.sshfl [vmem:[#allocation1 + $0x20] sm:$0xff pattern:$0x73625140]  ;;  %v20_v59 = vld [vmem:[#allocation2] sm:$0x3] }
  0x27   :  { %251 = vmatpush.msrb.mxu1 %v116_v3  ;;  %225 = vmatmul.f32.vlgmr.msra.gmra.mxu3 %v132_v13  ;;  %v309_v62 = vld [vmem:[%s651_s2] ss:$0 sm:$0xff] }
  0x28   :  { %232 = vmatpush.msrb.mxu0 %v99_v6  ;;  %306 = vmatpush.msk.msrb.mxu2 %vm145_vm0, %v123_v16 }
  0x29   :  { %252 = vmatpush.msrb.mxu1 %v115_v7  ;;  %165 = vmatmul.f32.vlgmr.msra.gmra.mxu0 %v129_v17 }
  0x2a   :  { %233 = vmatpush.msrb.mxu0 %v98_v10  ;;  %281 = vmatpush.msrb.mxu2 %v122_v20 }
  0x2b   :  { %253 = vmatpush.msrb.mxu1 %v114_v11 }
  0x2c   :  { %234 = vmatpush.msrb.mxu0 %v97_v14  ;;  %185 = vmatmul.f32.vlgmr.msra.gmra.mxu1 %v130_v21 }
  0x2d   :  { %254 = vmatpush.msrb.mxu1 %v113_v15  ;;  %282 = vmatpush.msrb.mxu2 %v121_v24 }
  0x2e   :  { %235 = vmatpush.msrb.mxu0 %v96_v18 }
  0x2f   :  { %255 = vmatpush.msrb.mxu1 %v112_v19  ;;  %283 = vmatpush.msrb.mxu2 %v120_v27 }
  0x30   :  { %236 = vmatpush.msrb.mxu0 %v95_v22 }
  0x31   :  { %256 = vmatpush.msrb.mxu1 %v111_v23  ;;  %284 = vmatpush.msrb.mxu2 %v119_v30 }
  0x32   :  { %237 = vmatpush.msrb.mxu0 %v94_v25  ;;  %307 = vmatmul.msk.f32.vlgmr.msrb.gmra.mxu2 %vm142_vm1, %v135_v33 }
  0x33   :  { %257 = vmatpush.msrb.mxu1 %v110_v26 }
  0x34   :  { %238 = vmatpush.msrb.mxu0 %v93_v28 }
  0x35   :  { %258 = vmatpush.msrb.mxu1 %v109_v29 }
  0x36   :  { %239 = vmatpush.msrb.mxu0 %v92_v31 }
  0x37   :  { %259 = vmatpush.msrb.mxu1 %v108_v32 }
  0x38   :  { %240 = vmatpush.msrb.mxu0 %v91_v34 }
  0x39   :  { %260 = vmatpush.msrb.mxu1 %v107_v35 }
  0x3a   :  { %241 = vmatpush.msrb.mxu0 %v90_v36 }
  0x3b   :  { %261 = vmatpush.msrb.mxu1 %v106_v37 }
  0x3c   :  { %242 = vmatpush.msrb.mxu0 %v89_v38 }
  0x3d   :  { %262 = vmatpush.msrb.mxu1 %v105_v39 }
  0x3e   :  { %243 = vmatpush.msrb.mxu0 %v88_v40 }
  0x3f   :  { %263 = vmatpush.msrb.mxu1 %v104_v41 }
  0x40   :  { %244 = vmatpush.msrb.mxu0 %v87_v42 }
  0x41   :  { %264 = vmatpush.msrb.mxu1 %v103_v43  ;;  %245 = vmatmul.f32.vlgmr.msrb.gmra.mxu0 %v133_v44 }
  0x42   :  { %265 = vmatmul.f32.vlgmr.msrb.gmra.mxu1 %v134_v45 }
  0xa6   :  { %v166_v47 = vpop.f32.mrf.mxu0 }
  0xa9   :  { %v186_v48 = vpop.f32.mrf.mxu1  ;;  %v206_v50 = vpop.f32.mrf.mxu2 }
  0xaa   :  { %v187_v49 = vadd.f32 %v186_v48, %v166_v47  ;;  %v226_v52 = vpop.f32.mrf.mxu3 }
  0xac   :  { %v207_v51 = vadd.f32 %v206_v50, %v187_v49 }
  0xae   :  { %v227_v53 = vadd.f32 %v226_v52, %v207_v51 }
  0xb5   :  { %v286_v57 = vpop.f32.mrf.mxu2 }
  0xbe   :  { %v246_v54 = vpop.f32.mrf.mxu0 }
  0xbf   :  { %v266_v55 = vpop.f32.mrf.mxu1  ;;  %v247_v56 = vadd.f32 %v246_v54, %v227_v53 }
  0xc1   :  { %v267_v58 = vadd.f32 %v266_v55, %v247_v56 }
  0xc3   :  { %v287_v60 = vadd.f32 %v286_v57, %v267_v58 }
  0xc5   :  { %v289_v61 = vadd.f32 %v287_v60, %v20_v59 }
  0xc7   :  { %291 = vst.msk [vmem:[#allocation2] sm:$0x3] %vm18_vm2, %v289_v61 }
  0xce   :  { %v295_v63 = vld [vmem:[#allocation2] sm:$0x3] }
  0xcf   :  { %v300_v0 = vadd.f32 %v309_v62, %v295_v63 }
  0xd1   :  { %301 = vst.msk [vmem:[%s652_s3] sm:$0x3] %vm18_vm2, %v300_v0 }

// kernel: ucitr_linear_forward.7
= control target key start
LH: loop header
LB: loop body
LE: loop exit
PB: predicated region body
PF: predicated region fallthrough
CT: control target
= control target key end

     0   :  { %8 = vsyncpa [#allocation3], 0  ;;  %s1145_s12 = smov 0   ;;  %s1485_s0 = inlined_call_operand.vmem [shape: f32[2,6,256], index: 0, kind: input, shape index: {}]   ;;  %s1486_s1 = inlined_call_operand.vmem [shape: f32[39,6], index: 1, kind: input, shape index: {}]   ;;  %s1487_s2 = inlined_call_operand.vmem [shape: f32[3], index: 2, kind: input, shape index: {}]   ;;  %s1488_s3 = inlined_call_operand.vmem [shape: f32[2,1,804], index: 3, kind: output, shape index: {}]  }
   0x1 LB: > { %s975_s13 = sadd.s32 4294967295, %s1085_s12   ;;  %p977_p0 = scmp.ge.s32.totalorder %s1085_s12, 1  ;;  %s1085_s12 = sphi %s1145_s12, %s14_s12  }
   0x2   : > { %p113_p1 = scmp.lt.s32.totalorder %s1085_s12, 3  ;;  %s128_s16 = sshll.u32 %s1487_s2, 4  ;;  %s129_s16 = int_to_ptr.vmem [resolvable:$true] %s128_s16 }
   0x3   : > { %p1012_p3 = scmp.eq.s32.totalorder %s975_s13, 0  ;;  %s1087_s17 = smov [#allocation2]  }
   0x4   : > { %p114_p2 = pnand %p977_p0, %p113_p1 }
   0x6   : > { %p1008_p4 = pneg %p114_p2  ;;  %149 = sbr.rel (%p114_p2) target bundleno = 677 (0x2a5), region = 32 }
   0x8   : > { %p1009_p5 = pnand %p1012_p3, %p1008_p4 }
   0xa   : > { %1011 = dma.vmem_to_smem (!%p1009_p5), %s129_s16, 16, %s1087_s17, [#allocation3]  }
   0xb   : > { %1080 = dma.done.wait (%p1012_p3), [#allocation3], 16  }
   0xc   : > { %1082 = vsyncadd (%p1012_p3), [#allocation3], 4294967280 }
   0xd   : > { %156 = sfence }
   0xe   : > { %p174_p6 = scmp.lt.s32.totalorder %s975_s13, 1  ;;  %vm206_vm0 = vcmask 1045504   ;;  %v185_v0 = vld [vmem:[%s1486_s1] sm:$0xff]  ;;  %vm190_vm1 = vcmask 48128   ;;  %v186_v3 = vld [vmem:[%s1486_s1 + $0x8] sm:$0xff]  ;;  %v187_v4 = vld [vmem:[%s1486_s1 + $0x10] sm:$0xff]  ;;  %v277_v5 = vlaneseq }
   0xf   : > { %v1088_v6 = vmov 0.0   ;;  %vm286_vm3 = vcmask 1040384   ;;  %s1089_s5 = smov 1   ;;  %s1090_s6 = smov 2   ;;  %v188_v19 = vld [vmem:[%s1486_s1 + $0x18] sm:$0xff]  ;;  %vm301_vm5 = vcmask 7168  }
  0x10   : > { %s1502_s13 = smov (!%p174_p6, %s975_s13), 1  ;;  %vm279_vm2 = vcmp.lt.s32.totalorder %v277_v5, 804  ;;  %vm290_vm4 = vcmp.lt.s32.totalorder %v277_v5, 256  ;;  %s1091_s7 = smov 3   ;;  %vm1192_vm6 = vcmp.ge.s32.totalorder %v277_v5, 1  ;;  %vm306_vm7 = vcmp.lt.s32.totalorder %v277_v5, 257 }
  0x11   : > { %s1000_s18 = sshll.u32 %s1502_s13, 4  ;;  %s1003_s28 = smul.u32 7, %s1502_s13  ;;  %vm307_vm8 = vmand %vm1192_vm6, %vm306_vm7  ;;  %vm317_vm9 = vcmask 15360   ;;  %vm321_vm10 = vcmp.ge.s32.totalorder %v277_v5, 2  ;;  %vm322_vm11 = vcmp.lt.s32.totalorder %v277_v5, 258  ;;  %vm333_vm13 = vcmask 23552  }
  0x12   : > { %s178_s21 = scalar_lea.vmem %s1485_s0, %s1000_s18  ;;  %s1092_s8 = smov 4   ;;  %vm323_vm12 = vmand %vm321_vm10, %vm322_vm11  ;;  %v189_v48 = vld [vmem:[%s1486_s1 + $0x20] sm:$0x7f]  ;;  %vm1218_vm14 = vcmp.ge.s32.totalorder %v277_v5, 3  ;;  %vm338_vm15 = vcmp.lt.s32.totalorder %v277_v5, 259  ;;  %vm383_vm7 = vcmask 39936  }
  0x13   : > { %v183_v1 = vld [vmem:[%s178_s21] sm:$0x3f]  ;;  %v184_v2 = vld [vmem:[%s178_s21 + $0x8] sm:$0x3f]  ;;  %s1177_s4 = scalar_lea.vmem %s1488_s3, %s1003_s28  ;;  %s1093_s9 = smov 5   ;;  %vm402_vm11 = vcmp.ge.s32.totalorder %v277_v5, 6 }
  0x14   : > { %984 = vmatpush.msk.msra.mxu0 %vm206_vm0, %v183_v1  ;;  %990 = vmatpush.msk.msra.mxu1 %vm206_vm0, %v184_v2  ;;  %281 = vst.msk [vmem:[%s1177_s4] sm:$0x7f] %vm279_vm2, %v1088_v6  ;;  %s1094_s13 = smov 6   ;;  %s1095_s14 = smov 7   ;;  %vm1237_vm2 = vcmp.ge.s32.totalorder %v277_v5, 4 }
  0x15   : > { %985 = vmatmul.msk.f32.vlgmr.msra.gmra.mxu0 %vm190_vm1, %v185_v0  ;;  %991 = vmatmul.msk.f32.vlgmr.msra.gmra.mxu1 %vm190_vm1, %v185_v0  ;;  %s1096_s15 = smov 8   ;;  %s1097_s16 = smov 9  }
  0x16   : > { %1001 = vmatpush.msk.msra.mxu2 %vm206_vm0, %v183_v1  ;;  %1002 = vmatpush.msk.msra.mxu3 %vm206_vm0, %v184_v2  ;;  %s1098_s17 = smov 10   ;;  %s1099_s18 = smov 11   ;;  %vm339_vm0 = vmand %vm1218_vm14, %vm338_vm15  ;;  %vm414_vm14 = vcmask 56320   ;;  %vm418_vm15 = vcmp.ge.s32.totalorder %v277_v5, 7 }
  0x17   : > { %988 = vmatmul.msk.f32.vlgmr.msra.gmra.mxu2 %vm190_vm1, %v188_v19  ;;  %994 = vmatmul.msk.f32.vlgmr.msra.gmra.mxu3 %vm190_vm1, %v188_v19  ;;  %s1100_s19 = smov 12   ;;  %s1101_s20 = smov 13  }
  0x18   : > { %s1102_s21 = smov 14   ;;  %s1103_s22 = smov 15  }
  0x19   : > { %s1104_s25 = smov 16   ;;  %s1105_s26 = smov 17  }
  0x1a   : > { %s358_s27 = sld [smem:[#allocation2]]  ;;  %s1106_s28 = smov 18  }
  0x1b   : > { %v282_v9 = vld [vmem:[%s1177_s4] sm:$0x3]  ;;  %s1107_s29 = smov 19   ;;  %s1108_s30 = smov 20  }
  0x1c   : > { %s1114_s10 = smov 27   ;;  %s1115_s11 = smov 25  }
  0x1d   : > { %986 = vmatmul.msk.f32.gmra.mxu0 %vm190_vm1, %v186_v3  ;;  %992 = vmatmul.msk.f32.gmra.mxu1 %vm190_vm1, %v186_v3  ;;  %s997_s23 = sld [smem:[#allocation2 + $0x2]] }
  0x1f   : > { %989 = vmatmul.msk.f32.gmra.mxu2 %vm190_vm1, %v189_v48  ;;  %995 = vmatmul.msk.f32.gmra.mxu3 %vm190_vm1, %v189_v48 }
  0x20   : > { %v359_v1 = vstv %s358_s27 }
  0x25   : > { %987 = vmatmul.msk.f32.gmra.mxu0 %vm190_vm1, %v187_v4  ;;  %993 = vmatmul.msk.f32.gmra.mxu1 %vm190_vm1, %v187_v4 }
  0x92   : > { %v230_v7 = vpop.f32.mrf.mxu0  ;;  %v262_v8 = vpop.f32.mrf.mxu1 }
  0x93   : > { %294 = vst [vmem:[#allocation1] sm:$0xff] %v230_v7  ;;  %v285_v10 = vrot.slane %v262_v8, 7 }
  0x94   : > { %295 = vst [vmem:[#allocation1 + $0x9] sm:$0xff] %v262_v8 }
  0x95   : > { %v287_v11 = vsel %vm286_vm3, %v230_v7, %v285_v10 }
  0x96   : > { %v289_v12 = vadd.f32 %v287_v11, %v282_v9 }
  0x98   : > { %292 = vst.msk [vmem:[%s1177_s4] sm:$0x3] %vm290_vm4, %v289_v12  ;;  %vm1242_vm4 = vcmp.lt.s32.totalorder %v277_v5, 260 }
  0x99   : > { %vm355_vm6 = vmand %vm1237_vm2, %vm1242_vm4 }
  0x9a   : > { %v233_v20 = vpop.f32.mrf.mxu0  ;;  %v265_v21 = vpop.f32.mrf.mxu1 }
  0x9b   : > { %v297_v13 = vld [vmem:[#allocation1 + $0x1] ss:$9 sm:$0xff]  ;;  %v409_v23 = vrot.slane %v265_v21, 7  ;;  %v1281_v19 = vpop.f32.mrf.mxu2 }
  0x9c   : > { %310 = vst [vmem:[#allocation1] sm:$0xff] %v230_v7  ;;  %298 = vrot.lane.b32.xlu0 %v297_v13, %s1089_s5  ;;  %s1109_s5 = smov 21  }
  0x9d   : > { %311 = vst [vmem:[#allocation1 + $0x9] sm:$0xff] %v262_v8  ;;  %v410_v24 = vsel %vm286_vm3, %v233_v20, %v409_v23 }
  0x9f   : > { %v293_v37 = vld [vmem:[%s1177_s4] sm:$0x7] }
  0xa2   : > { %v1197_v33 = vpop.f32.mrf.mxu0  ;;  %v1199_v35 = vpop.f32.mrf.mxu1 }
  0xa3   : > { %v543_v51 = vrot.slane %v1199_v35, 7 }
  0xa4   : > { %v313_v14 = vld [vmem:[#allocation1 + $0x2] ss:$9 sm:$0xff] }
  0xa5   : > { %326 = vst [vmem:[#allocation1] sm:$0xff] %v230_v7  ;;  %314 = vrot.lane.b32.xlu0 %v313_v14, %s1090_s6  ;;  %v544_v54 = vsel %vm286_vm3, %v1197_v33, %v543_v51  ;;  %s1110_s6 = smov 23  }
  0xa6   : > { %327 = vst [vmem:[#allocation1 + $0x9] sm:$0xff] %v262_v8 }
  0xad   : > { %v329_v15 = vld [vmem:[#allocation1 + $0x3] ss:$9 sm:$0xff] }
  0xae   : > { %342 = vst [vmem:[#allocation1] sm:$0xff] %v230_v7  ;;  %330 = vrot.lane.b32.xlu1 %v329_v15, %s1091_s7  ;;  %s1111_s7 = smov 24  }
  0xaf   : > { %343 = vst [vmem:[#allocation1 + $0x9] sm:$0xff] %v262_v8 }
  0xb6   : > { %v345_v16 = vld [vmem:[#allocation1 + $0x4] ss:$9 sm:$0xff] }
  0xb7   : > { %364 = vst [vmem:[#allocation1] sm:$0xff] %v230_v7  ;;  %346 = vrot.lane.b32.xlu1 %v345_v16, %s1092_s8 }
  0xb8   : > { %365 = vst [vmem:[#allocation1 + $0x9] sm:$0xff] %v262_v8 }
  0xbf   : > { %v367_v17 = vld [vmem:[#allocation1 + $0x5] ss:$9 sm:$0xff]  ;;  %411 = vrot.lane.b32.xlu1 %v410_v24, %s1095_s14  ;;  %s1117_s14 = smov 29  }
  0xc0   : > { %376 = vst [vmem:[#allocation1] sm:$0xff] %v230_v7  ;;  %368 = vrot.lane.b32.xlu2 %v367_v17, %s1092_s8  ;;  %s1112_s8 = smov 26  }
  0xc1   : > { %377 = vst [vmem:[#allocation1 + $0x9] sm:$0xff] %v262_v8 }
  0xc8   : > { %v379_v18 = vld [vmem:[#allocation1 + $0x6] ss:$9 sm:$0xff] }
  0xc9   : > { %392 = vst [vmem:[#allocation1] sm:$0xff] %v230_v7  ;;  %380 = vrot.lane.b32.xlu2 %v379_v18, %s1093_s9  ;;  %s1113_s9 = smov 22  }
  0xca   : > { %393 = vst [vmem:[#allocation1 + $0x9] sm:$0xff] %v262_v8 }
  0xd1   : > { %v395_v22 = vld [vmem:[#allocation1 + $0x7] ss:$9 sm:$0xff] }
  0xd2   : > { %423 = vst [vmem:[#allocation1] sm:$0xff] %v233_v20  ;;  %396 = vrot.lane.b32.xlu0 %v395_v22, %s1094_s13  ;;  %s1116_s13 = smov 28  }
  0xd3   : > { %424 = vst [vmem:[#allocation1 + $0x9] sm:$0xff] %v265_v21 }
  0xda   : > { %v426_v25 = vld [vmem:[#allocation1 + $0x1] ss:$9 sm:$0xff] }
  0xdb   : > { %439 = vst [vmem:[#allocation1] sm:$0xff] %v233_v20  ;;  %427 = vrot.lane.b32.xlu2 %v426_v25, %s1096_s15  ;;  %s996_s15 = sld [smem:[#allocation2 + $0x1]] }
  0xdc   : > { %440 = vst [vmem:[#allocation1 + $0x9] sm:$0xff] %v265_v21 }
  0xe3   : > { %v442_v26 = vld [vmem:[#allocation1 + $0x2] ss:$9 sm:$0xff] }
  0xe4   : > { %455 = vst [vmem:[#allocation1] sm:$0xff] %v233_v20  ;;  %443 = vrot.lane.b32.xlu0 %v442_v26, %s1097_s16  ;;  %s1118_s16 = smov 31  }
  0xe5   : > { %456 = vst [vmem:[#allocation1 + $0x9] sm:$0xff] %v265_v21 }
  0xec   : > { %v458_v27 = vld [vmem:[#allocation1 + $0x3] ss:$9 sm:$0xff] }
  0xed   : > { %471 = vst [vmem:[#allocation1] sm:$0xff] %v233_v20  ;;  %459 = vrot.lane.b32.xlu1 %v458_v27, %s1098_s17  ;;  %s1119_s17 = smov 32  }
  0xee   : > { %472 = vst [vmem:[#allocation1 + $0x9] sm:$0xff] %v265_v21 }
  0xf5   : > { %v474_v28 = vld [vmem:[#allocation1 + $0x4] ss:$9 sm:$0xff] }
  0xf6   : > { %487 = vst [vmem:[#allocation1] sm:$0xff] %v233_v20  ;;  %475 = vrot.lane.b32.xlu2 %v474_v28, %s1099_s18  ;;  %s1120_s18 = smov 30  }
  0xf7   : > { %488 = vst [vmem:[#allocation1 + $0x9] sm:$0xff] %v265_v21 }
  0xfe   : > { %v490_v29 = vld [vmem:[#allocation1 + $0x5] ss:$9 sm:$0xff] }
  0xff   : > { %503 = vst [vmem:[#allocation1] sm:$0xff] %v233_v20  ;;  %491 = vrot.lane.b32.xlu0 %v490_v29, %s1100_s19  ;;  %s1121_s19 = smov 34  }
 0x100   : > { %504 = vst [vmem:[#allocation1 + $0x9] sm:$0xff] %v265_v21 }
 0x107   : > { %v506_v30 = vld [vmem:[#allocation1 + $0x6] ss:$9 sm:$0xff]  ;;  %545 = vrot.lane.b32.xlu0 %v544_v54, %s1102_s21 }
 0x108   : > { %519 = vst [vmem:[#allocation1] sm:$0xff] %v233_v20  ;;  %507 = vrot.lane.b32.xlu1 %v506_v30, %s1101_s20  ;;  %v1283_v20 = vpop.f32.mrf.mxu3  ;;  %s1122_s20 = smov 33  }
 0x109   : > { %520 = vst [vmem:[#allocation1 + $0x9] sm:$0xff] %v265_v21 }
 0x10e   : > { %v299_v32 = vpop.permute.xlu0 %298 }
 0x10f   : > { %v300_v34 = vrot.slane %v299_v32, 7 }
 0x110   : > { %v522_v36 = vld [vmem:[#allocation1 + $0x7] ss:$9 sm:$0xff] }
 0x111   : > { %523 = vrot.lane.b32.xlu2 %v522_v36, %s1102_s21  ;;  %v302_v38 = vsel %vm301_vm5, %v300_v34, %v299_v32  ;;  %553 = vst [vmem:[#allocation1] sm:$0xff] %v1197_v33  ;;  %vm349_vm5 = vcmask 31744   ;;  %s1123_s21 = smov 35  }
 0x112   : > { %v304_v39 = vadd.f32 %v302_v38, %v293_v37  ;;  %554 = vst [vmem:[#allocation1 + $0x9] sm:$0xff] %v1199_v35 }
 0x114   : > { %308 = vst.msk [vmem:[%s1177_s4] sm:$0x7] %vm307_vm8, %v304_v39  ;;  %vm387_vm8 = vcmp.ge.s32.totalorder %v277_v5, 5 }
 0x117   : > { %v315_v40 = vpop.permute.xlu0 %314 }
 0x118   : > { %v316_v41 = vrot.slane %v315_v40, 7 }
 0x119   : > { %v556_v42 = vld [vmem:[#allocation1 + $0x1] ss:$9 sm:$0xff] }
 0x11a   : > { %569 = vst [vmem:[#allocation1] sm:$0xff] %v1197_v33  ;;  %557 = vrot.lane.b32.xlu1 %v556_v42, %s1103_s22  ;;  %v318_v44 = vsel %vm317_vm9, %v316_v41, %v315_v40  ;;  %v369_v4 = vpop.permute.xlu2 %368  ;;  %vm388_vm9 = vcmp.lt.s32.totalorder %v277_v5, 261  ;;  %s1124_s22 = smov 36  }
 0x11b   : > { %v309_v43 = vld [vmem:[%s1177_s4] sm:$0x7]  ;;  %570 = vst [vmem:[#allocation1 + $0x9] sm:$0xff] %v1199_v35  ;;  %v370_v7 = vrot.slane %v369_v4, 7  ;;  %vm389_vm10 = vmand %vm387_vm8, %vm388_vm9  ;;  %vm446_vm8 = vcmask 72704   ;;  %vm450_vm9 = vcmp.ge.s32.totalorder %v277_v5, 9 }
 0x11c   : > { %v320_v45 = vadd.f32 %v318_v44, %v309_v43 }
 0x11d   : > { %v371_v8 = vsel %vm349_vm5, %v370_v7, %v369_v4 }
 0x11e   : > { %324 = vst.msk [vmem:[%s1177_s4] sm:$0x7] %vm323_vm12, %v320_v45  ;;  %vm403_vm12 = vcmp.lt.s32.totalorder %v277_v5, 262  ;;  %v667_v45 = vrot.slane %v1283_v20, 7 }
 0x120   : > { %v331_v46 = vpop.permute.xlu1 %330 }
 0x121   : > { %v332_v47 = vrot.slane %v331_v46, 7 }
 0x122   : > { %v572_v49 = vld [vmem:[#allocation1 + $0x2] ss:$9 sm:$0xff] }
 0x123   : > { %585 = vst [vmem:[#allocation1] sm:$0xff] %v1197_v33  ;;  %573 = vrot.lane.b32.xlu2 %v572_v49, %s1104_s25  ;;  %v334_v53 = vsel %vm333_vm13, %v332_v47, %v331_v46  ;;  %v381_v12 = vpop.permute.xlu2 %380  ;;  %vm404_vm13 = vmand %vm402_vm11, %vm403_vm12  ;;  %v668_v46 = vsel %vm286_vm3, %v1281_v19, %v667_v45  ;;  %vm462_vm12 = vcmask 80896  }
 0x124   : > { %586 = vst [vmem:[#allocation1 + $0x9] sm:$0xff] %v1199_v35  ;;  %v382_v13 = vrot.slane %v381_v12, 7 }
 0x125   : > { %v325_v52 = vld [vmem:[%s1177_s4] sm:$0x7] }
 0x126   : > { %v336_v55 = vadd.f32 %v334_v53, %v325_v52  ;;  %v384_v14 = vsel %vm383_vm7, %v382_v13, %v381_v12  ;;  %v1347_v12 = vpop.f32.mrf.mxu3 }
 0x128   : > { %340 = vst.msk [vmem:[%s1177_s4] sm:$0x7] %vm339_vm0, %v336_v55  ;;  %vm419_vm0 = vcmp.lt.s32.totalorder %v277_v5, 263 }
 0x129   : > { %v347_v56 = vpop.permute.xlu1 %346 }
 0x12a   : > { %v348_v58 = vrot.slane %v347_v56, 7 }
 0x12b   : > { %v588_v57 = vld [vmem:[#allocation1 + $0x3] ss:$9 sm:$0xff] }
 0x12c   : > { %601 = vst [vmem:[#allocation1] sm:$0xff] %v1197_v33  ;;  %589 = vrot.lane.b32.xlu0 %v588_v57, %s1105_s26  ;;  %v350_v62 = vsel %vm349_vm5, %v348_v58, %v347_v56  ;;  %vm434_vm5 = vcmp.ge.s32.totalorder %v277_v5, 8 }
 0x12d   : > { %602 = vst [vmem:[#allocation1 + $0x9] sm:$0xff] %v1199_v35 }
 0x12f   : > { %v341_v61 = vld [vmem:[%s1177_s4] sm:$0x7] }
 0x130   : > { %v352_v63 = vadd.f32 %v350_v62, %v341_v61 }
 0x131   : > { %v412_v26 = vpop.permute.xlu1 %411 }
 0x132   : > { %356 = vst.msk [vmem:[%s1177_s4] sm:$0x7] %vm355_vm6, %v352_v63  ;;  %v413_v27 = vrot.slane %v412_v26, 7 }
 0x134   : > { %v604_v0 = vld [vmem:[#allocation1 + $0x4] ss:$9 sm:$0xff]  ;;  %v415_v29 = vsel %vm414_vm14, %v413_v27, %v412_v26  ;;  %vm467_vm14 = vcmp.lt.s32.totalorder %v277_v5, 266 }
 0x135   : > { %617 = vst [vmem:[#allocation1] sm:$0xff] %v1197_v33  ;;  %605 = vrot.lane.b32.xlu1 %v604_v0, %s1106_s28  ;;  %v428_v32 = vpop.permute.xlu2 %427 }
 0x136   : > { %618 = vst [vmem:[#allocation1 + $0x9] sm:$0xff] %v1199_v35 }
 0x139   : > { %v357_v2 = vld [vmem:[%s1177_s4] sm:$0x7] }
 0x13a   : > { %v360_v3 = vadd.f32 %v359_v1, %v357_v2 }
 0x13c   : > { %362 = vst.msk [vmem:[%s1177_s4] sm:$0x7] %vm1242_vm4, %v360_v3  ;;  %vm420_vm4 = vmand %vm418_vm15, %vm419_vm0  ;;  %vm478_vm0 = vcmask 89088  }
 0x13d   : > { %v620_v6 = vld [vmem:[#allocation1 + $0x5] ss:$9 sm:$0xff] }
 0x13e   : > { %633 = vst [vmem:[#allocation1] sm:$0xff] %v1197_v33  ;;  %621 = vrot.lane.b32.xlu2 %v620_v6, %s1107_s29 }
 0x13f   : > { %634 = vst [vmem:[#allocation1 + $0x9] sm:$0xff] %v1199_v35 }
 0x143   : > { %v363_v9 = vld [vmem:[%s1177_s4 + $0x2] sm:$0x7] }
 0x144   : > { %v373_v10 = vadd.f32 %v371_v8, %v363_v9  ;;  %v397_v18 = vpop.permute.xlu0 %396 }
 0x145   : > { %v398_v21 = vrot.slane %v397_v18, 7 }
 0x146   : > { %v636_v11 = vld [vmem:[#allocation1 + $0x6] ss:$9 sm:$0xff]  ;;  %374 = vst.msk [vmem:[%s1177_s4 + $0x2] sm:$0x7] %vm355_vm6, %v373_v10  ;;  %vm435_vm6 = vcmp.lt.s32.totalorder %v277_v5, 264  ;;  %669 = vrot.lane.b32.xlu2 %v668_v46, %s1113_s9 }
 0x147   : > { %649 = vst [vmem:[#allocation1] sm:$0xff] %v1197_v33  ;;  %637 = vrot.lane.b32.xlu0 %v636_v11, %s1108_s30  ;;  %v399_v23 = vsel %vm190_vm1, %v398_v21, %v397_v18  ;;  %v429_v33 = vrot.slane %v428_v32, 7  ;;  %vm430_vm1 = vcmask 64512   ;;  %vm436_vm7 = vmand %vm434_vm5, %vm435_vm6  ;;  %vm494_vm6 = vcmask 97280   ;;  %v1345_v11 = vpop.f32.mrf.mxu2 }
 0x148   : > { %650 = vst [vmem:[#allocation1 + $0x9] sm:$0xff] %v1199_v35 }
 0x149   : > { %v431_v34 = vsel %vm430_vm1, %v429_v33, %v428_v32  ;;  %vm483_vm1 = vcmp.lt.s32.totalorder %v277_v5, 267 }
 0x14d   : > { %v375_v15 = vld [vmem:[%s1177_s4 + $0x2] sm:$0x7] }
 0x14e   : > { %v386_v16 = vadd.f32 %v384_v14, %v375_v15 }
 0x14f   : > { %v652_v17 = vld [vmem:[#allocation1 + $0x7] ss:$9 sm:$0xff] }
 0x150   : > { %390 = vst.msk [vmem:[%s1177_s4 + $0x2] sm:$0x7] %vm389_vm10, %v386_v16  ;;  %653 = vrot.lane.b32.xlu1 %v652_v17, %s1109_s5  ;;  %vm451_vm10 = vcmp.lt.s32.totalorder %v277_v5, 265  ;;  %v476_v52 = vpop.permute.xlu2 %475  ;;  %v536_v17 = vstv %s996_s15 }
 0x151   : > { %681 = vst [vmem:[#allocation1] sm:$0xff] %v1281_v19  ;;  %vm452_vm11 = vmand %vm450_vm9, %vm451_vm10  ;;  %v477_v53 = vrot.slane %v476_v52, 7  ;;  %vm510_vm10 = vcmask 105472  }
 0x152   : > { %682 = vst [vmem:[#allocation1 + $0x9] sm:$0xff] %v1283_v20 }
 0x153   : > { %v479_v54 = vsel %vm478_vm0, %v477_v53, %v476_v52  ;;  %vm526_vm0 = vcmask 113664  }
 0x156   : > { %v444_v38 = vpop.permute.xlu0 %443 }
 0x157   : > { %v391_v22 = vld [vmem:[%s1177_s4 + $0x2] sm:$0x7]  ;;  %v445_v39 = vrot.slane %v444_v38, 7 }
 0x158   : > { %v401_v24 = vadd.f32 %v399_v23, %v391_v22 }
 0x159   : > { %v684_v25 = vld [vmem:[#allocation1 + $0x1] ss:$9 sm:$0xff]  ;;  %v447_v41 = vsel %vm446_vm8, %v445_v39, %v444_v38  ;;  %vm499_vm8 = vcmp.lt.s32.totalorder %v277_v5, 268 }
 0x15a   : > { %405 = vst.msk [vmem:[%s1177_s4 + $0x2] sm:$0x7] %vm404_vm13, %v401_v24  ;;  %685 = vrot.lane.b32.xlu0 %v684_v25, %s1110_s6  ;;  %vm466_vm13 = vcmp.ge.s32.totalorder %v277_v5, 10 }
 0x15b   : > { %698 = vst [vmem:[#allocation1 + $0x9] sm:$0xff] %v1283_v20  ;;  %vm468_vm15 = vmand %vm466_vm13, %vm467_vm14  ;;  %vm1336_vm14 = vcmp.ge.s32.totalorder %v277_v5, 14 }
 0x15c   : > { %697 = vst [vmem:[#allocation1] sm:$0xff] %v1281_v19 }
 0x15f   : > { %v460_v44 = vpop.permute.xlu1 %459 }
 0x160   : > { %v461_v47 = vrot.slane %v460_v44, 7 }
 0x161   : > { %v406_v28 = vld [vmem:[%s1177_s4 + $0x2] sm:$0x7] }
 0x162   : > { %v417_v30 = vadd.f32 %v415_v29, %v406_v28  ;;  %v463_v49 = vsel %vm462_vm12, %v461_v47, %v460_v44  ;;  %vm515_vm12 = vcmp.lt.s32.totalorder %v277_v5, 269  ;;  %v795_v28 = vrot.slane %v1347_v12, 7 }
 0x163   : > { %v700_v31 = vld [vmem:[#allocation1 + $0x2] ss:$9 sm:$0xff] }
 0x164   : > { %421 = vst.msk [vmem:[%s1177_s4 + $0x2] sm:$0x7] %vm420_vm4, %v417_v30  ;;  %701 = vrot.lane.b32.xlu1 %v700_v31, %s1111_s7  ;;  %vm482_vm4 = vcmp.ge.s32.totalorder %v277_v5, 11  ;;  %v796_v31 = vsel %vm286_vm3, %v1345_v11, %v795_v28  ;;  %vm581_vm3 = vcmp.lt.s32.totalorder %v277_v5, 272 }
 0x165   : > { %713 = vst [vmem:[#allocation1] sm:$0xff] %v1281_v19  ;;  %vm484_vm5 = vmand %vm482_vm4, %vm483_vm1 }
 0x166   : > { %714 = vst [vmem:[#allocation1 + $0x9] sm:$0xff] %v1283_v20 }
 0x16b   : > { %v422_v35 = vld [vmem:[%s1177_s4 + $0x2] sm:$0x7]  ;;  %v524_v7 = vpop.permute.xlu2 %523 }
 0x16c   : > { %v433_v36 = vadd.f32 %v431_v34, %v422_v35  ;;  %v525_v8 = vrot.slane %v524_v7, 7 }
 0x16d   : > { %v716_v37 = vld [vmem:[#allocation1 + $0x3] ss:$9 sm:$0xff] }
 0x16e   : > { %437 = vst.msk [vmem:[%s1177_s4 + $0x2] sm:$0x7] %vm436_vm7, %v433_v36  ;;  %717 = vrot.lane.b32.xlu2 %v716_v37, %s1115_s11  ;;  %vm498_vm7 = vcmp.ge.s32.totalorder %v277_v5, 12  ;;  %v527_v13 = vsel %vm526_vm0, %v525_v8, %v524_v7 }
 0x16f   : > { %729 = vst [vmem:[#allocation1] sm:$0xff] %v1281_v19  ;;  %vm500_vm9 = vmand %vm498_vm7, %vm499_vm8  ;;  %vm576_vm8 = vcmask 130048  }
 0x170   : > { %730 = vst [vmem:[#allocation1 + $0x9] sm:$0xff] %v1283_v20 }
 0x171   : > { %v492_v58 = vpop.permute.xlu0 %491 }
 0x172   : > { %v493_v60 = vrot.slane %v492_v58, 7 }
 0x174   : > { %v495_v62 = vsel %vm494_vm6, %v493_v60, %v492_v58  ;;  %vm565_vm6 = vcmp.lt.s32.totalorder %v277_v5, 271 }
 0x175   : > { %v438_v40 = vld [vmem:[%s1177_s4 + $0x2] sm:$0x7] }
 0x176   : > { %v449_v42 = vadd.f32 %v447_v41, %v438_v40 }
 0x177   : > { %v732_v43 = vld [vmem:[#allocation1 + $0x4] ss:$9 sm:$0xff] }
 0x178   : > { %453 = vst.msk [vmem:[%s1177_s4 + $0x2] sm:$0x7] %vm452_vm11, %v449_v42  ;;  %733 = vrot.lane.b32.xlu0 %v732_v43, %s1112_s8  ;;  %vm514_vm11 = vcmp.ge.s32.totalorder %v277_v5, 13 }
 0x179   : > { %745 = vst [vmem:[#allocation1] sm:$0xff] %v1281_v19  ;;  %vm516_vm13 = vmand %vm514_vm11, %vm515_vm12  ;;  %vm592_vm11 = vcmask 138240   ;;  %vm596_vm12 = vcmp.ge.s32.totalorder %v277_v5, 17 }
 0x17a   : > { %746 = vst [vmem:[#allocation1 + $0x9] sm:$0xff] %v1283_v20  ;;  %v508_v1 = vpop.permute.xlu1 %507 }
 0x17b   : > { %v509_v2 = vrot.slane %v508_v1, 7 }
 0x17d   : > { %v511_v4 = vsel %vm510_vm10, %v509_v2, %v508_v1  ;;  %v574_v34 = vpop.permute.xlu2 %573 }
 0x17e   : > { %v575_v35 = vrot.slane %v574_v34, 7 }
 0x17f   : > { %v454_v48 = vld [vmem:[%s1177_s4 + $0x2] sm:$0x7] }
 0x180   : > { %v465_v50 = vadd.f32 %v463_v49, %v454_v48  ;;  %v577_v36 = vsel %vm576_vm8, %v575_v35, %v574_v34 }
 0x181   : > { %v748_v51 = vld [vmem:[#allocation1 + $0x5] ss:$9 sm:$0xff] }
 0x182   : > { %469 = vst.msk [vmem:[%s1177_s4 + $0x2] sm:$0x7] %vm468_vm15, %v465_v50  ;;  %749 = vrot.lane.b32.xlu1 %v748_v51, %s1114_s10  ;;  %vm1341_vm15 = vcmp.lt.s32.totalorder %v277_v5, 270 }
 0x183   : > { %761 = vst [vmem:[#allocation1] sm:$0xff] %v1281_v19  ;;  %vm532_vm4 = vmand %vm1336_vm14, %vm1341_vm15 }
 0x184   : > { %762 = vst [vmem:[#allocation1 + $0x9] sm:$0xff] %v1283_v20  ;;  %vm538_vm1 = vmand %vm1237_vm2, %vm1341_vm15  ;;  %vm560_vm2 = vcmask 121856  }
 0x189   : > { %v470_v55 = vld [vmem:[%s1177_s4 + $0x2] sm:$0x7] }
 0x18a   : > { %v481_v56 = vadd.f32 %v479_v54, %v470_v55  ;;  %797 = vrot.lane.b32.xlu1 %v796_v31, %s1120_s18 }
 0x18b   : > { %v764_v57 = vld [vmem:[#allocation1 + $0x6] ss:$9 sm:$0xff] }
 0x18c   : > { %485 = vst.msk [vmem:[%s1177_s4 + $0x2] sm:$0x7] %vm484_vm5, %v481_v56  ;;  %765 = vrot.lane.b32.xlu2 %v764_v57, %s1116_s13  ;;  %v558_v59 = vpop.permute.xlu1 %557  ;;  %vm564_vm5 = vcmp.ge.s32.totalorder %v277_v5, 15 }
 0x18d   : > { %777 = vst [vmem:[#allocation1] sm:$0xff] %v1281_v19  ;;  %v559_v27 = vrot.slane %v558_v59, 7  ;;  %vm566_vm7 = vmand %vm564_vm5, %vm565_vm6  ;;  %vm624_vm5 = vcmask 154624   ;;  %vm628_vm6 = vcmp.ge.s32.totalorder %v277_v5, 19 }
 0x18e   : > { %778 = vst [vmem:[#allocation1 + $0x9] sm:$0xff] %v1283_v20  ;;  %v546_v20 = vpop.permute.xlu0 %545 }
 0x18f   : > { %v547_v21 = vrot.slane %v546_v20, 7  ;;  %v561_v29 = vsel %vm560_vm2, %v559_v27, %v558_v59 }
 0x191   : > { %v548_v24 = vsel %vm526_vm0, %v547_v21, %v546_v20  ;;  %vm608_vm0 = vcmask 146432  }
 0x193   : > { %v486_v61 = vld [vmem:[%s1177_s4 + $0x2] sm:$0x7] }
 0x194   : > { %v497_v63 = vadd.f32 %v495_v62, %v486_v61 }
 0x195   : > { %v780_v0 = vld [vmem:[#allocation1 + $0x7] ss:$9 sm:$0xff] }
 0x196   : > { %501 = vst.msk [vmem:[%s1177_s4 + $0x2] sm:$0x7] %vm500_vm9, %v497_v63  ;;  %781 = vrot.lane.b32.xlu0 %v780_v0, %s1117_s14  ;;  %vm580_vm9 = vcmp.ge.s32.totalorder %v277_v5, 16 }
 0x197   : > { %809 = vst [vmem:[#allocation1] sm:$0xff] %v1345_v11  ;;  %vm582_vm10 = vmand %vm580_vm9, %vm581_vm3  ;;  %vm640_vm9 = vcmask 162816   ;;  %vm644_vm3 = vcmp.ge.s32.totalorder %v277_v5, 20 }
 0x198   : > { %810 = vst [vmem:[#allocation1 + $0x9] sm:$0xff] %v1347_v12  ;;  %v622_v51 = vpop.permute.xlu2 %621 }
 0x199   : > { %v623_v52 = vrot.slane %v622_v51, 7 }
 0x19b   : > { %v625_v53 = vsel %vm624_vm5, %v623_v52, %v622_v51 }
 0x19d   : > { %v502_v3 = vld [vmem:[%s1177_s4 + $0x2] sm:$0x7] }
 0x19e   : > { %v513_v6 = vadd.f32 %v511_v4, %v502_v3  ;;  %v590_v40 = vpop.permute.xlu0 %589 }
 0x19f   : > { %v812_v16 = vld [vmem:[#allocation1 + $0x1] ss:$9 sm:$0xff]  ;;  %v591_v41 = vrot.slane %v590_v40, 7 }
 0x1a0   : > { %517 = vst.msk [vmem:[%s1177_s4 + $0x2] sm:$0x7] %vm516_vm13, %v513_v6  ;;  %813 = vrot.lane.b32.xlu2 %v812_v16, %s1118_s16  ;;  %vm597_vm13 = vcmp.lt.s32.totalorder %v277_v5, 273  ;;  %v670_v3 = vpop.permute.xlu2 %669 }
 0x1a1   : > { %825 = vst [vmem:[#allocation1] sm:$0xff] %v1345_v11  ;;  %vm598_vm15 = vmand %vm596_vm12, %vm597_vm13  ;;  %v593_v43 = vsel %vm592_vm11, %v591_v41, %v590_v40  ;;  %vm656_vm12 = vcmask 171008   ;;  %vm660_vm13 = vcmp.ge.s32.totalorder %v277_v5, 21  ;;  %v671_v4 = vrot.slane %v670_v3, 7 }
 0x1a2   : > { %826 = vst [vmem:[#allocation1 + $0x9] sm:$0xff] %v1347_v12 }
 0x1a7   : > { %v518_v14 = vld [vmem:[%s1177_s4 + $0x2] sm:$0x7]  ;;  %v606_v46 = vpop.permute.xlu1 %605 }
 0x1a8   : > { %v529_v15 = vadd.f32 %v527_v13, %v518_v14  ;;  %v607_v47 = vrot.slane %v606_v46, 7 }
 0x1a9   : > { %v828_v22 = vld [vmem:[#allocation1 + $0x2] ss:$9 sm:$0xff] }
 0x1aa   : > { %533 = vst.msk [vmem:[%s1177_s4 + $0x2] sm:$0x7] %vm532_vm4, %v529_v15  ;;  %829 = vrot.lane.b32.xlu0 %v828_v22, %s1119_s17  ;;  %v609_v48 = vsel %vm608_vm0, %v607_v47, %v606_v46 }
 0x1ab   : > { %841 = vst [vmem:[#allocation1] sm:$0xff] %v1345_v11 }
 0x1ac   : > { %842 = vst [vmem:[#allocation1 + $0x9] sm:$0xff] %v1347_v12 }
 0x1b1   : > { %v534_v18 = vld [vmem:[%s1177_s4 + $0x2] sm:$0x7] }
 0x1b2   : > { %v537_v19 = vadd.f32 %v536_v17, %v534_v18 }
 0x1b3   : > { %v844_v26 = vld [vmem:[#allocation1 + $0x3] ss:$9 sm:$0xff] }
 0x1b4   : > { %539 = vst.msk [vmem:[%s1177_s4 + $0x2] sm:$0x7] %vm538_vm1, %v537_v19  ;;  %845 = vrot.lane.b32.xlu1 %v844_v26, %s1122_s20  ;;  %vm613_vm1 = vcmp.lt.s32.totalorder %v277_v5, 274 }
 0x1b5   : > { %857 = vst [vmem:[#allocation1] sm:$0xff] %v1345_v11 }
 0x1b6   : > { %858 = vst [vmem:[#allocation1 + $0x9] sm:$0xff] %v1347_v12 }
 0x1b9   : > { %v638_v56 = vpop.permute.xlu0 %637 }
 0x1ba   : > { %v639_v57 = vrot.slane %v638_v56, 7 }
 0x1bb   : > { %v540_v23 = vld [vmem:[%s1177_s4 + $0x4] sm:$0x7] }
 0x1bc   : > { %v550_v25 = vadd.f32 %v548_v24, %v540_v23  ;;  %v641_v60 = vsel %vm640_vm9, %v639_v57, %v638_v56 }
 0x1bd   : > { %v860_v33 = vld [vmem:[#allocation1 + $0x4] ss:$9 sm:$0xff] }
 0x1be   : > { %551 = vst.msk [vmem:[%s1177_s4 + $0x4] sm:$0x7] %vm532_vm4, %v550_v25  ;;  %861 = vrot.lane.b32.xlu2 %v860_v33, %s1121_s19  ;;  %vm612_vm4 = vcmp.ge.s32.totalorder %v277_v5, 18 }
 0x1bf   : > { %873 = vst [vmem:[#allocation1] sm:$0xff] %v1345_v11  ;;  %vm614_vm2 = vmand %vm612_vm4, %vm613_vm1  ;;  %vm672_vm4 = vcmask 179200   ;;  %vm676_vm1 = vcmp.ge.s32.totalorder %v277_v5, 22 }
 0x1c0   : > { %874 = vst [vmem:[#allocation1 + $0x9] sm:$0xff] %v1347_v12  ;;  %v673_v7 = vsel %vm672_vm4, %v671_v4, %v670_v3 }
 0x1c2   : > { %v654_v62 = vpop.permute.xlu1 %653 }
 0x1c3   : > { %v655_v63 = vrot.slane %v654_v62, 7 }
 0x1c5   : > { %v552_v30 = vld [vmem:[%s1177_s4 + $0x4] sm:$0x7]  ;;  %v657_v0 = vsel %vm656_vm12, %v655_v63, %v654_v62 }
 0x1c6   : > { %v563_v32 = vadd.f32 %v561_v29, %v552_v30 }
 0x1c7   : > { %v876_v39 = vld [vmem:[#allocation1 + $0x5] ss:$9 sm:$0xff] }
 0x1c8   : > { %567 = vst.msk [vmem:[%s1177_s4 + $0x4] sm:$0x7] %vm566_vm7, %v563_v32  ;;  %877 = vrot.lane.b32.xlu0 %v876_v39, %s1123_s21  ;;  %vm629_vm7 = vcmp.lt.s32.totalorder %v277_v5, 275  ;;  %v718_v20 = vpop.permute.xlu2 %717 }
 0x1c9   : > { %889 = vst [vmem:[#allocation1] sm:$0xff] %v1345_v11  ;;  %vm630_vm8 = vmand %vm628_vm6, %vm629_vm7  ;;  %vm688_vm6 = vcmask 187392   ;;  %vm692_vm7 = vcmp.ge.s32.totalorder %v277_v5, 23  ;;  %v719_v21 = vrot.slane %v718_v20, 7 }
 0x1ca   : > { %890 = vst [vmem:[#allocation1 + $0x9] sm:$0xff] %v1347_v12 }
 0x1cc   : > { %v686_v10 = vpop.permute.xlu0 %685 }
 0x1cd   : > { %v687_v11 = vrot.slane %v686_v10, 7 }
 0x1cf   : > { %v568_v37 = vld [vmem:[%s1177_s4 + $0x4] sm:$0x7]  ;;  %v689_v13 = vsel %vm688_vm6, %v687_v11, %v686_v10 }
 0x1d0   : > { %v579_v38 = vadd.f32 %v577_v36, %v568_v37 }
 0x1d1   : > { %v892_v45 = vld [vmem:[#allocation1 + $0x6] ss:$9 sm:$0xff] }
 0x1d2   : > { %583 = vst.msk [vmem:[%s1177_s4 + $0x4] sm:$0x7] %vm582_vm10, %v579_v38  ;;  %893 = vrot.lane.b32.xlu1 %v892_v45, %s1124_s22  ;;  %vm645_vm10 = vcmp.lt.s32.totalorder %v277_v5, 276 }
 0x1d3   : > { %vm646_vm11 = vmand %vm644_vm3, %vm645_vm10  ;;  %vm704_vm3 = vcmask 195584   ;;  %vm708_vm10 = vcmp.ge.s32.totalorder %v277_v5, 24 }
 0x1d6   : > { %v702_v15 = vpop.permute.xlu1 %701 }
 0x1d7   : > { %v703_v16 = vrot.slane %v702_v15, 7 }
 0x1d9   : > { %v584_v42 = vld [vmem:[%s1177_s4 + $0x4] sm:$0x7]  ;;  %v705_v18 = vsel %vm704_vm3, %v703_v16, %v702_v15 }
 0x1da   : > { %v595_v44 = vadd.f32 %v593_v43, %v584_v42 }
 0x1dc   : > { %599 = vst.msk [vmem:[%s1177_s4 + $0x4] sm:$0x7] %vm598_vm15, %v595_v44  ;;  %vm661_vm15 = vcmp.lt.s32.totalorder %v277_v5, 277 }
 0x1dd   : > { %vm662_vm0 = vmand %vm660_vm13, %vm661_vm15  ;;  %vm720_vm13 = vcmask 203776   ;;  %vm724_vm15 = vcmp.ge.s32.totalorder %v277_v5, 25 }
 0x1de   : > { %v721_v22 = vsel %vm720_vm13, %v719_v21, %v718_v20 }
 0x1e3   : > { %v600_v49 = vld [vmem:[%s1177_s4 + $0x4] sm:$0x7] }
 0x1e4   : > { %v611_v50 = vadd.f32 %v609_v48, %v600_v49 }
 0x1e6   : > { %615 = vst.msk [vmem:[%s1177_s4 + $0x4] sm:$0x7] %vm614_vm2, %v611_v50  ;;  %vm677_vm2 = vcmp.lt.s32.totalorder %v277_v5, 278  ;;  %v766_v34 = vpop.permute.xlu2 %765 }
 0x1e7   : > { %vm678_vm5 = vmand %vm676_vm1, %vm677_vm2  ;;  %vm736_vm1 = vcmask 211968   ;;  %vm740_vm2 = vcmp.ge.s32.totalorder %v277_v5, 26  ;;  %v767_v35 = vrot.slane %v766_v34, 7 }
 0x1ea   : > { %v734_v25 = vpop.permute.xlu0 %733 }
 0x1eb   : > { %v735_v59 = vrot.slane %v734_v25, 7 }
 0x1ed   : > { %v616_v54 = vld [vmem:[%s1177_s4 + $0x4] sm:$0x7]  ;;  %v737_v27 = vsel %vm736_vm1, %v735_v59, %v734_v25 }
 0x1ee   : > { %v627_v55 = vadd.f32 %v625_v53, %v616_v54 }
 0x1f0   : > { %631 = vst.msk [vmem:[%s1177_s4 + $0x4] sm:$0x7] %vm630_vm8, %v627_v55  ;;  %vm693_vm8 = vcmp.lt.s32.totalorder %v277_v5, 279 }
 0x1f1   : > { %vm694_vm9 = vmand %vm692_vm7, %vm693_vm8  ;;  %vm752_vm7 = vcmask 220160   ;;  %vm756_vm8 = vcmp.ge.s32.totalorder %v277_v5, 27 }
 0x1f4   : > { %v750_v29 = vpop.permute.xlu1 %749 }
 0x1f5   : > { %v751_v30 = vrot.slane %v750_v29, 7 }
 0x1f7   : > { %v632_v58 = vld [vmem:[%s1177_s4 + $0x4] sm:$0x7]  ;;  %v753_v32 = vsel %vm752_vm7, %v751_v30, %v750_v29 }
 0x1f8   : > { %v643_v61 = vadd.f32 %v641_v60, %v632_v58 }
 0x1fa   : > { %647 = vst.msk [vmem:[%s1177_s4 + $0x4] sm:$0x7] %vm646_vm11, %v643_v61  ;;  %vm709_vm11 = vcmp.lt.s32.totalorder %v277_v5, 280  ;;  %v814_v49 = vpop.permute.xlu2 %813 }
 0x1fb   : > { %vm710_vm12 = vmand %vm708_vm10, %vm709_vm11  ;;  %vm768_vm10 = vcmask 228352   ;;  %vm772_vm11 = vcmp.ge.s32.totalorder %v277_v5, 28  ;;  %v815_v50 = vrot.slane %v814_v49, 7 }
 0x1fc   : > { %v769_v36 = vsel %vm768_vm10, %v767_v35, %v766_v34  ;;  %v798_v44 = vpop.permute.xlu1 %797 }
 0x1fd   : > { %v799_v45 = vrot.slane %v798_v44, 7 }
 0x201   : > { %v648_v1 = vld [vmem:[%s1177_s4 + $0x4] sm:$0x7] }
 0x202   : > { %v659_v2 = vadd.f32 %v657_v0, %v648_v1 }
 0x204   : > { %663 = vst.msk [vmem:[%s1177_s4 + $0x4] sm:$0x7] %vm662_vm0, %v659_v2  ;;  %vm725_vm0 = vcmp.lt.s32.totalorder %v277_v5, 281 }
 0x205   : > { %vm726_vm4 = vmand %vm724_vm15, %vm725_vm0  ;;  %vm784_vm15 = vcmask 236544   ;;  %vm788_vm0 = vcmp.ge.s32.totalorder %v277_v5, 29 }
 0x208   : > { %v782_v39 = vpop.permute.xlu0 %781 }
 0x209   : > { %v783_v40 = vrot.slane %v782_v39, 7 }
 0x20b   : > { %v664_v6 = vld [vmem:[%s1177_s4 + $0x4] sm:$0x7]  ;;  %v785_v42 = vsel %vm784_vm15, %v783_v40, %v782_v39 }
 0x20c   : > { %v675_v8 = vadd.f32 %v673_v7, %v664_v6 }
 0x20e   : > { %679 = vst.msk [vmem:[%s1177_s4 + $0x4] sm:$0x7] %vm678_vm5, %v675_v8  ;;  %vm741_vm5 = vcmp.lt.s32.totalorder %v277_v5, 282 }
 0x20f   : > { %vm742_vm6 = vmand %vm740_vm2, %vm741_vm5  ;;  %vm800_vm2 = vcmask 244736   ;;  %vm804_vm5 = vcmp.ge.s32.totalorder %v277_v5, 30 }
 0x210   : > { %v801_v47 = vsel %vm800_vm2, %v799_v45, %v798_v44 }
 0x215   : > { %v680_v12 = vld [vmem:[%s1177_s4 + $0x4] sm:$0x7] }
 0x216   : > { %v691_v14 = vadd.f32 %v689_v13, %v680_v12 }
 0x218   : > { %695 = vst.msk [vmem:[%s1177_s4 + $0x4] sm:$0x7] %vm694_vm9, %v691_v14  ;;  %vm757_vm9 = vcmp.lt.s32.totalorder %v277_v5, 283  ;;  %v862_v1 = vpop.permute.xlu2 %861 }
 0x219   : > { %vm758_vm3 = vmand %vm756_vm8, %vm757_vm9  ;;  %vm816_vm8 = vcmask 252928   ;;  %vm820_vm9 = vcmp.ge.s32.totalorder %v277_v5, 31  ;;  %v863_v2 = vrot.slane %v862_v1, 7 }
 0x21a   : > { %v817_v51 = vsel %vm816_vm8, %v815_v50, %v814_v49 }
 0x21c   : > { %v830_v54 = vpop.permute.xlu0 %829 }
 0x21d   : > { %v831_v55 = vrot.slane %v830_v54, 7 }
 0x21f   : > { %v696_v17 = vld [vmem:[%s1177_s4 + $0x4] sm:$0x7] }
 0x220   : > { %v707_v19 = vadd.f32 %v705_v18, %v696_v17  ;;  %v906_v18 = vstv %s997_s23 }
 0x222   : > { %711 = vst.msk [vmem:[%s1177_s4 + $0x4] sm:$0x7] %vm710_vm12, %v707_v19  ;;  %vm773_vm12 = vcmp.lt.s32.totalorder %v277_v5, 284 }
 0x223   : > { %vm774_vm13 = vmand %vm772_vm11, %vm773_vm12  ;;  %vm832_vm11 = vcmask 261120   ;;  %vm836_vm12 = vcmp.ge.s32.totalorder %v277_v5, 32 }
 0x224   : > { %v833_v57 = vsel %vm832_vm11, %v831_v55, %v830_v54 }
 0x226   : > { %v846_v60 = vpop.permute.xlu1 %845 }
 0x227   : > { %v847_v61 = vrot.slane %v846_v60, 7 }
 0x229   : > { %v712_v23 = vld [vmem:[%s1177_s4 + $0x4] sm:$0x7] }
 0x22a   : > { %v723_v24 = vadd.f32 %v721_v22, %v712_v23 }
 0x22c   : > { %727 = vst.msk [vmem:[%s1177_s4 + $0x4] sm:$0x7] %vm726_vm4, %v723_v24  ;;  %vm789_vm4 = vcmp.lt.s32.totalorder %v277_v5, 285 }
 0x22d   : > { %vm790_vm1 = vmand %vm788_vm0, %vm789_vm4  ;;  %vm848_vm0 = vcmask 269312   ;;  %vm852_vm4 = vcmp.ge.s32.totalorder %v277_v5, 33 }
 0x22e   : > { %v849_v62 = vsel %vm848_vm0, %v847_v61, %v846_v60 }
 0x233   : > { %v728_v26 = vld [vmem:[%s1177_s4 + $0x4] sm:$0x7] }
 0x234   : > { %v739_v28 = vadd.f32 %v737_v27, %v728_v26 }
 0x236   : > { %743 = vst.msk [vmem:[%s1177_s4 + $0x4] sm:$0x7] %vm742_vm6, %v739_v28  ;;  %vm805_vm6 = vcmp.lt.s32.totalorder %v277_v5, 286 }
 0x237   : > { %vm806_vm7 = vmand %vm804_vm5, %vm805_vm6  ;;  %vm864_vm5 = vcmask 277504   ;;  %vm868_vm6 = vcmp.ge.s32.totalorder %v277_v5, 34 }
 0x238   : > { %v865_v3 = vsel %vm864_vm5, %v863_v2, %v862_v1 }
 0x23a   : > { %v878_v7 = vpop.permute.xlu0 %877 }
 0x23b   : > { %v879_v8 = vrot.slane %v878_v7, 7 }
 0x23d   : > { %v744_v31 = vld [vmem:[%s1177_s4 + $0x4] sm:$0x7] }
 0x23e   : > { %v755_v33 = vadd.f32 %v753_v32, %v744_v31 }
 0x240   : > { %759 = vst.msk [vmem:[%s1177_s4 + $0x4] sm:$0x7] %vm758_vm3, %v755_v33  ;;  %vm821_vm3 = vcmp.lt.s32.totalorder %v277_v5, 287 }
 0x241   : > { %vm822_vm10 = vmand %vm820_vm9, %vm821_vm3  ;;  %vm880_vm9 = vcmask 285696   ;;  %vm884_vm3 = vcmp.ge.s32.totalorder %v277_v5, 35 }
 0x242   : > { %v881_v11 = vsel %vm880_vm9, %v879_v8, %v878_v7 }
 0x244   : > { %v894_v13 = vpop.permute.xlu1 %893 }
 0x245   : > { %v895_v14 = vrot.slane %v894_v13, 7 }
 0x247   : > { %v760_v37 = vld [vmem:[%s1177_s4 + $0x4] sm:$0x7] }
 0x248   : > { %v771_v38 = vadd.f32 %v769_v36, %v760_v37 }
 0x24a   : > { %775 = vst.msk [vmem:[%s1177_s4 + $0x4] sm:$0x7] %vm774_vm13, %v771_v38  ;;  %vm837_vm13 = vcmp.lt.s32.totalorder %v277_v5, 288 }
 0x24b   : > { %vm838_vm15 = vmand %vm836_vm12, %vm837_vm13  ;;  %vm900_vm12 = vcmp.ge.s32.totalorder %v277_v5, 36  ;;  %vm901_vm13 = vcmp.lt.s32.totalorder %v277_v5, 292 }
 0x24c   : > { %vm902_vm0 = vmand %vm900_vm12, %vm901_vm13 }
 0x251   : > { %v776_v41 = vld [vmem:[%s1177_s4 + $0x4] sm:$0x7] }
 0x252   : > { %v787_v43 = vadd.f32 %v785_v42, %v776_v41 }
 0x254   : > { %791 = vst.msk [vmem:[%s1177_s4 + $0x4] sm:$0x7] %vm790_vm1, %v787_v43  ;;  %vm853_vm1 = vcmp.lt.s32.totalorder %v277_v5, 289 }
 0x255   : > { %vm854_vm2 = vmand %vm852_vm4, %vm853_vm1 }
 0x256   : > { %vm908_vm4 = vmand %vm1336_vm14, %vm901_vm13 }
 0x25b   : > { %v792_v46 = vld [vmem:[%s1177_s4 + $0x4] sm:$0x7] }
 0x25c   : > { %v803_v48 = vadd.f32 %v801_v47, %v792_v46 }
 0x25e   : > { %807 = vst.msk [vmem:[%s1177_s4 + $0x4] sm:$0x7] %vm806_vm7, %v803_v48  ;;  %vm869_vm7 = vcmp.lt.s32.totalorder %v277_v5, 290 }
 0x25f   : > { %vm870_vm8 = vmand %vm868_vm6, %vm869_vm7 }
 0x265   : > { %v808_v52 = vld [vmem:[%s1177_s4 + $0x4] sm:$0x7] }
 0x266   : > { %v819_v53 = vadd.f32 %v817_v51, %v808_v52 }
 0x268   : > { %823 = vst.msk [vmem:[%s1177_s4 + $0x4] sm:$0x7] %vm822_vm10, %v819_v53  ;;  %vm885_vm10 = vcmp.lt.s32.totalorder %v277_v5, 291 }
 0x269   : > { %vm886_vm11 = vmand %vm884_vm3, %vm885_vm10 }
 0x26f   : > { %v824_v56 = vld [vmem:[%s1177_s4 + $0x4] sm:$0x7] }
 0x270   : > { %v835_v58 = vadd.f32 %v833_v57, %v824_v56 }
 0x272   : > { %839 = vst.msk [vmem:[%s1177_s4 + $0x4] sm:$0x7] %vm838_vm15, %v835_v58  ;;  %vm896_vm15 = vcmask 293888  }
 0x273   : > { %v897_v15 = vsel %vm896_vm15, %v895_v14, %v894_v13 }
 0x279   : > { %v840_v63 = vld [vmem:[%s1177_s4 + $0x4] sm:$0x7] }
 0x27a   : > { %v851_v0 = vadd.f32 %v849_v62, %v840_v63 }
 0x27c   : > { %855 = vst.msk [vmem:[%s1177_s4 + $0x4] sm:$0x7] %vm854_vm2, %v851_v0 }
 0x283   : > { %v856_v4 = vld [vmem:[%s1177_s4 + $0x4] sm:$0x7] }
 0x284   : > { %v867_v6 = vadd.f32 %v865_v3, %v856_v4 }
 0x286   : > { %871 = vst.msk [vmem:[%s1177_s4 + $0x4] sm:$0x7] %vm870_vm8, %v867_v6 }
 0x28d   : > { %v872_v10 = vld [vmem:[%s1177_s4 + $0x4] sm:$0x7] }
 0x28e   : > { %v883_v12 = vadd.f32 %v881_v11, %v872_v10 }
 0x290   : > { %887 = vst.msk [vmem:[%s1177_s4 + $0x4] sm:$0x7] %vm886_vm11, %v883_v12 }
 0x297   : > { %v888_v16 = vld [vmem:[%s1177_s4 + $0x4] sm:$0x7] }
 0x298   : > { %v899_v17 = vadd.f32 %v897_v15, %v888_v16 }
 0x29a   : > { %903 = vst.msk [vmem:[%s1177_s4 + $0x4] sm:$0x7] %vm902_vm0, %v899_v17 }
 0x2a1   : > { %v904_v19 = vld [vmem:[%s1177_s4 + $0x4] sm:$0x7] }
 0x2a2   : > { %v907_v20 = vadd.f32 %v906_v18, %v904_v19 }
 0x2a4   : > { %909 = vst.msk [vmem:[%s1177_s4 + $0x4] sm:$0x7] %vm908_vm4, %v907_v20 }
 0x2a5 PF: > { %s14_s12 = sadd.s32 1, %s1085_s12  }
 0x2a6   : > { %p11_p7 = scmp.ge.s32.totalorder %s14_s12, 4  }
 0x2a8   :  { %13 = sbr.rel (!%p11_p7) target bundleno = 1 (0x1), region = 101 }
 0x2ad   :  { %929 = vsyncpa [#allocation3], 1 }
 0x2ae   :  { %931 = vsyncpa [#allocation3 + $0x1], 1 }

// kernel: ucitr_linear_forward.11
= control target key start
LH: loop header
LB: loop body
LE: loop exit
PB: predicated region body
PF: predicated region fallthrough
CT: control target
= control target key end

     0   :  { %vm37_vm0 = vcmask 261120   ;;  %vm130_vm1 = vcmask 1045508   ;;  %vm128_vm2 = vcmask 1041408   ;;  %vm132_vm3 = vcmask 1043456   ;;  %s245_s1 = inlined_call_operand.vmem [shape: f32[32,512], index: 1, kind: input, shape index: {}]   ;;  %s246_s0 = inlined_call_operand.vmem [shape: f32[2,32], index: 0, kind: input, shape index: {}]   ;;  %s247_s2 = inlined_call_operand.vmem [shape: f32[1,512], index: 2, kind: input, shape index: {}]   ;;  %s248_s3 = inlined_call_operand.vmem [shape: f32[2,512], index: 3, kind: output, shape index: {}]  }
   0x1   :  { %v35_v0 = vld [vmem:[%s245_s1 + $0x70] sm:$0xff]  ;;  %v36_v1 = vld [vmem:[%s245_s1 + $0x78] sm:$0xff]  ;;  %v34_v6 = vld [vmem:[%s245_s1 + $0x68] sm:$0xff] }
   0x2   :  { %v31_v2 = vld [vmem:[%s245_s1 + $0x50] sm:$0xff]  ;;  %93 = vmatpush.msra.mxu2 %v35_v0  ;;  %113 = vmatpush.msra.mxu3 %v36_v1  ;;  %v32_v3 = vld [vmem:[%s245_s1 + $0x58] sm:$0xff]  ;;  %v33_v7 = vld [vmem:[%s245_s1 + $0x60] sm:$0xff] }
   0x3   :  { %v27_v4 = vld [vmem:[%s245_s1 + $0x30] sm:$0xff]  ;;  %v28_v5 = vld [vmem:[%s245_s1 + $0x38] sm:$0xff]  ;;  %v30_v8 = vld [vmem:[%s245_s1 + $0x48] sm:$0xff]  ;;  %73 = vmatpush.msra.mxu1 %v34_v6  ;;  %53 = vmatpush.msra.mxu0 %v33_v7 }
   0x4   :  { %94 = vmatpush.msra.mxu2 %v31_v2  ;;  %114 = vmatpush.msra.mxu3 %v32_v3  ;;  %v23_v9 = vld [vmem:[%s245_s1 + $0x10] sm:$0xff]  ;;  %v24_v10 = vld [vmem:[%s245_s1 + $0x18] sm:$0xff]  ;;  %v29_v11 = vld [vmem:[%s245_s1 + $0x40] sm:$0xff] }
   0x5   :  { %v20_v12 = vld [vmem:[%s246_s0] sm:$0x3]  ;;  %74 = vmatpush.msra.mxu1 %v30_v8  ;;  %54 = vmatpush.msra.mxu0 %v29_v11  ;;  %v26_v13 = vld [vmem:[%s245_s1 + $0x28] sm:$0xff] }
   0x6   :  { %95 = vmatpush.msra.mxu2 %v27_v4  ;;  %115 = vmatpush.msra.mxu3 %v28_v5  ;;  %v25_v14 = vld [vmem:[%s245_s1 + $0x20] sm:$0xff]  ;;  %v22_v15 = vld [vmem:[%s245_s1 + $0x8] sm:$0xff] }
   0x7   :  { %v21_v16 = vld [vmem:[%s245_s1] sm:$0xff]  ;;  %75 = vmatpush.msra.mxu1 %v26_v13  ;;  %55 = vmatpush.msra.mxu0 %v25_v14 }
   0x8   :  { %96 = vmatpush.msra.mxu2 %v23_v9  ;;  %116 = vmatpush.msra.mxu3 %v24_v10  ;;  %v141_v17 = vld [vmem:[%s247_s2] sm:$0xf] }
   0x9   :  { %162 = vmatmul.msk.f32.vlgmr.msra.gmra.mxu2 %vm37_vm0, %v20_v12  ;;  %163 = vmatmul.msk.f32.vlgmr.msra.gmra.mxu3 %vm37_vm0, %v20_v12  ;;  %v144_v18 = vperm.slane %v141_v17, 1  ;;  %v145_v19 = vperm.slane %v141_v17, 2  ;;  %v146_v20 = vperm.slane %v141_v17, 3  ;;  %v143_v21 = vperm.slane %v141_v17, 0 }
   0xa   :  { %76 = vmatpush.msra.mxu1 %v22_v15  ;;  %56 = vmatpush.msra.mxu0 %v21_v16 }
   0xb   :  { %161 = vmatmul.msk.f32.vlgmr.msra.gmra.mxu1 %vm37_vm0, %v20_v12  ;;  %160 = vmatmul.msk.f32.vlgmr.msra.gmra.mxu0 %vm37_vm0, %v20_v12  ;;  %v147_v22 = vrot.slane %v144_v18, 6  ;;  %v148_v23 = vrot.slane %v145_v19, 4  ;;  %v149_v24 = vrot.slane %v146_v20, 2 }
   0xd   :  { %v150_v28 = vsel %vm128_vm2, %v143_v21, %v147_v22  ;;  %v151_v29 = vsel %vm130_vm1, %v148_v23, %v149_v24 }
   0xe   :  { %v152_v35 = vsel %vm132_vm3, %v150_v28, %v151_v29 }
  0x88   :  { %v78_v25 = vpop.f32.mrf.mxu1  ;;  %v58_v26 = vpop.f32.mrf.mxu0 }
  0x89   :  { %v125_v27 = vrot.slane %v78_v25, 6 }
  0x8b   :  { %v129_v34 = vsel %vm128_vm2, %v58_v26, %v125_v27 }
  0x8c   :  { %v98_v30 = vpop.f32.mrf.mxu2  ;;  %v118_v31 = vpop.f32.mrf.mxu3 }
  0x8d   :  { %v126_v32 = vrot.slane %v98_v30, 4  ;;  %v127_v33 = vrot.slane %v118_v31, 2 }
  0x8f   :  { %v131_v36 = vsel %vm130_vm1, %v126_v32, %v127_v33 }
  0x90   :  { %v133_v37 = vsel %vm132_vm3, %v129_v34, %v131_v36 }
  0x91   :  { %v154_v38 = vadd.f32 %v152_v35, %v133_v37 }
  0x93   :  { %155 = vst [vmem:[%s248_s3] sm:$0xff] %v154_v38 }

// kernel: ucitr_linear_forward.10
= control target key start
LH: loop header
LB: loop body
LE: loop exit
PB: predicated region body
PF: predicated region fallthrough
CT: control target
= control target key end

     0   :  { %vm26_vm0 = vcmask 64512   ;;  %vm18_vm1 = vcmask 31744   ;;  %v83_v3 = vmov 0.0   ;;  %s128_s1 = inlined_call_operand.vmem [shape: f32[8,4], index: 1, kind: input, shape index: {}]   ;;  %s129_s0 = inlined_call_operand.vmem [shape: f32[16,8], index: 0, kind: input, shape index: {}]   ;;  %s130_s2 = inlined_call_operand.vmem [shape: f32[1,4], index: 2, kind: input, shape index: {}]   ;;  %s131_s3 = inlined_call_operand.vmem [shape: f32[16,4], index: 3, kind: output, shape index: {}]  }
   0x1   :  { %v25_v0 = vld [vmem:[%s128_s1] sm:$0xff]  ;;  %v24_v2 = vld [vmem:[%s129_s0 + $0x8] sm:$0xff]  ;;  %19 = vst.msk [vmem:[#allocation2] sm:$0xff] %vm18_vm1, %v83_v3 }
   0x2   :  { %v23_v1 = vld [vmem:[%s129_s0] sm:$0xff]  ;;  %48 = vmatpush.msra.mxu0 %v25_v0  ;;  %80 = vmatpush.msra.mxu1 %v25_v0  ;;  %20 = vst.msk [vmem:[#allocation2 + $0x8] sm:$0xff] %vm18_vm1, %v83_v3 }
   0x3   :  { %78 = vmatmul.msk.f32.vlgmr.msra.gmra.mxu0 %vm26_vm0, %v23_v1  ;;  %79 = vmatmul.msk.f32.vlgmr.msra.gmra.mxu1 %vm26_vm0, %v24_v2  ;;  %v82_v10 = vld [vmem:[%s130_s2] ss:$0 sm:$0xff] }
   0x8   :  { %v21_v4 = vld [vmem:[#allocation2] sm:$0xff] }
   0x9   :  { %v22_v5 = vld [vmem:[#allocation2 + $0x8] sm:$0xff] }
  0x80   :  { %v50_v6 = vpop.f32.mrf.mxu0  ;;  %v53_v7 = vpop.f32.mrf.mxu1 }
  0x81   :  { %v56_v8 = vadd.f32 %v50_v6, %v21_v4  ;;  %v57_v9 = vadd.f32 %v53_v7, %v22_v5 }
  0x83   :  { %59 = vst.msk [vmem:[#allocation2] sm:$0xff] %vm18_vm1, %v56_v8 }
  0x84   :  { %60 = vst.msk [vmem:[#allocation2 + $0x8] sm:$0xff] %vm18_vm1, %v57_v9 }
  0x8a   :  { %v64_v11 = vld [vmem:[#allocation2] sm:$0xff] }
  0x8b   :  { %v70_v12 = vadd.f32 %v82_v10, %v64_v11  ;;  %v65_v13 = vld [vmem:[#allocation2 + $0x8] sm:$0xff] }
  0x8c   :  { %v71_v14 = vadd.f32 %v82_v10, %v65_v13 }
  0x8d   :  { %72 = vst.msk [vmem:[%s131_s3] sm:$0xff] %vm18_vm1, %v70_v12 }
  0x8e   :  { %73 = vst.msk [vmem:[%s131_s3 + $0x8] sm:$0xff] %vm18_vm1, %v71_v14 }

</bundles_post_ra>
